<compile_context>
chip_gen: v5e
topology: v5e:2x2
jax: 0.10.0
libtpu: 0.0.40
codegen_flags: <defaults>
</compile_context>

<pallas_src>
import jax
import jax.numpy as jnp
import numpy as np
from jax.experimental import pallas as pl
from jax.experimental.pallas import tpu as pltpu

_VMEM_LIMIT = 32 * 1024 * 1024  # explicit scoped-VMEM budget; safe on v5e/v6e/v7x


# ----------------------------------------------------------------------------
# Pallas kernel 1: per-batch conv-as-matmul (lane-dense output) + bias + ReLU.
#   o[b] = relu(W @ P[b] + bias),  W:(C_out, K) bf16,  P[b]:(K, S) bf16
# ----------------------------------------------------------------------------
def _conv_mm_kernel(p_ref, w_ref, b_ref, o_ref):
    acc = jnp.dot(w_ref[...], p_ref[0], preferred_element_type=jnp.float32)
    acc = jnp.maximum(acc + b_ref[...], 0.0)       # (C_out, S) + (C_out, 1)
    o_ref[0] = acc.astype(o_ref.dtype)


def conv_matmul(patches, w, b):
    """patches: (B, K, S) bf16, w: (C_out, K) bf16, b: (C_out, 1) f32
       -> (B, C_out, S) f32, post-ReLU.  Grid over batch (parallel)."""
    B, K, S = patches.shape
    c_out = w.shape[0]
    return pl.pallas_call(
        _conv_mm_kernel,
        out_shape=jax.ShapeDtypeStruct((B, c_out, S), jnp.float32),
        grid=(B,),
        in_specs=[
            pl.BlockSpec((1, K, S), lambda i: (i, 0, 0)),
            pl.BlockSpec((c_out, K), lambda i: (0, 0)),
            pl.BlockSpec((c_out, 1), lambda i: (0, 0)),
        ],
        out_specs=pl.BlockSpec((1, c_out, S), lambda i: (i, 0, 0)),
        compiler_params=pltpu.CompilerParams(
            dimension_semantics=("parallel",),
            vmem_limit_bytes=_VMEM_LIMIT),
    )(patches, w, b)


# ----------------------------------------------------------------------------
# Pallas kernel 2: fused fc1 (+ReLU) and output layer.  All weights in VMEM.
# ----------------------------------------------------------------------------
def _head_kernel(x_ref, wf_ref, bf_ref, wo_ref, bo_ref, h_ref, o_ref):
    h = jnp.dot(x_ref[...], wf_ref[...], preferred_element_type=jnp.float32)
    h = jnp.maximum(h + bf_ref[...], 0.0)          # (B, 256)
    h_ref[...] = h
    o = jnp.dot(h.astype(wo_ref.dtype), wo_ref[...],
                preferred_element_type=jnp.float32)
    o_ref[...] = o + bo_ref[...]                   # (B, A), no activation


def head_matmul(flat, wf, bf, wo, bo):
    """flat: (B, 2592) bf16, wf: (2592, 256) bf16, bf: (1, 256) f32,
       wo: (256, A) bf16, bo: (1, A) f32 -> ((B, 256) f32, (B, A) f32)."""
    B, K = flat.shape
    N1 = wf.shape[1]
    A = wo.shape[1]
    return pl.pallas_call(
        _head_kernel,
        out_shape=(jax.ShapeDtypeStruct((B, N1), jnp.float32),
                   jax.ShapeDtypeStruct((B, A), jnp.float32)),
        grid=(1,),
        in_specs=[
            pl.BlockSpec((B, K), lambda i: (0, 0)),
            pl.BlockSpec((K, N1), lambda i: (0, 0)),
            pl.BlockSpec((1, N1), lambda i: (0, 0)),
            pl.BlockSpec((N1, A), lambda i: (0, 0)),
            pl.BlockSpec((1, A), lambda i: (0, 0)),
        ],
        out_specs=(pl.BlockSpec((B, N1), lambda i: (0, 0)),
                   pl.BlockSpec((B, A), lambda i: (0, 0))),
        compiler_params=pltpu.CompilerParams(
            dimension_semantics=("arbitrary",),
            vmem_limit_bytes=_VMEM_LIMIT),
    )(flat, wf, bf, wo, bo)


# ----------------------------------------------------------------------------
# im2col glue (thin XLA): NCHW -> (B, C*KH*KW, OH*OW); K order = (C, KH, KW)
# matches PyTorch weight flattening; no big transposes.
# ----------------------------------------------------------------------------
def im2col(x, kh, kw, stride):
    B, C, H, W = x.shape
    oh = (H - kh) // stride + 1
    ow = (W - kw) // stride + 1
    cols = []
    for i in range(kh):
        for j in range(kw):
            cols.append(x[:, :, i:i + stride * oh:stride,
                          j:j + stride * ow:stride])       # (B, C, oh, ow)
    p = jnp.stack(cols, axis=2)                             # (B, C, kh*kw, oh, ow)
    p = p.reshape(B, C * kh * kw, oh * ow)                  # k = c*kh*kw + i*kw + j
    return p, oh, ow


# ----------------------------------------------------------------------------
# Parameter prep: done ONCE outside the jitted forward (no per-call transposes).
# ----------------------------------------------------------------------------
def prepare_params(params):
    w_c1, b_c1, w_c2, b_c2, w_fc1, b_fc1, w_out, b_out = params
    return {
        "w1": w_c1.reshape(16, -1).astype(jnp.bfloat16),    # (16, 256)
        "b1": b_c1.reshape(16, 1).astype(jnp.float32),
        "w2": w_c2.reshape(32, -1).astype(jnp.bfloat16),    # (32, 256)
        "b2": b_c2.reshape(32, 1).astype(jnp.float32),
        "wf": w_fc1.T.astype(jnp.bfloat16),                 # (2592, 256)
        "bf": b_fc1.reshape(1, -1).astype(jnp.float32),
        "wo": w_out.T.astype(jnp.bfloat16),                 # (256, A)
        "bo": b_out.reshape(1, -1).astype(jnp.float32),
    }


# ----------------------------------------------------------------------------
# NipsNet forward
# ----------------------------------------------------------------------------
def nipsnet_forward(x, p):
    B = x.shape[0]

    # conv1 + ReLU: patches (B, 256, 400); output already NCHW-ordered.
    p1, oh1, ow1 = im2col(x, 8, 8, 4)
    c1 = conv_matmul(p1.astype(jnp.bfloat16), p["w1"], p["b1"])   # (B, 16, 400)
    conv1_out = c1.reshape(B, 16, oh1, ow1)                       # (B, 16, 20, 20)

    # conv2 + ReLU: patches (B, 256, 81).
    p2, oh2, ow2 = im2col(conv1_out, 4, 4, 2)
    c2 = conv_matmul(p2.astype(jnp.bfloat16), p["w2"], p["b2"])   # (B, 32, 81)
    conv2_out = c2.reshape(B, 32, oh2, ow2)                       # (B, 32, 9, 9)

    # Flatten: (B, 32, 81) row-major == PyTorch .view(B, -1) on NCHW.
    flat = c2.reshape(B, -1).astype(jnp.bfloat16)                 # (B, 2592)

    # fc1 (+ReLU) and output layer fused in one Pallas kernel.
    fc1_out, out = head_matmul(flat, p["wf"], p["bf"], p["wo"], p["bo"])
    return conv1_out, conv2_out, fc1_out, out


def init_params(key, num_actions):
    ks = jax.random.split(key, 8)

    def u(k, shape, fan_in):
        bound = 1.0 / jnp.sqrt(fan_in)
        return jax.random.uniform(k, shape, jnp.float32, -bound, bound)

    w_c1 = u(ks[0], (16, 4, 8, 8), 4 * 8 * 8)
    b_c1 = u(ks[1], (16,), 4 * 8 * 8)
    w_c2 = u(ks[2], (32, 16, 4, 4), 16 * 4 * 4)
    b_c2 = u(ks[3], (32,), 16 * 4 * 4)
    w_fc1 = u(ks[4], (256, 2592), 2592)
    b_fc1 = u(ks[5], (256,), 2592)
    w_out = u(ks[6], (num_actions, 256), 256)
    b_out = u(ks[7], (num_actions,), 256)
    return (w_c1, b_c1, w_c2, b_c2, w_fc1, b_fc1, w_out, b_out)


# Pure-JAX f32 reference (for correctness check; bf16 kernel -> loose tol).
def nipsnet_reference(x, params):
    w_c1, b_c1, w_c2, b_c2, w_fc1, b_fc1, w_out, b_out = params
    dn = ("NCHW", "OIHW", "NCHW")
    c1 = jax.lax.conv_general_dilated(x, w_c1, (4, 4), "VALID",
                                      dimension_numbers=dn)
    c1 = jnp.maximum(c1 + b_c1[None, :, None, None], 0.0)
    c2 = jax.lax.conv_general_dilated(c1, w_c2, (2, 2), "VALID",
                                      dimension_numbers=dn)
    c2 = jnp.maximum(c2 + b_c2[None, :, None, None], 0.0)
    flat = c2.reshape(c2.shape[0], -1)
    f1 = jnp.maximum(flat @ w_fc1.T + b_fc1, 0.0)
    out = f1 @ w_out.T + b_out
    return c1, c2, f1, out


if __name__ == "__main__":
    key = jax.random.PRNGKey(0)
    k_x, k_p = jax.random.split(key)

    num_actions = 6
    batch = 2
    # Spatial size must be 84 so conv2's output flattens to 2592 (fc1 input).
    x = jax.random.normal(k_x, (batch, 4, 84, 84), jnp.float32)
    params = init_params(k_p, num_actions)
    prepped = prepare_params(params)          # one-time weight layout prep

    fwd = jax.jit(nipsnet_forward)
    conv1_out, conv2_out, fc1_out, out = fwd(x, prepped)
    jax.block_until_ready((conv1_out, conv2_out, fc1_out, out))

    assert conv1_out.shape == (batch, 16, 20, 20)
    assert conv2_out.shape == (batch, 32, 9, 9)
    assert fc1_out.shape == (batch, 256)
    assert out.shape == (batch, num_actions)

    # Correctness vs pure-JAX f32 reference (loose tol: bf16 operands).
    r1, r2, rf, ro = jax.jit(nipsnet_reference)(x, params)
    np.testing.assert_allclose(np.asarray(conv1_out), np.asarray(r1),
                               rtol=1e-1, atol=1e-1)
    np.testing.assert_allclose(np.asarray(conv2_out), np.asarray(r2),
                               rtol=1e-1, atol=1e-1)
    np.testing.assert_allclose(np.asarray(fc1_out), np.asarray(rf),
                               rtol=1e-1, atol=1e-1)
    np.testing.assert_allclose(np.asarray(out), np.asarray(ro),
                               rtol=1e-1, atol=1e-1)

    print("KERNEL_OK")
</pallas_src>

<mosaic_0001>
module attributes {stable_mosaic.version = 11 : i64} {
  func.func @_conv_mm_kernel(%arg0: i32, %arg1: memref<1x256x400xbf16, #tpu.memory_space<vmem>>, %arg2: memref<16x256xbf16, #tpu.memory_space<vmem>>, %arg3: memref<16x1xf32, #tpu.memory_space<vmem>>, %arg4: memref<1x16x400xf32, #tpu.memory_space<vmem>>) attributes {dimension_semantics = [#tpu.dimension_semantics<parallel>], iteration_bounds = array<i64: 2>, scalar_prefetch = 0 : i64, scratch_operands = 0 : i64, tpu.core_type = #tpu.core_type<tc>, window_params = [{transform_indices = @transform_0, window_bounds = array<i64: 1, 256, 400>}, {pipeline_mode = #tpu.pipeline_mode<synchronous>, transform_indices = @transform_1, window_bounds = array<i64: 16, 256>}, {pipeline_mode = #tpu.pipeline_mode<synchronous>, transform_indices = @transform_2, window_bounds = array<i64: 16, 1>}, {transform_indices = @transform_3, window_bounds = array<i64: 1, 16, 400>}]} {
    %c0 = arith.constant 0 : index
    %c0_0 = arith.constant 0 : index
    %0 = vector.load %arg2[%c0, %c0_0] : memref<16x256xbf16, #tpu.memory_space<vmem>>, vector<16x256xbf16>
    %c0_1 = arith.constant 0 : index
    %c0_2 = arith.constant 0 : index
    %c0_3 = arith.constant 0 : index
    %1 = vector.load %arg1[%c0_1, %c0_2, %c0_3] : memref<1x256x400xbf16, #tpu.memory_space<vmem>>, vector<1x256x400xbf16>
    %2 = vector.shape_cast %1 : vector<1x256x400xbf16> to vector<256x400xbf16>
    %cst = arith.constant dense<0.000000e+00> : vector<16x400xf32>
    %3 = tpu.matmul %0, %2, %cst {dimension_numbers = #tpu.dot_dimension_numbers<[1], [0], [0], [1], [0, 0, 1, 1], [], []>} : vector<16x256xbf16>, vector<256x400xbf16>, vector<16x400xf32> -> vector<16x400xf32>
    %c0_4 = arith.constant 0 : index
    %c0_5 = arith.constant 0 : index
    %4 = vector.load %arg3[%c0_4, %c0_5] : memref<16x1xf32, #tpu.memory_space<vmem>>, vector<16x1xf32>
    %5 = vector.broadcast %4 : vector<16x1xf32> to vector<16x400xf32>
    %6 = arith.addf %3, %5 : vector<16x400xf32>
    %cst_6 = arith.constant 0.000000e+00 : f32
    %7 = vector.broadcast %cst_6 : f32 to vector<16x400xf32>
    %8 = arith.maximumf %6, %7 : vector<16x400xf32>
    %c0_7 = arith.constant 0 : index
    %c0_8 = arith.constant 0 : index
    %c0_9 = arith.constant 0 : index
    %9 = vector.load %arg4[%c0_7, %c0_8, %c0_9] : memref<1x16x400xf32, #tpu.memory_space<vmem>>, vector<1x16x400xf32>
    %10 = vector.shape_cast %9 : vector<1x16x400xf32> to vector<16x400xf32>
    %11 = vector.shape_cast %8 : vector<16x400xf32> to vector<1x16x400xf32>
    tpu.vector_store %arg4[%c0_7, %c0_8, %c0_9], %11 {strides = array<i32>} : memref<1x16x400xf32, #tpu.memory_space<vmem>>, vector<1x16x400xf32>,
    return
  }
  func.func @transform_0(%arg0: i32) -> (i32, i32, i32) {
    %c0_i32 = arith.constant 0 : i32
    %c0_i32_0 = arith.constant 0 : i32
    %c0_i32_1 = arith.constant 0 : i32
    return %arg0, %c0_i32, %c0_i32_0 : i32, i32, i32
  }
  func.func @transform_1(%arg0: i32) -> (i32, i32) {
    %c0_i32 = arith.constant 0 : i32
    %c0_i32_0 = arith.constant 0 : i32
    %c0_i32_1 = arith.constant 0 : i32
    return %c0_i32, %c0_i32_0 : i32, i32
  }
  func.func @transform_2(%arg0: i32) -> (i32, i32) {
    %c0_i32 = arith.constant 0 : i32
    %c0_i32_0 = arith.constant 0 : i32
    %c0_i32_1 = arith.constant 0 : i32
    return %c0_i32, %c0_i32_0 : i32, i32
  }
  func.func @transform_3(%arg0: i32) -> (i32, i32, i32) {
    %c0_i32 = arith.constant 0 : i32
    %c0_i32_0 = arith.constant 0 : i32
    %c0_i32_1 = arith.constant 0 : i32
    return %arg0, %c0_i32, %c0_i32_0 : i32, i32, i32
  }
}

module attributes {stable_mosaic.version = 11 : i64} {
  func.func @_conv_mm_kernel(%arg0: i32, %arg1: memref<1x256x81xbf16, #tpu.memory_space<vmem>>, %arg2: memref<32x256xbf16, #tpu.memory_space<vmem>>, %arg3: memref<32x1xf32, #tpu.memory_space<vmem>>, %arg4: memref<1x32x81xf32, #tpu.memory_space<vmem>>) attributes {dimension_semantics = [#tpu.dimension_semantics<parallel>], iteration_bounds = array<i64: 2>, scalar_prefetch = 0 : i64, scratch_operands = 0 : i64, tpu.core_type = #tpu.core_type<tc>, window_params = [{transform_indices = @transform_0, window_bounds = array<i64: 1, 256, 81>}, {pipeline_mode = #tpu.pipeline_mode<synchronous>, transform_indices = @transform_1, window_bounds = array<i64: 32, 256>}, {pipeline_mode = #tpu.pipeline_mode<synchronous>, transform_indices = @transform_2, window_bounds = array<i64: 32, 1>}, {transform_indices = @transform_3, window_bounds = array<i64: 1, 32, 81>}]} {
    %c0 = arith.constant 0 : index
    %c0_0 = arith.constant 0 : index
    %0 = vector.load %arg2[%c0, %c0_0] : memref<32x256xbf16, #tpu.memory_space<vmem>>, vector<32x256xbf16>
    %c0_1 = arith.constant 0 : index
    %c0_2 = arith.constant 0 : index
    %c0_3 = arith.constant 0 : index
    %1 = vector.load %arg1[%c0_1, %c0_2, %c0_3] : memref<1x256x81xbf16, #tpu.memory_space<vmem>>, vector<1x256x81xbf16>
    %2 = vector.shape_cast %1 : vector<1x256x81xbf16> to vector<256x81xbf16>
    %cst = arith.constant dense<0.000000e+00> : vector<32x81xf32>
    %3 = tpu.matmul %0, %2, %cst {dimension_numbers = #tpu.dot_dimension_numbers<[1], [0], [0], [1], [0, 0, 1, 1], [], []>} : vector<32x256xbf16>, vector<256x81xbf16>, vector<32x81xf32> -> vector<32x81xf32>
    %c0_4 = arith.constant 0 : index
    %c0_5 = arith.constant 0 : index
    %4 = vector.load %arg3[%c0_4, %c0_5] : memref<32x1xf32, #tpu.memory_space<vmem>>, vector<32x1xf32>
    %5 = vector.broadcast %4 : vector<32x1xf32> to vector<32x81xf32>
    %6 = arith.addf %3, %5 : vector<32x81xf32>
    %cst_6 = arith.constant 0.000000e+00 : f32
    %7 = vector.broadcast %cst_6 : f32 to vector<32x81xf32>
    %8 = arith.maximumf %6, %7 : vector<32x81xf32>
    %c0_7 = arith.constant 0 : index
    %c0_8 = arith.constant 0 : index
    %c0_9 = arith.constant 0 : index
    %9 = vector.load %arg4[%c0_7, %c0_8, %c0_9] : memref<1x32x81xf32, #tpu.memory_space<vmem>>, vector<1x32x81xf32>
    %10 = vector.shape_cast %9 : vector<1x32x81xf32> to vector<32x81xf32>
    %11 = vector.shape_cast %8 : vector<32x81xf32> to vector<1x32x81xf32>
    tpu.vector_store %arg4[%c0_7, %c0_8, %c0_9], %11 {strides = array<i32>} : memref<1x32x81xf32, #tpu.memory_space<vmem>>, vector<1x32x81xf32>,
    return
  }
  func.func @transform_0(%arg0: i32) -> (i32, i32, i32) {
    %c0_i32 = arith.constant 0 : i32
    %c0_i32_0 = arith.constant 0 : i32
    %c0_i32_1 = arith.constant 0 : i32
    return %arg0, %c0_i32, %c0_i32_0 : i32, i32, i32
  }
  func.func @transform_1(%arg0: i32) -> (i32, i32) {
    %c0_i32 = arith.constant 0 : i32
    %c0_i32_0 = arith.constant 0 : i32
    %c0_i32_1 = arith.constant 0 : i32
    return %c0_i32, %c0_i32_0 : i32, i32
  }
  func.func @transform_2(%arg0: i32) -> (i32, i32) {
    %c0_i32 = arith.constant 0 : i32
    %c0_i32_0 = arith.constant 0 : i32
    %c0_i32_1 = arith.constant 0 : i32
    return %c0_i32, %c0_i32_0 : i32, i32
  }
  func.func @transform_3(%arg0: i32) -> (i32, i32, i32) {
    %c0_i32 = arith.constant 0 : i32
    %c0_i32_0 = arith.constant 0 : i32
    %c0_i32_1 = arith.constant 0 : i32
    return %arg0, %c0_i32, %c0_i32_0 : i32, i32, i32
  }
}

module attributes {stable_mosaic.version = 11 : i64} {
  func.func @_head_kernel(%arg0: i32, %arg1: memref<2x2592xbf16, #tpu.memory_space<vmem>>, %arg2: memref<2592x256xbf16, #tpu.memory_space<vmem>>, %arg3: memref<1x256xf32, #tpu.memory_space<vmem>>, %arg4: memref<256x6xbf16, #tpu.memory_space<vmem>>, %arg5: memref<1x6xf32, #tpu.memory_space<vmem>>, %arg6: memref<2x256xf32, #tpu.memory_space<vmem>>, %arg7: memref<2x6xf32, #tpu.memory_space<vmem>>) attributes {dimension_semantics = [#tpu.dimension_semantics<arbitrary>], iteration_bounds = array<i64: 1>, scalar_prefetch = 0 : i64, scratch_operands = 0 : i64, tpu.core_type = #tpu.core_type<tc>, window_params = [{pipeline_mode = #tpu.pipeline_mode<synchronous>, transform_indices = @transform_0, window_bounds = array<i64: 2, 2592>}, {pipeline_mode = #tpu.pipeline_mode<synchronous>, transform_indices = @transform_1, window_bounds = array<i64: 2592, 256>}, {pipeline_mode = #tpu.pipeline_mode<synchronous>, transform_indices = @transform_2, window_bounds = array<i64: 1, 256>}, {pipeline_mode = #tpu.pipeline_mode<synchronous>, transform_indices = @transform_3, window_bounds = array<i64: 256, 6>}, {pipeline_mode = #tpu.pipeline_mode<synchronous>, transform_indices = @transform_4, window_bounds = array<i64: 1, 6>}, {pipeline_mode = #tpu.pipeline_mode<synchronous>, transform_indices = @transform_5, window_bounds = array<i64: 2, 256>}, {pipeline_mode = #tpu.pipeline_mode<synchronous>, transform_indices = @transform_6, window_bounds = array<i64: 2, 6>}]} {
    %c0 = arith.constant 0 : index
    %c0_0 = arith.constant 0 : index
    %0 = vector.load %arg1[%c0, %c0_0] : memref<2x2592xbf16, #tpu.memory_space<vmem>>, vector<2x2592xbf16>
    %c0_1 = arith.constant 0 : index
    %c0_2 = arith.constant 0 : index
    %1 = vector.load %arg2[%c0_1, %c0_2] : memref<2592x256xbf16, #tpu.memory_space<vmem>>, vector<2592x256xbf16>
    %cst = arith.constant dense<0.000000e+00> : vector<2x256xf32>
    %2 = tpu.matmul %0, %1, %cst {dimension_numbers = #tpu.dot_dimension_numbers<[1], [0], [0], [1], [0, 0, 1, 1], [], []>} : vector<2x2592xbf16>, vector<2592x256xbf16>, vector<2x256xf32> -> vector<2x256xf32>
    %c0_3 = arith.constant 0 : index
    %c0_4 = arith.constant 0 : index
    %3 = vector.load %arg3[%c0_3, %c0_4] : memref<1x256xf32, #tpu.memory_space<vmem>>, vector<1x256xf32>
    %4 = vector.broadcast %3 : vector<1x256xf32> to vector<2x256xf32>
    %5 = arith.addf %2, %4 : vector<2x256xf32>
    %cst_5 = arith.constant 0.000000e+00 : f32
    %6 = vector.broadcast %cst_5 : f32 to vector<2x256xf32>
    %7 = arith.maximumf %5, %6 : vector<2x256xf32>
    %c0_6 = arith.constant 0 : index
    %c0_7 = arith.constant 0 : index
    %8 = vector.load %arg6[%c0_6, %c0_7] : memref<2x256xf32, #tpu.memory_space<vmem>>, vector<2x256xf32>
    tpu.vector_store %arg6[%c0_6, %c0_7], %7 {strides = array<i32>} : memref<2x256xf32, #tpu.memory_space<vmem>>, vector<2x256xf32>,
    %9 = arith.truncf %7 : vector<2x256xf32> to vector<2x256xbf16>
    %c0_8 = arith.constant 0 : index
    %c0_9 = arith.constant 0 : index
    %10 = vector.load %arg4[%c0_8, %c0_9] : memref<256x6xbf16, #tpu.memory_space<vmem>>, vector<256x6xbf16>
    %cst_10 = arith.constant dense<0.000000e+00> : vector<2x6xf32>
    %11 = tpu.matmul %9, %10, %cst_10 {dimension_numbers = #tpu.dot_dimension_numbers<[1], [0], [0], [1], [0, 0, 1, 1], [], []>} : vector<2x256xbf16>, vector<256x6xbf16>, vector<2x6xf32> -> vector<2x6xf32>
    %c0_11 = arith.constant 0 : index
    %c0_12 = arith.constant 0 : index
    %12 = vector.load %arg5[%c0_11, %c0_12] : memref<1x6xf32, #tpu.memory_space<vmem>>, vector<1x6xf32>
    %13 = vector.broadcast %12 : vector<1x6xf32> to vector<2x6xf32>
    %14 = arith.addf %11, %13 : vector<2x6xf32>
    %c0_13 = arith.constant 0 : index
    %c0_14 = arith.constant 0 : index
    %15 = vector.load %arg7[%c0_13, %c0_14] : memref<2x6xf32, #tpu.memory_space<vmem>>, vector<2x6xf32>
    tpu.vector_store %arg7[%c0_13, %c0_14], %14 {strides = array<i32>} : memref<2x6xf32, #tpu.memory_space<vmem>>, vector<2x6xf32>,
    return
  }
  func.func @transform_0(%arg0: i32) -> (i32, i32) {
    %c0_i32 = arith.constant 0 : i32
    %c0_i32_0 = arith.constant 0 : i32
    %c0_i32_1 = arith.constant 0 : i32
    return %c0_i32, %c0_i32_0 : i32, i32
  }
  func.func @transform_1(%arg0: i32) -> (i32, i32) {
    %c0_i32 = arith.constant 0 : i32
    %c0_i32_0 = arith.constant 0 : i32
    %c0_i32_1 = arith.constant 0 : i32
    return %c0_i32, %c0_i32_0 : i32, i32
  }
  func.func @transform_2(%arg0: i32) -> (i32, i32) {
    %c0_i32 = arith.constant 0 : i32
    %c0_i32_0 = arith.constant 0 : i32
    %c0_i32_1 = arith.constant 0 : i32
    return %c0_i32, %c0_i32_0 : i32, i32
  }
  func.func @transform_3(%arg0: i32) -> (i32, i32) {
    %c0_i32 = arith.constant 0 : i32
    %c0_i32_0 = arith.constant 0 : i32
    %c0_i32_1 = arith.constant 0 : i32
    return %c0_i32, %c0_i32_0 : i32, i32
  }
  func.func @transform_4(%arg0: i32) -> (i32, i32) {
    %c0_i32 = arith.constant 0 : i32
    %c0_i32_0 = arith.constant 0 : i32
    %c0_i32_1 = arith.constant 0 : i32
    return %c0_i32, %c0_i32_0 : i32, i32
  }
  func.func @transform_5(%arg0: i32) -> (i32, i32) {
    %c0_i32 = arith.constant 0 : i32
    %c0_i32_0 = arith.constant 0 : i32
    %c0_i32_1 = arith.constant 0 : i32
    return %c0_i32, %c0_i32_0 : i32, i32
  }
  func.func @transform_6(%arg0: i32) -> (i32, i32) {
    %c0_i32 = arith.constant 0 : i32
    %c0_i32_0 = arith.constant 0 : i32
    %c0_i32_1 = arith.constant 0 : i32
    return %c0_i32, %c0_i32_0 : i32, i32
  }
}

</mosaic_0001>

<bundles_post_ra>
// kernel: nipsnet_forward.3
= control target key start
LH: loop header
LB: loop body
LE: loop exit
PB: predicated region body
PF: predicated region fallthrough
CT: control target
= control target key end

     0   :  { %s1145_s12 = smov 0   ;;  %s1336_s0 = inlined_call_operand.vmem [shape: bf16[2,256,400], index: 0, kind: input, shape index: {}]   ;;  %s1337_s1 = inlined_call_operand.vmem [shape: bf16[16,256], index: 1, kind: input, shape index: {}]   ;;  %s1338_s2 = inlined_call_operand.vmem [shape: f32[16,1], index: 2, kind: input, shape index: {}]   ;;  %s1339_s3 = inlined_call_operand.vmem [shape: f32[2,16,400], index: 3, kind: output, shape index: {}]  }
   0x1 LB: > { %s763_s13 = sadd.s32 4294967295, %s1122_s12   ;;  %p767_p0 = scmp.ge.s32.totalorder %s1122_s12, 1  ;;  %s1122_s12 = sphi %s1145_s12, %s13_s12  }
   0x2   : > { %p137_p1 = scmp.lt.s32.totalorder %s1122_s12, 3 }
   0x4   : > { %p138_p2 = pnand %p767_p0, %p137_p1 }
   0x5   : > { %p161_p3 = scmp.lt.s32.totalorder (!%p138_p2), %s763_s13, 1 }
   0x6   : > { %141 = sbr.rel (%p138_p2) target bundleno = 228 (0xe4), region = 32 }
   0xb   : > { %s1341_s13 = smov (!%p161_p3, %s763_s13), 1  ;;  %vm702_vm0 = vcmask 130048  }
   0xc   : > { %s1038_s14 = sshll.u32 %s1341_s13, 9  ;;  %s1039_s30 = sshll.u32 %s1341_s13, 6 }
   0xd   : > { %s1159_s17 = scalar_lea.vmem %s1336_s0, %s1038_s14  ;;  %s1323_s6 = scalar_lea.vmem %s1339_s3, %s1039_s30 }
   0xe   : > { %v894_v0 = vld [vmem:[%s1159_s17 + $0xe0] sm:$0xf]  ;;  %v1072_v1 = vld [vmem:[%s1159_s17 + $0xec] sm:$0xf0]  ;;  %v1070_v5 = vld [vmem:[%s1159_s17 + $0xe4] sm:$0xf] }
   0xf   : > { %v1022_v2 = vld [vmem:[%s1159_s17 + $0x1e0] sm:$0xf]  ;;  %v895_v3 = vor.u32 %v1072_v1, %v894_v0  ;;  %v1104_v4 = vld [vmem:[%s1159_s17 + $0x1ec] sm:$0xf0]  ;;  %v896_v6 = vld [vmem:[%s1159_s17 + $0xf0] sm:$0xf0] }
  0x10   : > { %v1023_v7 = vor.u32 %v1104_v4, %v1022_v2  ;;  %v899_v8 = vor.u32 %v1070_v5, %v896_v6  ;;  %v1102_v9 = vld [vmem:[%s1159_s17 + $0x1e4] sm:$0xf]  ;;  %v1024_v10 = vld [vmem:[%s1159_s17 + $0x1f0] sm:$0xf0]  ;;  %v878_v11 = vld [vmem:[%s1159_s17 + $0xc0] sm:$0xf] }
  0x11   : > { %579 = vmatpush.bf16.msra.mxu0 %v895_v3  ;;  %v1027_v12 = vor.u32 %v1102_v9, %v1024_v10  ;;  %v1068_v13 = vld [vmem:[%s1159_s17 + $0xcc] sm:$0xf0]  ;;  %v1006_v14 = vld [vmem:[%s1159_s17 + $0x1c0] sm:$0xf]  ;;  %v1066_v18 = vld [vmem:[%s1159_s17 + $0xc4] sm:$0xf] }
  0x12   : > { %v1100_v15 = vld [vmem:[%s1159_s17 + $0x1cc] sm:$0xf0]  ;;  %593 = vmatpush.bf16.msra.mxu1 %v1023_v7  ;;  %607 = vmatpush.bf16.msra.mxu2 %v899_v8  ;;  %v879_v16 = vor.u32 %v1068_v13, %v878_v11  ;;  %v880_v19 = vld [vmem:[%s1159_s17 + $0xd0] sm:$0xf0]  ;;  %v1098_v20 = vld [vmem:[%s1159_s17 + $0x1c4] sm:$0xf] }
  0x13   : > { %v1007_v17 = vor.u32 %v1100_v15, %v1006_v14  ;;  %621 = vmatpush.bf16.msra.mxu3 %v1027_v12  ;;  %v883_v21 = vor.u32 %v1066_v18, %v880_v19  ;;  %v1008_v22 = vld [vmem:[%s1159_s17 + $0x1d0] sm:$0xf0]  ;;  %v862_v23 = vld [vmem:[%s1159_s17 + $0xa0] sm:$0xf]  ;;  %v1064_v24 = vld [vmem:[%s1159_s17 + $0xac] sm:$0xf0] }
  0x14   : > { %v1011_v25 = vor.u32 %v1098_v20, %v1008_v22  ;;  %v990_v26 = vld [vmem:[%s1159_s17 + $0x1a0] sm:$0xf]  ;;  %v1096_v27 = vld [vmem:[%s1159_s17 + $0x1ac] sm:$0xf0]  ;;  %v1062_v28 = vld [vmem:[%s1159_s17 + $0xa4] sm:$0xf]  ;;  %v863_v29 = vor.u32 %v1064_v24, %v862_v23 }
  0x15   : > { %580 = vmatpush.bf16.msra.mxu0 %v879_v16  ;;  %v864_v30 = vld [vmem:[%s1159_s17 + $0xb0] sm:$0xf0]  ;;  %v1094_v31 = vld [vmem:[%s1159_s17 + $0x1a4] sm:$0xf]  ;;  %v991_v33 = vor.u32 %v1096_v27, %v990_v26  ;;  %v846_v35 = vld [vmem:[%s1159_s17 + $0x80] sm:$0xf] }
  0x16   : > { %v992_v32 = vld [vmem:[%s1159_s17 + $0x1b0] sm:$0xf0]  ;;  %594 = vmatpush.bf16.msra.mxu1 %v1007_v17  ;;  %608 = vmatpush.bf16.msra.mxu2 %v883_v21  ;;  %v867_v34 = vor.u32 %v1062_v28, %v864_v30  ;;  %v1060_v36 = vld [vmem:[%s1159_s17 + $0x8c] sm:$0xf0]  ;;  %v974_v37 = vld [vmem:[%s1159_s17 + $0x180] sm:$0xf] }
  0x17   : > { %622 = vmatpush.bf16.msra.mxu3 %v1011_v25  ;;  %v995_v38 = vor.u32 %v1094_v31, %v992_v32  ;;  %v1092_v39 = vld [vmem:[%s1159_s17 + $0x18c] sm:$0xf0]  ;;  %v1058_v40 = vld [vmem:[%s1159_s17 + $0x84] sm:$0xf]  ;;  %v848_v41 = vld [vmem:[%s1159_s17 + $0x90] sm:$0xf0]  ;;  %v847_v44 = vor.u32 %v1060_v36, %v846_v35 }
  0x18   : > { %v1090_v42 = vld [vmem:[%s1159_s17 + $0x184] sm:$0xf]  ;;  %v976_v43 = vld [vmem:[%s1159_s17 + $0x190] sm:$0xf0]  ;;  %v975_v45 = vor.u32 %v1092_v39, %v974_v37  ;;  %v851_v46 = vor.u32 %v1058_v40, %v848_v41  ;;  %v830_v47 = vld [vmem:[%s1159_s17 + $0x60] sm:$0xf] }
  0x19   : > { %581 = vmatpush.bf16.msra.mxu0 %v863_v29  ;;  %v1056_v48 = vld [vmem:[%s1159_s17 + $0x6c] sm:$0xf0]  ;;  %v958_v49 = vld [vmem:[%s1159_s17 + $0x160] sm:$0xf]  ;;  %v979_v50 = vor.u32 %v1090_v42, %v976_v43  ;;  %v1054_v52 = vld [vmem:[%s1159_s17 + $0x64] sm:$0xf] }
  0x1a   : > { %595 = vmatpush.bf16.msra.mxu1 %v991_v33  ;;  %609 = vmatpush.bf16.msra.mxu2 %v867_v34  ;;  %v1088_v51 = vld [vmem:[%s1159_s17 + $0x16c] sm:$0xf0]  ;;  %v832_v53 = vld [vmem:[%s1159_s17 + $0x70] sm:$0xf0]  ;;  %v1086_v54 = vld [vmem:[%s1159_s17 + $0x164] sm:$0xf]  ;;  %v831_v56 = vor.u32 %v1056_v48, %v830_v47 }
  0x1b   : > { %623 = vmatpush.bf16.msra.mxu3 %v995_v38  ;;  %v960_v55 = vld [vmem:[%s1159_s17 + $0x170] sm:$0xf0]  ;;  %v959_v57 = vor.u32 %v1088_v51, %v958_v49  ;;  %v835_v58 = vor.u32 %v1054_v52, %v832_v53  ;;  %v814_v59 = vld [vmem:[%s1159_s17 + $0x40] sm:$0xf]  ;;  %v1052_v60 = vld [vmem:[%s1159_s17 + $0x4c] sm:$0xf0] }
  0x1c   : > { %v942_v61 = vld [vmem:[%s1159_s17 + $0x140] sm:$0xf]  ;;  %v963_v62 = vor.u32 %v1086_v54, %v960_v55  ;;  %v1084_v63 = vld [vmem:[%s1159_s17 + $0x14c] sm:$0xf0]  ;;  %v1050_v0 = vld [vmem:[%s1159_s17 + $0x44] sm:$0xf]  ;;  %v815_v4 = vor.u32 %v1052_v60, %v814_v59 }
  0x1d   : > { %582 = vmatpush.bf16.msra.mxu0 %v847_v44  ;;  %v816_v1 = vld [vmem:[%s1159_s17 + $0x50] sm:$0xf0]  ;;  %v1082_v2 = vld [vmem:[%s1159_s17 + $0x144] sm:$0xf]  ;;  %v943_v5 = vor.u32 %v1084_v63, %v942_v61  ;;  %v798_v7 = vld [vmem:[%s1159_s17 + $0x20] sm:$0xf] }
  0x1e   : > { %596 = vmatpush.bf16.msra.mxu1 %v975_v45  ;;  %610 = vmatpush.bf16.msra.mxu2 %v851_v46  ;;  %v944_v3 = vld [vmem:[%s1159_s17 + $0x150] sm:$0xf0]  ;;  %v819_v6 = vor.u32 %v1050_v0, %v816_v1  ;;  %v1048_v8 = vld [vmem:[%s1159_s17 + $0x2c] sm:$0xf0]  ;;  %v926_v9 = vld [vmem:[%s1159_s17 + $0x120] sm:$0xf] }
  0x1f   : > { %624 = vmatpush.bf16.msra.mxu3 %v979_v50  ;;  %v947_v10 = vor.u32 %v1082_v2, %v944_v3  ;;  %v1080_v11 = vld [vmem:[%s1159_s17 + $0x12c] sm:$0xf0]  ;;  %v1046_v12 = vld [vmem:[%s1159_s17 + $0x24] sm:$0xf]  ;;  %v800_v13 = vld [vmem:[%s1159_s17 + $0x30] sm:$0xf0]  ;;  %v799_v16 = vor.u32 %v1048_v8, %v798_v7 }
  0x20   : > { %v1078_v14 = vld [vmem:[%s1159_s17 + $0x124] sm:$0xf]  ;;  %v928_v15 = vld [vmem:[%s1159_s17 + $0x130] sm:$0xf0]  ;;  %v782_v17 = vld [vmem:[%s1159_s17] sm:$0xf]  ;;  %v927_v20 = vor.u32 %v1080_v11, %v926_v9  ;;  %v803_v21 = vor.u32 %v1046_v12, %v800_v13 }
  0x21   : > { %583 = vmatpush.bf16.msra.mxu0 %v831_v56  ;;  %v1044_v18 = vld [vmem:[%s1159_s17 + $0xc] sm:$0xf0]  ;;  %v910_v19 = vld [vmem:[%s1159_s17 + $0x100] sm:$0xf]  ;;  %v1042_v23 = vld [vmem:[%s1159_s17 + $0x4] sm:$0xf]  ;;  %v931_v25 = vor.u32 %v1078_v14, %v928_v15 }
  0x22   : > { %597 = vmatpush.bf16.msra.mxu1 %v959_v57  ;;  %611 = vmatpush.bf16.msra.mxu2 %v835_v58  ;;  %v1076_v22 = vld [vmem:[%s1159_s17 + $0x10c] sm:$0xf0]  ;;  %v784_v24 = vld [vmem:[%s1159_s17 + $0x10] sm:$0xf0]  ;;  %v1074_v26 = vld [vmem:[%s1159_s17 + $0x104] sm:$0xf]  ;;  %v783_v32 = vor.u32 %v1044_v18, %v782_v17 }
  0x23   : > { %625 = vmatpush.bf16.msra.mxu3 %v963_v62  ;;  %v912_v27 = vld [vmem:[%s1159_s17 + $0x110] sm:$0xf0]  ;;  %v902_v28 = vld [vmem:[%s1159_s17 + $0xe8] sm:$0xf]  ;;  %v1073_v29 = vld [vmem:[%s1159_s17 + $0xf4] sm:$0xf0]  ;;  %v911_v36 = vor.u32 %v1076_v22, %v910_v19  ;;  %v787_v37 = vor.u32 %v1042_v23, %v784_v24 }
  0x24   : > { %v1030_v30 = vld [vmem:[%s1159_s17 + $0x1e8] sm:$0xf]  ;;  %v1105_v31 = vld [vmem:[%s1159_s17 + $0x1f4] sm:$0xf0]  ;;  %v1071_v33 = vld [vmem:[%s1159_s17 + $0xec] sm:$0xf]  ;;  %v915_v41 = vor.u32 %v1074_v26, %v912_v27  ;;  %v903_v42 = vor.u32 %v1073_v29, %v902_v28 }
  0x25   : > { %584 = vmatpush.bf16.msra.mxu0 %v815_v4  ;;  %v904_v34 = vld [vmem:[%s1159_s17 + $0xf8] sm:$0xf0]  ;;  %v1103_v35 = vld [vmem:[%s1159_s17 + $0x1ec] sm:$0xf]  ;;  %v774_v39 = vld [vmem:[%s1337_s1] sm:$0xf]  ;;  %v1031_v45 = vor.u32 %v1105_v31, %v1030_v30 }
  0x26   : > { %598 = vmatpush.bf16.msra.mxu1 %v943_v5  ;;  %612 = vmatpush.bf16.msra.mxu2 %v819_v6  ;;  %v1032_v38 = vld [vmem:[%s1159_s17 + $0x1f8] sm:$0xf0]  ;;  %v1041_v40 = vld [vmem:[%s1337_s1 + $0x4] sm:$0xf0]  ;;  %v1069_v44 = vld [vmem:[%s1159_s17 + $0xd4] sm:$0xf0]  ;;  %v907_v46 = vor.u32 %v1071_v33, %v904_v34 }
  0x27   : > { %626 = vmatpush.bf16.msra.mxu3 %v947_v10  ;;  %v886_v43 = vld [vmem:[%s1159_s17 + $0xc8] sm:$0xf]  ;;  %v1040_v48 = vld [vmem:[%s1337_s1 + $0x4] sm:$0xf]  ;;  %v776_v49 = vld [vmem:[%s1337_s1 + $0x8] sm:$0xf0]  ;;  %v1035_v50 = vor.u32 %v1103_v35, %v1032_v38  ;;  %v1251_v54 = vor.u32 %v1041_v40, %v774_v39 }
  0x28   : > { %v1014_v47 = vld [vmem:[%s1159_s17 + $0x1c8] sm:$0xf]  ;;  %v1101_v51 = vld [vmem:[%s1159_s17 + $0x1d4] sm:$0xf0]  ;;  %v1067_v52 = vld [vmem:[%s1159_s17 + $0xcc] sm:$0xf]  ;;  %v1255_v57 = vor.u32 %v1040_v48, %v776_v49  ;;  %v887_v58 = vor.u32 %v1069_v44, %v886_v43 }
  0x29   : > { %585 = vmatpush.bf16.msra.mxu0 %v799_v16  ;;  %v888_v53 = vld [vmem:[%s1159_s17 + $0xd8] sm:$0xf0]  ;;  %v1099_v55 = vld [vmem:[%s1159_s17 + $0x1cc] sm:$0xf]  ;;  %v1015_v59 = vor.u32 %v1101_v51, %v1014_v47  ;;  %v870_v61 = vld [vmem:[%s1159_s17 + $0xa8] sm:$0xf] }
  0x2a   : > { %599 = vmatpush.bf16.msra.mxu1 %v927_v20  ;;  %613 = vmatpush.bf16.msra.mxu2 %v803_v21  ;;  %v1016_v56 = vld [vmem:[%s1159_s17 + $0x1d8] sm:$0xf0]  ;;  %v891_v60 = vor.u32 %v1067_v52, %v888_v53  ;;  %v1065_v62 = vld [vmem:[%s1159_s17 + $0xb4] sm:$0xf0]  ;;  %v998_v63 = vld [vmem:[%s1159_s17 + $0x1a8] sm:$0xf] }
  0x2b   : > { %627 = vmatpush.bf16.msra.mxu3 %v931_v25  ;;  %v1019_v0 = vor.u32 %v1099_v55, %v1016_v56  ;;  %v1097_v1 = vld [vmem:[%s1159_s17 + $0x1b4] sm:$0xf0]  ;;  %v1063_v2 = vld [vmem:[%s1159_s17 + $0xac] sm:$0xf]  ;;  %v872_v3 = vld [vmem:[%s1159_s17 + $0xb8] sm:$0xf0]  ;;  %v871_v6 = vor.u32 %v1065_v62, %v870_v61 }
  0x2c   : > { %v1095_v4 = vld [vmem:[%s1159_s17 + $0x1ac] sm:$0xf]  ;;  %v1000_v5 = vld [vmem:[%s1159_s17 + $0x1b8] sm:$0xf0]  ;;  %v854_v7 = vld [vmem:[%s1159_s17 + $0x88] sm:$0xf]  ;;  %v999_v8 = vor.u32 %v1097_v1, %v998_v63  ;;  %v875_v9 = vor.u32 %v1063_v2, %v872_v3 }
  0x2d   : > { %586 = vmatpush.bf16.msra.mxu0 %v783_v32  ;;  %v1061_v10 = vld [vmem:[%s1159_s17 + $0x94] sm:$0xf0]  ;;  %v982_v11 = vld [vmem:[%s1159_s17 + $0x188] sm:$0xf]  ;;  %v237_v12 = vld [vmem:[%s1338_s2] sm:$0xff]  ;;  %v1003_v13 = vor.u32 %v1095_v4, %v1000_v5  ;;  %v1124_v17 = vmov 0  }
  0x2e   : > { %600 = vmatpush.bf16.msra.mxu1 %v911_v36  ;;  %614 = vmatpush.bf16.msra.mxu2 %v787_v37  ;;  %v1093_v14 = vld [vmem:[%s1159_s17 + $0x194] sm:$0xf0]  ;;  %v1059_v15 = vld [vmem:[%s1159_s17 + $0x8c] sm:$0xf]  ;;  %v856_v16 = vld [vmem:[%s1159_s17 + $0x98] sm:$0xf0]  ;;  %v855_v20 = vor.u32 %v1061_v10, %v854_v7 }
  0x2f   : > { %628 = vmatpush.bf16.msra.mxu3 %v915_v41  ;;  %1115 = vset.pattern.permute.xlu0 %v1124_v17  ;;  %v1091_v18 = vld [vmem:[%s1159_s17 + $0x18c] sm:$0xf]  ;;  %v984_v19 = vld [vmem:[%s1159_s17 + $0x198] sm:$0xf0]  ;;  %v983_v21 = vor.u32 %v1093_v14, %v982_v11  ;;  %v859_v22 = vor.u32 %v1059_v15, %v856_v16  ;;  %v838_v23 = vld [vmem:[%s1159_s17 + $0x68] sm:$0xf] }
  0x30   : > { %587 = vmatmul.bf16.vlgmr.msra.gmra.mxu0 %v1251_v54  ;;  %241 = vperm.xlu0 %1115, %v237_v12   ;;  %v1057_v24 = vld [vmem:[%s1159_s17 + $0x74] sm:$0xf0]  ;;  %v966_v25 = vld [vmem:[%s1159_s17 + $0x168] sm:$0xf]  ;;  %v987_v26 = vor.u32 %v1091_v18, %v984_v19  ;;  %v1055_v28 = vld [vmem:[%s1159_s17 + $0x6c] sm:$0xf] }
  0x31   : > { %635 = vmatpush.bf16.msrb.mxu0 %v903_v42  ;;  %615 = vmatmul.bf16.vlgmr.msra.gmra.mxu2 %v1251_v54  ;;  %v1089_v27 = vld [vmem:[%s1159_s17 + $0x174] sm:$0xf0]  ;;  %v840_v29 = vld [vmem:[%s1159_s17 + $0x78] sm:$0xf0]  ;;  %v1087_v30 = vld [vmem:[%s1159_s17 + $0x16c] sm:$0xf]  ;;  %v839_v32 = vor.u32 %v1057_v24, %v838_v23 }
  0x32   : > { %649 = vmatpush.bf16.msrb.mxu1 %v1031_v45  ;;  %663 = vmatpush.bf16.msrb.mxu2 %v907_v46  ;;  %v968_v31 = vld [vmem:[%s1159_s17 + $0x178] sm:$0xf0]  ;;  %v238_v33 = vld [vmem:[%s1338_s2 + $0x8] sm:$0xff]  ;;  %v967_v34 = vor.u32 %v1089_v27, %v966_v25  ;;  %v843_v35 = vor.u32 %v1055_v28, %v840_v29  ;;  %v1053_v37 = vld [vmem:[%s1159_s17 + $0x54] sm:$0xf0] }
  0x33   : > { %677 = vmatpush.bf16.msrb.mxu3 %v1035_v50  ;;  %601 = vmatmul.bf16.vlgmr.msra.gmra.mxu1 %v1255_v57  ;;  %v822_v36 = vld [vmem:[%s1159_s17 + $0x48] sm:$0xf]  ;;  %v971_v39 = vor.u32 %v1087_v30, %v968_v31  ;;  %v1085_v40 = vld [vmem:[%s1159_s17 + $0x154] sm:$0xf0]  ;;  %v1051_v41 = vld [vmem:[%s1159_s17 + $0x4c] sm:$0xf] }
  0x34   : > { %629 = vmatmul.bf16.vlgmr.msra.gmra.mxu3 %v1255_v57  ;;  %v950_v38 = vld [vmem:[%s1159_s17 + $0x148] sm:$0xf]  ;;  %v824_v42 = vld [vmem:[%s1159_s17 + $0x58] sm:$0xf0]  ;;  %v1083_v43 = vld [vmem:[%s1159_s17 + $0x14c] sm:$0xf]  ;;  %v823_v45 = vor.u32 %v1053_v37, %v822_v36 }
  0x35   : > { %636 = vmatpush.bf16.msrb.mxu0 %v887_v58  ;;  %v952_v44 = vld [vmem:[%s1159_s17 + $0x158] sm:$0xf0]  ;;  %v951_v46 = vor.u32 %v1085_v40, %v950_v38  ;;  %v827_v47 = vor.u32 %v1051_v41, %v824_v42  ;;  %v806_v48 = vld [vmem:[%s1159_s17 + $0x28] sm:$0xf]  ;;  %v1049_v49 = vld [vmem:[%s1159_s17 + $0x34] sm:$0xf0] }
  0x36   : > { %650 = vmatpush.bf16.msrb.mxu1 %v1015_v59  ;;  %664 = vmatpush.bf16.msrb.mxu2 %v891_v60  ;;  %v934_v50 = vld [vmem:[%s1159_s17 + $0x128] sm:$0xf]  ;;  %v955_v51 = vor.u32 %v1083_v43, %v952_v44  ;;  %v1081_v52 = vld [vmem:[%s1159_s17 + $0x134] sm:$0xf0]  ;;  %v1047_v53 = vld [vmem:[%s1159_s17 + $0x2c] sm:$0xf]  ;;  %v807_v59 = vor.u32 %v1049_v49, %v806_v48 }
  0x37   : > { %678 = vmatpush.bf16.msrb.mxu3 %v1019_v0  ;;  %v808_v55 = vld [vmem:[%s1159_s17 + $0x38] sm:$0xf0]  ;;  %v1079_v56 = vld [vmem:[%s1159_s17 + $0x12c] sm:$0xf]  ;;  %v935_v60 = vor.u32 %v1081_v52, %v934_v50  ;;  %v790_v62 = vld [vmem:[%s1159_s17 + $0x8] sm:$0xf] }
  0x38   : > { %246 = vperm.xlu0 %1115, %v238_v33   ;;  %v936_v58 = vld [vmem:[%s1159_s17 + $0x138] sm:$0xf0]  ;;  %v811_v61 = vor.u32 %v1047_v53, %v808_v55  ;;  %v1045_v63 = vld [vmem:[%s1159_s17 + $0x14] sm:$0xf0]  ;;  %v918_v0 = vld [vmem:[%s1159_s17 + $0x108] sm:$0xf] }
  0x39   : > { %637 = vmatpush.bf16.msrb.mxu0 %v871_v6  ;;  %v939_v1 = vor.u32 %v1079_v56, %v936_v58  ;;  %v1077_v2 = vld [vmem:[%s1159_s17 + $0x114] sm:$0xf0]  ;;  %v1043_v3 = vld [vmem:[%s1159_s17 + $0xc] sm:$0xf]  ;;  %v792_v4 = vld [vmem:[%s1159_s17 + $0x18] sm:$0xf0]  ;;  %v791_v7 = vor.u32 %v1045_v63, %v790_v62 }
  0x3a   : > { %651 = vmatpush.bf16.msrb.mxu1 %v999_v8  ;;  %665 = vmatpush.bf16.msrb.mxu2 %v875_v9  ;;  %v1075_v5 = vld [vmem:[%s1159_s17 + $0x10c] sm:$0xf]  ;;  %v920_v6 = vld [vmem:[%s1159_s17 + $0x118] sm:$0xf0]  ;;  %v919_v8 = vor.u32 %v1077_v2, %v918_v0  ;;  %v795_v9 = vor.u32 %v1043_v3, %v792_v4 }
  0x3b   : > { %679 = vmatpush.bf16.msrb.mxu3 %v1003_v13  ;;  %v923_v10 = vor.u32 %v1075_v5, %v920_v6 }
  0x3d   : > { %638 = vmatpush.bf16.msrb.mxu0 %v855_v20 }
  0x3e   : > { %652 = vmatpush.bf16.msrb.mxu1 %v983_v21  ;;  %666 = vmatpush.bf16.msrb.mxu2 %v859_v22 }
  0x3f   : > { %680 = vmatpush.bf16.msrb.mxu3 %v987_v26 }
  0x41   : > { %639 = vmatpush.bf16.msrb.mxu0 %v839_v32 }
  0x42   : > { %653 = vmatpush.bf16.msrb.mxu1 %v967_v34  ;;  %667 = vmatpush.bf16.msrb.mxu2 %v843_v35 }
  0x43   : > { %681 = vmatpush.bf16.msrb.mxu3 %v971_v39 }
  0x45   : > { %640 = vmatpush.bf16.msrb.mxu0 %v823_v45 }
  0x46   : > { %654 = vmatpush.bf16.msrb.mxu1 %v951_v46  ;;  %668 = vmatpush.bf16.msrb.mxu2 %v827_v47 }
  0x47   : > { %682 = vmatpush.bf16.msrb.mxu3 %v955_v51 }
  0x49   : > { %641 = vmatpush.bf16.msrb.mxu0 %v807_v59 }
  0x4a   : > { %655 = vmatpush.bf16.msrb.mxu1 %v935_v60  ;;  %669 = vmatpush.bf16.msrb.mxu2 %v811_v61 }
  0x4b   : > { %683 = vmatpush.bf16.msrb.mxu3 %v939_v1 }
  0x4d   : > { %642 = vmatpush.bf16.msrb.mxu0 %v791_v7 }
  0x4e   : > { %656 = vmatpush.bf16.msrb.mxu1 %v919_v8  ;;  %670 = vmatpush.bf16.msrb.mxu2 %v795_v9 }
  0x4f   : > { %684 = vmatpush.bf16.msrb.mxu3 %v923_v10 }
  0x50   : > { %643 = vmatmul.bf16.vlgmr.msrb.gmra.mxu0 %v1251_v54 }
  0x51   : > { %657 = vmatmul.bf16.vlgmr.msrb.gmra.mxu1 %v1255_v57  ;;  %671 = vmatmul.bf16.vlgmr.msrb.gmra.mxu2 %v1251_v54 }
  0x52   : > { %685 = vmatmul.bf16.vlgmr.msrb.gmra.mxu3 %v1255_v57 }
  0xa2   : > { %v242_v11 = vpop.permute.xlu0 %241 }
  0xaa   : > { %v247_v19 = vpop.permute.xlu0 %246 }
  0xad   : > { %v588_v12 = vpop.f32.mrf.mxu0 }
  0xae   : > { %v589_v13 = vadd.f32 %v588_v12, %v242_v11 }
  0xb0   : > { %v602_v14 = vpop.f32.mrf.mxu1 }
  0xb1   : > { %v603_v15 = vadd.f32 %v602_v14, %v589_v13 }
  0xb3   : > { %v691_v17 = vmax.f32 %v603_v15, 0.0 }
  0xb4   : > { %v616_v16 = vpop.f32.mrf.mxu2 }
  0xb5   : > { %v617_v18 = vadd.f32 %v616_v16, %v242_v11  ;;  %699 = vst [vmem:[%s1323_s6] sm:$0xff] %v691_v17  ;;  %v590_v20 = vpop.f32.mrf.mxu0 }
  0xb6   : > { %v591_v21 = vadd.f32 %v590_v20, %v247_v19 }
  0xb7   : > { %v630_v54 = vpop.f32.mrf.mxu3 }
  0xb8   : > { %v631_v57 = vadd.f32 %v630_v54, %v617_v18  ;;  %v604_v22 = vpop.f32.mrf.mxu1 }
  0xb9   : > { %v605_v24 = vadd.f32 %v604_v22, %v591_v21 }
  0xba   : > { %v692_v23 = vmax.f32 %v631_v57, 0.0 }
  0xbb   : > { %v695_v26 = vmax.f32 %v605_v24, 0.0 }
  0xbc   : > { %700 = vst [vmem:[%s1323_s6 + $0x8] sm:$0xff] %v692_v23  ;;  %v618_v25 = vpop.f32.mrf.mxu2 }
  0xbd   : > { %v619_v27 = vadd.f32 %v618_v25, %v247_v19  ;;  %704 = vst [vmem:[%s1323_s6 + $0x20] sm:$0xff] %v695_v26 }
  0xbf   : > { %v632_v28 = vpop.f32.mrf.mxu3 }
  0xc0   : > { %v633_v29 = vadd.f32 %v632_v28, %v619_v27 }
  0xc2   : > { %v696_v30 = vmax.f32 %v633_v29, 0.0 }
  0xc4   : > { %705 = vst [vmem:[%s1323_s6 + $0x28] sm:$0xff] %v696_v30 }
  0xcd   : > { %v644_v31 = vpop.f32.mrf.mxu0 }
  0xce   : > { %v645_v32 = vadd.f32 %v644_v31, %v242_v11  ;;  %v658_v33 = vpop.f32.mrf.mxu1 }
  0xd0   : > { %v659_v34 = vadd.f32 %v658_v33, %v645_v32 }
  0xd2   : > { %v693_v35 = vmax.f32 %v659_v34, 0.0 }
  0xd4   : > { %701 = vst [vmem:[%s1323_s6 + $0x10] sm:$0xff] %v693_v35  ;;  %v672_v36 = vpop.f32.mrf.mxu2 }
  0xd5   : > { %v673_v37 = vadd.f32 %v672_v36, %v242_v11  ;;  %v686_v38 = vpop.f32.mrf.mxu3  ;;  %v646_v39 = vpop.f32.mrf.mxu0 }
  0xd6   : > { %v647_v40 = vadd.f32 %v646_v39, %v247_v19  ;;  %v660_v42 = vpop.f32.mrf.mxu1 }
  0xd7   : > { %v687_v41 = vadd.f32 %v686_v38, %v673_v37 }
  0xd8   : > { %v661_v43 = vadd.f32 %v660_v42, %v647_v40 }
  0xd9   : > { %v694_v44 = vmax.f32 %v687_v41, 0.0 }
  0xda   : > { %v697_v45 = vmax.f32 %v661_v43, 0.0 }
  0xdb   : > { %703 = vst.msk [vmem:[%s1323_s6 + $0x18] sm:$0xff] %vm702_vm0, %v694_v44 }
  0xdc   : > { %706 = vst [vmem:[%s1323_s6 + $0x30] sm:$0xff] %v697_v45  ;;  %v674_v46 = vpop.f32.mrf.mxu2 }
  0xdd   : > { %v675_v47 = vadd.f32 %v674_v46, %v247_v19  ;;  %v688_v48 = vpop.f32.mrf.mxu3 }
  0xdf   : > { %v689_v49 = vadd.f32 %v688_v48, %v675_v47 }
  0xe1   : > { %v698_v50 = vmax.f32 %v689_v49, 0.0 }
  0xe3   : > { %707 = vst.msk [vmem:[%s1323_s6 + $0x38] sm:$0xff] %vm702_vm0, %v698_v50 }
  0xe4 PF: > { %s13_s12 = sadd.s32 1, %s1122_s12  }
  0xe5   : > { %p10_p4 = scmp.ge.s32.totalorder %s13_s12, 4  }
  0xe7   :  { %12 = sbr.rel (!%p10_p4) target bundleno = 1 (0x1), region = 62 }

// kernel: nipsnet_forward.4
= control target key start
LH: loop header
LB: loop body
LE: loop exit
PB: predicated region body
PF: predicated region fallthrough
CT: control target
= control target key end

     0   :  { %s618_s12 = smov 0   ;;  %s697_s0 = inlined_call_operand.vmem [shape: bf16[2,256,81], index: 0, kind: input, shape index: {}]   ;;  %s698_s1 = inlined_call_operand.vmem [shape: bf16[32,256], index: 1, kind: input, shape index: {}]   ;;  %s699_s2 = inlined_call_operand.vmem [shape: f32[32,1], index: 2, kind: input, shape index: {}]   ;;  %s700_s3 = inlined_call_operand.vmem [shape: f32[2,32,81], index: 3, kind: output, shape index: {}]  }
   0x1 LB: > { %s449_s13 = sadd.s32 4294967295, %s595_s12   ;;  %p453_p0 = scmp.ge.s32.totalorder %s595_s12, 1  ;;  %s595_s12 = sphi %s618_s12, %s13_s12  }
   0x2   : > { %p137_p1 = scmp.lt.s32.totalorder %s595_s12, 3 }
   0x4   : > { %p138_p2 = pnand %p453_p0, %p137_p1 }
   0x5   : > { %p161_p3 = scmp.lt.s32.totalorder (!%p138_p2), %s449_s13, 1 }
   0x6   : > { %141 = sbr.rel (%p138_p2) target bundleno = 193 (0xc1), region = 32 }
   0xb   : > { %s702_s13 = smov (!%p161_p3, %s449_s13), 1  ;;  %v597_v4 = vmov 0   ;;  %v209_v7 = vld [vmem:[%s699_s2 + $0x10] sm:$0xff]  ;;  %v207_v8 = vld [vmem:[%s699_s2] sm:$0xff]  ;;  %v210_v11 = vld [vmem:[%s699_s2 + $0x18] sm:$0xff]  ;;  %vm389_vm0 = vcmask 662528  }
   0xc   : > { %s540_s14 = sshll.u32 %s702_s13, 7  ;;  %588 = vset.pattern.permute.xlu1 %v597_v4  ;;  %587 = vset.pattern.permute.xlu0 %v597_v4  ;;  %v208_v12 = vld [vmem:[%s699_s2 + $0x8] sm:$0xff]  ;;  %v460_v19 = vld [vmem:[%s698_s1] sm:$0xf]  ;;  %v468_v22 = vld [vmem:[%s698_s1 + $0x10] sm:$0xf] }
   0xd   : > { %s632_s17 = scalar_lea.vmem %s697_s0, %s540_s14  ;;  %223 = vperm.xlu1 %588, %v209_v7   ;;  %213 = vperm.xlu0 %587, %v207_v8   ;;  %v543_v21 = vld [vmem:[%s698_s1 + $0x4] sm:$0xf0]  ;;  %v545_v24 = vld [vmem:[%s698_s1 + $0x14] sm:$0xf0]  ;;  %v542_v25 = vld [vmem:[%s698_s1 + $0x4] sm:$0xf] }
   0xe   : > { %v553_v0 = vld [vmem:[%s632_s17 + $0x38] sm:$0xff]  ;;  %v552_v2 = vld [vmem:[%s632_s17 + $0x30] sm:$0xff]  ;;  %v551_v5 = vld [vmem:[%s632_s17 + $0x28] sm:$0xff]  ;;  %v461_v29 = vor.u32 %v543_v21, %v460_v19  ;;  %v469_v30 = vor.u32 %v545_v24, %v468_v22 }
   0xf   : > { %v561_v1 = vld [vmem:[%s632_s17 + $0x78] sm:$0xff]  ;;  %347 = vmatpush.bf16.msra.mxu0 %v553_v0  ;;  %562 = vmatpush.bf16.msra.mxu2 %v553_v0  ;;  %v560_v3 = vld [vmem:[%s632_s17 + $0x70] sm:$0xff]  ;;  %v559_v6 = vld [vmem:[%s632_s17 + $0x68] sm:$0xff] }
  0x10   : > { %366 = vmatpush.bf16.msra.mxu1 %v561_v1  ;;  %570 = vmatpush.bf16.msra.mxu3 %v561_v1  ;;  %v550_v9 = vld [vmem:[%s632_s17 + $0x20] sm:$0xff]  ;;  %v549_v13 = vld [vmem:[%s632_s17 + $0x18] sm:$0xff]  ;;  %v548_v15 = vld [vmem:[%s632_s17 + $0x10] sm:$0xff] }
  0x11   : > { %v558_v10 = vld [vmem:[%s632_s17 + $0x60] sm:$0xff]  ;;  %v557_v14 = vld [vmem:[%s632_s17 + $0x58] sm:$0xff]  ;;  %v556_v16 = vld [vmem:[%s632_s17 + $0x50] sm:$0xff] }
  0x12   : > { %v547_v17 = vld [vmem:[%s632_s17 + $0x8] sm:$0xff]  ;;  %v546_v20 = vld [vmem:[%s632_s17] sm:$0xff]  ;;  %v544_v27 = vld [vmem:[%s698_s1 + $0x14] sm:$0xf] }
  0x13   : > { %348 = vmatpush.bf16.msra.mxu0 %v552_v2  ;;  %563 = vmatpush.bf16.msra.mxu2 %v552_v2  ;;  %v555_v18 = vld [vmem:[%s632_s17 + $0x48] sm:$0xff]  ;;  %v554_v23 = vld [vmem:[%s632_s17 + $0x40] sm:$0xff]  ;;  %v470_v28 = vld [vmem:[%s698_s1 + $0x18] sm:$0xf0]  ;;  %s541_s17 = sshll.u32 %s702_s13, 5 }
  0x14   : > { %367 = vmatpush.bf16.msra.mxu1 %v560_v3  ;;  %571 = vmatpush.bf16.msra.mxu3 %v560_v3  ;;  %v462_v26 = vld [vmem:[%s698_s1 + $0x8] sm:$0xf0]  ;;  %v473_v32 = vor.u32 %v544_v27, %v470_v28  ;;  %s170_s20 = scalar_lea.vmem %s700_s3, %s541_s17 }
  0x15   : > { %228 = vperm.xlu1 %588, %v210_v11   ;;  %218 = vperm.xlu0 %587, %v208_v12   ;;  %v465_v31 = vor.u32 %v542_v25, %v462_v26 }
  0x17   : > { %349 = vmatpush.bf16.msra.mxu0 %v551_v5  ;;  %564 = vmatpush.bf16.msra.mxu2 %v551_v5 }
  0x18   : > { %368 = vmatpush.bf16.msra.mxu1 %v559_v6  ;;  %572 = vmatpush.bf16.msra.mxu3 %v559_v6 }
  0x1b   : > { %350 = vmatpush.bf16.msra.mxu0 %v550_v9  ;;  %565 = vmatpush.bf16.msra.mxu2 %v550_v9 }
  0x1c   : > { %369 = vmatpush.bf16.msra.mxu1 %v558_v10  ;;  %573 = vmatpush.bf16.msra.mxu3 %v558_v10 }
  0x1f   : > { %351 = vmatpush.bf16.msra.mxu0 %v549_v13  ;;  %566 = vmatpush.bf16.msra.mxu2 %v549_v13 }
  0x20   : > { %370 = vmatpush.bf16.msra.mxu1 %v557_v14  ;;  %574 = vmatpush.bf16.msra.mxu3 %v557_v14 }
  0x23   : > { %352 = vmatpush.bf16.msra.mxu0 %v548_v15  ;;  %567 = vmatpush.bf16.msra.mxu2 %v548_v15 }
  0x24   : > { %371 = vmatpush.bf16.msra.mxu1 %v556_v16  ;;  %575 = vmatpush.bf16.msra.mxu3 %v556_v16 }
  0x27   : > { %353 = vmatpush.bf16.msra.mxu0 %v547_v17  ;;  %568 = vmatpush.bf16.msra.mxu2 %v547_v17 }
  0x28   : > { %372 = vmatpush.bf16.msra.mxu1 %v555_v18  ;;  %576 = vmatpush.bf16.msra.mxu3 %v555_v18 }
  0x2b   : > { %354 = vmatpush.bf16.msra.mxu0 %v546_v20  ;;  %569 = vmatpush.bf16.msra.mxu2 %v546_v20 }
  0x2c   : > { %373 = vmatpush.bf16.msra.mxu1 %v554_v23  ;;  %577 = vmatpush.bf16.msra.mxu3 %v554_v23 }
  0x2e   : > { %355 = vmatmul.bf16.vlgmr.msra.gmra.mxu0 %v461_v29  ;;  %360 = vmatmul.bf16.vlgmr.msra.gmra.mxu2 %v469_v30 }
  0x2f   : > { %374 = vmatmul.bf16.vlgmr.msra.gmra.mxu1 %v465_v31  ;;  %379 = vmatmul.bf16.vlgmr.msra.gmra.mxu3 %v473_v32 }
  0x7f   : > { %v214_v33 = vpop.permute.xlu0 %213  ;;  %v224_v38 = vpop.permute.xlu1 %223 }
  0x87   : > { %v219_v43 = vpop.permute.xlu0 %218  ;;  %v229_v51 = vpop.permute.xlu1 %228 }
  0xab   : > { %v356_v34 = vpop.f32.mrf.mxu0 }
  0xac   : > { %v357_v35 = vadd.f32 %v356_v34, %v214_v33  ;;  %v375_v36 = vpop.f32.mrf.mxu1 }
  0xae   : > { %v376_v37 = vadd.f32 %v375_v36, %v357_v35 }
  0xb0   : > { %v385_v39 = vmax.f32 %v376_v37, 0.0 }
  0xb1   : > { %v361_v40 = vpop.f32.mrf.mxu2 }
  0xb2   : > { %390 = vst.msk [vmem:[%s170_s20] sm:$0xff] %vm389_vm0, %v385_v39  ;;  %v362_v41 = vadd.f32 %v361_v40, %v224_v38  ;;  %v380_v42 = vpop.f32.mrf.mxu3 }
  0xb3   : > { %v358_v44 = vpop.f32.mrf.mxu0 }
  0xb4   : > { %v381_v45 = vadd.f32 %v380_v42, %v362_v41  ;;  %v359_v46 = vadd.f32 %v358_v44, %v219_v43  ;;  %v377_v47 = vpop.f32.mrf.mxu1 }
  0xb6   : > { %v387_v48 = vmax.f32 %v381_v45, 0.0  ;;  %v378_v49 = vadd.f32 %v377_v47, %v359_v46 }
  0xb8   : > { %392 = vst.msk [vmem:[%s170_s20 + $0x10] sm:$0xff] %vm389_vm0, %v387_v48  ;;  %v386_v50 = vmax.f32 %v378_v49, 0.0 }
  0xb9   : > { %v363_v52 = vpop.f32.mrf.mxu2 }
  0xba   : > { %391 = vst.msk [vmem:[%s170_s20 + $0x8] sm:$0xff] %vm389_vm0, %v386_v50  ;;  %v364_v53 = vadd.f32 %v363_v52, %v229_v51  ;;  %v382_v54 = vpop.f32.mrf.mxu3 }
  0xbc   : > { %v383_v55 = vadd.f32 %v382_v54, %v364_v53 }
  0xbe   : > { %v388_v56 = vmax.f32 %v383_v55, 0.0 }
  0xc0   : > { %393 = vst.msk [vmem:[%s170_s20 + $0x18] sm:$0xff] %vm389_vm0, %v388_v56 }
  0xc1 PF: > { %s13_s12 = sadd.s32 1, %s595_s12  }
  0xc2   : > { %p10_p4 = scmp.ge.s32.totalorder %s13_s12, 4  }
  0xc4   :  { %12 = sbr.rel (!%p10_p4) target bundleno = 1 (0x1), region = 62 }

// kernel: nipsnet_forward.5
= control target key start
LH: loop header
LB: loop body
LE: loop exit
PB: predicated region body
PF: predicated region fallthrough
CT: control target
= control target key end

     0   :  { %12 = vsyncpa [#allocation3], 0  ;;  %s6697_s0 = inlined_call_operand.vmem [shape: bf16[2,2592], index: 0, kind: input, shape index: {}]   ;;  %s6698_s1 = inlined_call_operand.vmem [shape: bf16[2592,256], index: 1, kind: input, shape index: {}]   ;;  %s6699_s2 = inlined_call_operand.vmem [shape: f32[1,256], index: 2, kind: input, shape index: {}]   ;;  %s6700_s3 = inlined_call_operand.vmem [shape: bf16[256,6], index: 3, kind: input, shape index: {}]   ;;  %s6701_s4 = inlined_call_operand.vmem [shape: f32[1,6], index: 4, kind: input, shape index: {}]   ;;  %s6702_s5 = inlined_call_operand.hbm [shape: f32[2,256], index: 5, kind: output, shape index: {0}]   ;;  %s6703_s6 = inlined_call_operand.hbm [shape: f32[2,6], index: 6, kind: output, shape index: {1}]  }
   0x1   :  { %v2835_v0 = vld [vmem:[%s6698_s1 + $0x70] sm:$0xf]  ;;  %v4154_v1 = vld [vmem:[%s6698_s1 + $0x74] sm:$0xf0]  ;;  %v2827_v11 = vld [vmem:[%s6698_s1 + $0x60] sm:$0xf] }
   0x2   :  { %v2899_v2 = vld [vmem:[%s6698_s1 + $0xf0] sm:$0xf]  ;;  %v2836_v3 = vor.u32 %v4154_v1, %v2835_v0  ;;  %v4170_v4 = vld [vmem:[%s6698_s1 + $0xf4] sm:$0xf0]  ;;  %v4152_v13 = vld [vmem:[%s6698_s1 + $0x64] sm:$0xf0] }
   0x3   :  { %v2963_v5 = vld [vmem:[%s6698_s1 + $0x170] sm:$0xf]  ;;  %v4186_v6 = vld [vmem:[%s6698_s1 + $0x174] sm:$0xf0]  ;;  %v2900_v7 = vor.u32 %v4170_v4, %v2899_v2  ;;  %v2891_v14 = vld [vmem:[%s6698_s1 + $0xe0] sm:$0xf]  ;;  %v2828_v16 = vor.u32 %v4152_v13, %v2827_v11 }
   0x4   :  { %v2964_v8 = vor.u32 %v4186_v6, %v2963_v5  ;;  %v3027_v9 = vld [vmem:[%s6698_s1 + $0x1f0] sm:$0xf]  ;;  %v4202_v10 = vld [vmem:[%s6698_s1 + $0x1f4] sm:$0xf0]  ;;  %2028 = vmatpush.bf16.msra.mxu0 %v2836_v3  ;;  %v4168_v15 = vld [vmem:[%s6698_s1 + $0xe4] sm:$0xf0] }
   0x5   :  { %v3028_v12 = vor.u32 %v4202_v10, %v3027_v9  ;;  %2041 = vmatpush.bf16.msra.mxu1 %v2900_v7  ;;  %v2892_v17 = vor.u32 %v4168_v15, %v2891_v14  ;;  %v2955_v18 = vld [vmem:[%s6698_s1 + $0x160] sm:$0xf]  ;;  %v4184_v19 = vld [vmem:[%s6698_s1 + $0x164] sm:$0xf0]  ;;  %v2819_v23 = vld [vmem:[%s6698_s1 + $0x50] sm:$0xf] }
   0x6   :  { %2054 = vmatpush.bf16.msra.mxu2 %v2964_v8  ;;  %v3019_v20 = vld [vmem:[%s6698_s1 + $0x1e0] sm:$0xf]  ;;  %v2956_v21 = vor.u32 %v4184_v19, %v2955_v18  ;;  %v4200_v22 = vld [vmem:[%s6698_s1 + $0x1e4] sm:$0xf0]  ;;  %v4150_v24 = vld [vmem:[%s6698_s1 + $0x54] sm:$0xf0] }
   0x7   :  { %2067 = vmatpush.bf16.msra.mxu3 %v3028_v12  ;;  %v3020_v25 = vor.u32 %v4200_v22, %v3019_v20  ;;  %v2883_v26 = vld [vmem:[%s6698_s1 + $0xd0] sm:$0xf]  ;;  %v4166_v27 = vld [vmem:[%s6698_s1 + $0xd4] sm:$0xf0]  ;;  %v2820_v29 = vor.u32 %v4150_v24, %v2819_v23  ;;  %v2811_v35 = vld [vmem:[%s6698_s1 + $0x40] sm:$0xf] }
   0x8   :  { %v2947_v28 = vld [vmem:[%s6698_s1 + $0x150] sm:$0xf]  ;;  %2029 = vmatpush.bf16.msra.mxu0 %v2828_v16  ;;  %v4182_v30 = vld [vmem:[%s6698_s1 + $0x154] sm:$0xf0]  ;;  %v2884_v33 = vor.u32 %v4166_v27, %v2883_v26  ;;  %v4148_v36 = vld [vmem:[%s6698_s1 + $0x44] sm:$0xf0] }
   0x9   :  { %v3011_v31 = vld [vmem:[%s6698_s1 + $0x1d0] sm:$0xf]  ;;  %v4198_v32 = vld [vmem:[%s6698_s1 + $0x1d4] sm:$0xf0]  ;;  %2042 = vmatpush.bf16.msra.mxu1 %v2892_v17  ;;  %v2948_v34 = vor.u32 %v4182_v30, %v2947_v28  ;;  %v2875_v37 = vld [vmem:[%s6698_s1 + $0xc0] sm:$0xf]  ;;  %v2812_v44 = vor.u32 %v4148_v36, %v2811_v35 }
   0xa   :  { %2055 = vmatpush.bf16.msra.mxu2 %v2956_v21  ;;  %v3012_v38 = vor.u32 %v4198_v32, %v3011_v31  ;;  %v4164_v39 = vld [vmem:[%s6698_s1 + $0xc4] sm:$0xf0]  ;;  %v2939_v40 = vld [vmem:[%s6698_s1 + $0x140] sm:$0xf]  ;;  %v2803_v47 = vld [vmem:[%s6698_s1 + $0x30] sm:$0xf] }
   0xb   :  { %2068 = vmatpush.bf16.msra.mxu3 %v3020_v25  ;;  %v4180_v41 = vld [vmem:[%s6698_s1 + $0x144] sm:$0xf0]  ;;  %v3003_v42 = vld [vmem:[%s6698_s1 + $0x1c0] sm:$0xf]  ;;  %v2876_v45 = vor.u32 %v4164_v39, %v2875_v37  ;;  %v4146_v48 = vld [vmem:[%s6698_s1 + $0x34] sm:$0xf0] }
   0xc   :  { %v4196_v43 = vld [vmem:[%s6698_s1 + $0x1c4] sm:$0xf0]  ;;  %2030 = vmatpush.bf16.msra.mxu0 %v2820_v29  ;;  %v2940_v46 = vor.u32 %v4180_v41, %v2939_v40  ;;  %v2867_v49 = vld [vmem:[%s6698_s1 + $0xb0] sm:$0xf]  ;;  %v4162_v51 = vld [vmem:[%s6698_s1 + $0xb4] sm:$0xf0]  ;;  %v2804_v56 = vor.u32 %v4146_v48, %v2803_v47 }
   0xd   :  { %2043 = vmatpush.bf16.msra.mxu1 %v2884_v33  ;;  %v3004_v50 = vor.u32 %v4196_v43, %v3003_v42  ;;  %v2931_v52 = vld [vmem:[%s6698_s1 + $0x130] sm:$0xf]  ;;  %v4178_v53 = vld [vmem:[%s6698_s1 + $0x134] sm:$0xf0]  ;;  %v2868_v57 = vor.u32 %v4162_v51, %v2867_v49  ;;  %v2795_v59 = vld [vmem:[%s6698_s1 + $0x20] sm:$0xf] }
   0xe   :  { %2056 = vmatpush.bf16.msra.mxu2 %v2948_v34  ;;  %v2995_v54 = vld [vmem:[%s6698_s1 + $0x1b0] sm:$0xf]  ;;  %v4194_v55 = vld [vmem:[%s6698_s1 + $0x1b4] sm:$0xf0]  ;;  %v2932_v58 = vor.u32 %v4178_v53, %v2931_v52  ;;  %v4144_v60 = vld [vmem:[%s6698_s1 + $0x24] sm:$0xf0] }
   0xf   :  { %2069 = vmatpush.bf16.msra.mxu3 %v3012_v38  ;;  %v2859_v61 = vld [vmem:[%s6698_s1 + $0xa0] sm:$0xf]  ;;  %v2996_v62 = vor.u32 %v4194_v55, %v2995_v54  ;;  %v4160_v63 = vld [vmem:[%s6698_s1 + $0xa4] sm:$0xf0]  ;;  %v2796_v4 = vor.u32 %v4144_v60, %v2795_v59  ;;  %v2787_v7 = vld [vmem:[%s6698_s1 + $0x10] sm:$0xf] }
  0x10   :  { %2031 = vmatpush.bf16.msra.mxu0 %v2812_v44  ;;  %v2923_v0 = vld [vmem:[%s6698_s1 + $0x120] sm:$0xf]  ;;  %v4176_v1 = vld [vmem:[%s6698_s1 + $0x124] sm:$0xf0]  ;;  %v2860_v5 = vor.u32 %v4160_v63, %v2859_v61  ;;  %v4142_v8 = vld [vmem:[%s6698_s1 + $0x14] sm:$0xf0] }
  0x11   :  { %2044 = vmatpush.bf16.msra.mxu1 %v2876_v45  ;;  %v2987_v2 = vld [vmem:[%s6698_s1 + $0x1a0] sm:$0xf]  ;;  %v4192_v3 = vld [vmem:[%s6698_s1 + $0x1a4] sm:$0xf0]  ;;  %v2924_v6 = vor.u32 %v4176_v1, %v2923_v0  ;;  %v2851_v9 = vld [vmem:[%s6698_s1 + $0x90] sm:$0xf]  ;;  %v2788_v16 = vor.u32 %v4142_v8, %v2787_v7 }
  0x12   :  { %2057 = vmatpush.bf16.msra.mxu2 %v2940_v46  ;;  %v2988_v10 = vor.u32 %v4192_v3, %v2987_v2  ;;  %v4158_v11 = vld [vmem:[%s6698_s1 + $0x94] sm:$0xf0]  ;;  %v2915_v12 = vld [vmem:[%s6698_s1 + $0x110] sm:$0xf]  ;;  %v2779_v17 = vld [vmem:[%s6698_s1] sm:$0xf] }
  0x13   :  { %2070 = vmatpush.bf16.msra.mxu3 %v3004_v50  ;;  %v4174_v13 = vld [vmem:[%s6698_s1 + $0x114] sm:$0xf0]  ;;  %v2979_v14 = vld [vmem:[%s6698_s1 + $0x190] sm:$0xf]  ;;  %v4140_v18 = vld [vmem:[%s6698_s1 + $0x4] sm:$0xf0]  ;;  %v2852_v19 = vor.u32 %v4158_v11, %v2851_v9 }
  0x14   :  { %2032 = vmatpush.bf16.msra.mxu0 %v2804_v56  ;;  %v4190_v15 = vld [vmem:[%s6698_s1 + $0x194] sm:$0xf0]  ;;  %v2916_v20 = vor.u32 %v4174_v13, %v2915_v12  ;;  %v2843_v21 = vld [vmem:[%s6698_s1 + $0x80] sm:$0xf]  ;;  %v4156_v22 = vld [vmem:[%s6698_s1 + $0x84] sm:$0xf0]  ;;  %v2780_v31 = vor.u32 %v4140_v18, %v2779_v17 }
  0x15   :  { %2045 = vmatpush.bf16.msra.mxu1 %v2868_v57  ;;  %v2907_v23 = vld [vmem:[%s6698_s1 + $0x100] sm:$0xf]  ;;  %v2980_v24 = vor.u32 %v4190_v15, %v2979_v14  ;;  %v4172_v25 = vld [vmem:[%s6698_s1 + $0x104] sm:$0xf0]  ;;  %v3091_v28 = vld [vmem:[%s6698_s1 + $0x270] sm:$0xf]  ;;  %v2844_v35 = vor.u32 %v4156_v22, %v2843_v21 }
  0x16   :  { %2058 = vmatpush.bf16.msra.mxu2 %v2932_v58  ;;  %v2971_v26 = vld [vmem:[%s6698_s1 + $0x180] sm:$0xf]  ;;  %v4188_v27 = vld [vmem:[%s6698_s1 + $0x184] sm:$0xf0]  ;;  %v4218_v29 = vld [vmem:[%s6698_s1 + $0x274] sm:$0xf0]  ;;  %v2908_v36 = vor.u32 %v4172_v25, %v2907_v23 }
  0x17   :  { %2071 = vmatpush.bf16.msra.mxu3 %v2996_v62  ;;  %v3155_v30 = vld [vmem:[%s6698_s1 + $0x2f0] sm:$0xf]  ;;  %v4234_v32 = vld [vmem:[%s6698_s1 + $0x2f4] sm:$0xf0]  ;;  %v2972_v39 = vor.u32 %v4188_v27, %v2971_v26  ;;  %v3092_v40 = vor.u32 %v4218_v29, %v3091_v28  ;;  %v3083_v43 = vld [vmem:[%s6698_s1 + $0x260] sm:$0xf] }
  0x18   :  { %2033 = vmatpush.bf16.msra.mxu0 %v2796_v4  ;;  %v3219_v33 = vld [vmem:[%s6698_s1 + $0x370] sm:$0xf]  ;;  %v4250_v34 = vld [vmem:[%s6698_s1 + $0x374] sm:$0xf0]  ;;  %v3156_v41 = vor.u32 %v4234_v32, %v3155_v30  ;;  %v4216_v44 = vld [vmem:[%s6698_s1 + $0x264] sm:$0xf0] }
  0x19   :  { %2046 = vmatpush.bf16.msra.mxu1 %v2860_v5  ;;  %v3283_v37 = vld [vmem:[%s6698_s1 + $0x3f0] sm:$0xf]  ;;  %v4266_v38 = vld [vmem:[%s6698_s1 + $0x3f4] sm:$0xf0]  ;;  %v3220_v42 = vor.u32 %v4250_v34, %v3219_v33  ;;  %v3147_v45 = vld [vmem:[%s6698_s1 + $0x2e0] sm:$0xf]  ;;  %v3084_v52 = vor.u32 %v4216_v44, %v3083_v43 }
  0x1a   :  { %2059 = vmatpush.bf16.msra.mxu2 %v2924_v6  ;;  %v3284_v46 = vor.u32 %v4266_v38, %v3283_v37  ;;  %v4232_v47 = vld [vmem:[%s6698_s1 + $0x2e4] sm:$0xf0]  ;;  %v3211_v48 = vld [vmem:[%s6698_s1 + $0x360] sm:$0xf]  ;;  %v3075_v53 = vld [vmem:[%s6698_s1 + $0x250] sm:$0xf] }
  0x1b   :  { %2072 = vmatpush.bf16.msra.mxu3 %v2988_v10  ;;  %v4248_v49 = vld [vmem:[%s6698_s1 + $0x364] sm:$0xf0]  ;;  %v3275_v50 = vld [vmem:[%s6698_s1 + $0x3e0] sm:$0xf]  ;;  %v4214_v54 = vld [vmem:[%s6698_s1 + $0x254] sm:$0xf0]  ;;  %v3148_v55 = vor.u32 %v4232_v47, %v3147_v45 }
  0x1c   :  { %2034 = vmatpush.bf16.msra.mxu0 %v2788_v16  ;;  %v4264_v51 = vld [vmem:[%s6698_s1 + $0x3e4] sm:$0xf0]  ;;  %v3212_v56 = vor.u32 %v4248_v49, %v3211_v48  ;;  %v3139_v57 = vld [vmem:[%s6698_s1 + $0x2d0] sm:$0xf]  ;;  %v4230_v58 = vld [vmem:[%s6698_s1 + $0x2d4] sm:$0xf0]  ;;  %v3076_v1 = vor.u32 %v4214_v54, %v3075_v53 }
  0x1d   :  { %2047 = vmatpush.bf16.msra.mxu1 %v2852_v19  ;;  %v25_v59 = vld [vmem:[%s6697_s0] sm:$0xff]  ;;  %v3276_v60 = vor.u32 %v4264_v51, %v3275_v50  ;;  %v3203_v61 = vld [vmem:[%s6698_s1 + $0x350] sm:$0xf]  ;;  %v4246_v62 = vld [vmem:[%s6698_s1 + $0x354] sm:$0xf0]  ;;  %v3140_v2 = vor.u32 %v4230_v58, %v3139_v57 }
  0x1e   :  { %2060 = vmatpush.bf16.msra.mxu2 %v2916_v20  ;;  %359 = vst [vmem:[#allocation1] ss:$9 sm:$0xff] %v25_v59  ;;  %v3267_v63 = vld [vmem:[%s6698_s1 + $0x3d0] sm:$0xf]  ;;  %v4262_v0 = vld [vmem:[%s6698_s1 + $0x3d4] sm:$0xf0]  ;;  %v3204_v3 = vor.u32 %v4246_v62, %v3203_v61 }
  0x1f   :  { %2073 = vmatpush.bf16.msra.mxu3 %v2980_v24  ;;  %v3067_v4 = vld [vmem:[%s6698_s1 + $0x240] sm:$0xf]  ;;  %v4212_v5 = vld [vmem:[%s6698_s1 + $0x244] sm:$0xf0]  ;;  %v3268_v7 = vor.u32 %v4262_v0, %v3267_v63  ;;  %v3059_v13 = vld [vmem:[%s6698_s1 + $0x230] sm:$0xf] }
  0x20   :  { %2035 = vmatpush.bf16.msra.mxu0 %v2780_v31  ;;  %v3131_v6 = vld [vmem:[%s6698_s1 + $0x2c0] sm:$0xf]  ;;  %v4228_v8 = vld [vmem:[%s6698_s1 + $0x2c4] sm:$0xf0]  ;;  %v3068_v14 = vor.u32 %v4212_v5, %v3067_v4  ;;  %v4210_v15 = vld [vmem:[%s6698_s1 + $0x234] sm:$0xf0] }
  0x21   :  { %2048 = vmatpush.bf16.msra.mxu1 %v2844_v35  ;;  %v3195_v9 = vld [vmem:[%s6698_s1 + $0x340] sm:$0xf]  ;;  %v4244_v10 = vld [vmem:[%s6698_s1 + $0x344] sm:$0xf0]  ;;  %v3123_v16 = vld [vmem:[%s6698_s1 + $0x2b0] sm:$0xf]  ;;  %v3132_v18 = vor.u32 %v4228_v8, %v3131_v6  ;;  %v3060_v29 = vor.u32 %v4210_v15, %v3059_v13 }
  0x22   :  { %2061 = vmatpush.bf16.msra.mxu2 %v2908_v36  ;;  %v3259_v11 = vld [vmem:[%s6698_s1 + $0x3c0] sm:$0xf]  ;;  %v4260_v12 = vld [vmem:[%s6698_s1 + $0x3c4] sm:$0xf0]  ;;  %v4226_v17 = vld [vmem:[%s6698_s1 + $0x2b4] sm:$0xf0]  ;;  %v3196_v19 = vor.u32 %v4244_v10, %v3195_v9 }
  0x23   :  { %2074 = vmatpush.bf16.msra.mxu3 %v2972_v39  ;;  %v3260_v23 = vor.u32 %v4260_v12, %v3259_v11  ;;  %v3187_v24 = vld [vmem:[%s6698_s1 + $0x330] sm:$0xf]  ;;  %v4242_v25 = vld [vmem:[%s6698_s1 + $0x334] sm:$0xf0]  ;;  %v3051_v30 = vld [vmem:[%s6698_s1 + $0x220] sm:$0xf]  ;;  %v3124_v31 = vor.u32 %v4226_v17, %v3123_v16 }
  0x24   :  { %2080 = vmatpush.bf16.msrb.mxu0 %v3092_v40  ;;  %v3251_v27 = vld [vmem:[%s6698_s1 + $0x3b0] sm:$0xf]  ;;  %v4258_v28 = vld [vmem:[%s6698_s1 + $0x3b4] sm:$0xf0]  ;;  %v3188_v32 = vor.u32 %v4242_v25, %v3187_v24  ;;  %v4208_v33 = vld [vmem:[%s6698_s1 + $0x224] sm:$0xf0] }
  0x25   :  { %2093 = vmatpush.bf16.msrb.mxu1 %v3156_v41  ;;  %v4880_v20 = vld [vmem:[#allocation1 + $0x12] sm:$0xff]  ;;  %v4882_v21 = vld [vmem:[#allocation1] sm:$0xff]  ;;  %v4893_v26 = vld [vmem:[#allocation1 + $0x9] sm:$0xff]  ;;  %v3252_v36 = vor.u32 %v4258_v28, %v3251_v27  ;;  %v3052_v43 = vor.u32 %v4208_v33, %v3051_v30 }
  0x26   :  { %2106 = vmatpush.bf16.msrb.mxu2 %v3220_v42  ;;  %v4884_v22 = vld [vmem:[#allocation1 + $0x1b] sm:$0xff]  ;;  %2036 = vmatmul.bf16.vlgmr.msra.gmra.mxu0 %v4882_v21  ;;  %v4224_v35 = vld [vmem:[%s6698_s1 + $0x2a4] sm:$0xf0]  ;;  %v3043_v41 = vld [vmem:[%s6698_s1 + $0x210] sm:$0xf] }
  0x27   :  { %2119 = vmatpush.bf16.msrb.mxu3 %v3284_v46  ;;  %2062 = vmatmul.bf16.vlgmr.msra.gmra.mxu2 %v4880_v20  ;;  %v3115_v34 = vld [vmem:[%s6698_s1 + $0x2a0] sm:$0xf]  ;;  %v4240_v38 = vld [vmem:[%s6698_s1 + $0x324] sm:$0xf0]  ;;  %v4206_v42 = vld [vmem:[%s6698_s1 + $0x214] sm:$0xf0] }
  0x28   :  { %2081 = vmatpush.bf16.msrb.mxu0 %v3084_v52  ;;  %2075 = vmatmul.bf16.vlgmr.msra.gmra.mxu3 %v4884_v22  ;;  %v3179_v37 = vld [vmem:[%s6698_s1 + $0x320] sm:$0xf]  ;;  %v4256_v40 = vld [vmem:[%s6698_s1 + $0x3a4] sm:$0xf0]  ;;  %v3107_v44 = vld [vmem:[%s6698_s1 + $0x290] sm:$0xf]  ;;  %v3116_v47 = vor.u32 %v4224_v35, %v3115_v34  ;;  %v3044_v58 = vor.u32 %v4206_v42, %v3043_v41 }
  0x29   :  { %2094 = vmatpush.bf16.msrb.mxu1 %v3148_v55  ;;  %v3243_v39 = vld [vmem:[%s6698_s1 + $0x3a0] sm:$0xf]  ;;  %v4222_v45 = vld [vmem:[%s6698_s1 + $0x294] sm:$0xf0]  ;;  %v3171_v46 = vld [vmem:[%s6698_s1 + $0x310] sm:$0xf]  ;;  %v3180_v48 = vor.u32 %v4240_v38, %v3179_v37 }
  0x2a   :  { %2107 = vmatpush.bf16.msrb.mxu2 %v3212_v56  ;;  %2049 = vmatmul.bf16.vlgmr.msra.gmra.mxu1 %v4893_v26  ;;  %v4238_v49 = vld [vmem:[%s6698_s1 + $0x314] sm:$0xf0]  ;;  %v4948_v51 = vld [vmem:[#allocation1 + $0x24] sm:$0xff]  ;;  %v3244_v52 = vor.u32 %v4256_v40, %v3243_v39  ;;  %v4955_v55 = vld [vmem:[#allocation1 + $0x2d] sm:$0xff]  ;;  %v3108_v61 = vor.u32 %v4222_v45, %v3107_v44 }
  0x2b   :  { %2120 = vmatpush.bf16.msrb.mxu3 %v3276_v60  ;;  %v4946_v50 = vld [vmem:[#allocation1 + $0x36] sm:$0xff]  ;;  %v4950_v53 = vld [vmem:[#allocation1 + $0x3f] sm:$0xff]  ;;  %v26_v54 = vld [vmem:[%s6697_s0 + $0x8] sm:$0xff]  ;;  %v3172_v62 = vor.u32 %v4238_v49, %v3171_v46 }
  0x2c   :  { %2082 = vmatpush.bf16.msrb.mxu0 %v3076_v1  ;;  %v3235_v56 = vld [vmem:[%s6698_s1 + $0x390] sm:$0xf]  ;;  %v4254_v57 = vld [vmem:[%s6698_s1 + $0x394] sm:$0xf0]  ;;  %369 = vst [vmem:[#allocation1] ss:$9 sm:$0xff] %v26_v54 }
  0x2d   :  { %2095 = vmatpush.bf16.msrb.mxu1 %v3140_v2  ;;  %v3035_v59 = vld [vmem:[%s6698_s1 + $0x200] sm:$0xf]  ;;  %v4204_v60 = vld [vmem:[%s6698_s1 + $0x204] sm:$0xf0]  ;;  %v3236_v2 = vor.u32 %v4254_v57, %v3235_v56  ;;  %v3347_v6 = vld [vmem:[%s6698_s1 + $0x470] sm:$0xf] }
  0x2e   :  { %2108 = vmatpush.bf16.msrb.mxu2 %v3204_v3  ;;  %v3099_v63 = vld [vmem:[%s6698_s1 + $0x280] sm:$0xf]  ;;  %v4220_v0 = vld [vmem:[%s6698_s1 + $0x284] sm:$0xf0]  ;;  %v3411_v8 = vld [vmem:[%s6698_s1 + $0x4f0] sm:$0xf]  ;;  %v3036_v9 = vor.u32 %v4204_v60, %v3035_v59 }
  0x2f   :  { %2121 = vmatpush.bf16.msrb.mxu3 %v3268_v7  ;;  %v3163_v1 = vld [vmem:[%s6698_s1 + $0x300] sm:$0xf]  ;;  %v4236_v3 = vld [vmem:[%s6698_s1 + $0x304] sm:$0xf0]  ;;  %v4282_v7 = vld [vmem:[%s6698_s1 + $0x474] sm:$0xf0]  ;;  %v3100_v13 = vor.u32 %v4220_v0, %v3099_v63 }
  0x30   :  { %2083 = vmatpush.bf16.msrb.mxu0 %v3068_v14  ;;  %v3227_v4 = vld [vmem:[%s6698_s1 + $0x380] sm:$0xf]  ;;  %v4252_v5 = vld [vmem:[%s6698_s1 + $0x384] sm:$0xf0]  ;;  %v4298_v10 = vld [vmem:[%s6698_s1 + $0x4f4] sm:$0xf0]  ;;  %v3164_v14 = vor.u32 %v4236_v3, %v3163_v1 }
  0x31   :  { %2096 = vmatpush.bf16.msrb.mxu1 %v3132_v18  ;;  %v3475_v11 = vld [vmem:[%s6698_s1 + $0x570] sm:$0xf]  ;;  %v4314_v12 = vld [vmem:[%s6698_s1 + $0x574] sm:$0xf0]  ;;  %v3228_v17 = vor.u32 %v4252_v5, %v3227_v4  ;;  %v3348_v18 = vor.u32 %v4282_v7, %v3347_v6  ;;  %v3339_v24 = vld [vmem:[%s6698_s1 + $0x460] sm:$0xf] }
  0x32   :  { %2109 = vmatpush.bf16.msrb.mxu2 %v3196_v19  ;;  %v3539_v15 = vld [vmem:[%s6698_s1 + $0x5f0] sm:$0xf]  ;;  %v4330_v16 = vld [vmem:[%s6698_s1 + $0x5f4] sm:$0xf0]  ;;  %v3412_v19 = vor.u32 %v4298_v10, %v3411_v8  ;;  %v4280_v25 = vld [vmem:[%s6698_s1 + $0x464] sm:$0xf0] }
  0x33   :  { %2122 = vmatpush.bf16.msrb.mxu3 %v3260_v23  ;;  %v3476_v23 = vor.u32 %v4314_v12, %v3475_v11  ;;  %v3403_v27 = vld [vmem:[%s6698_s1 + $0x4e0] sm:$0xf]  ;;  %v3540_v28 = vor.u32 %v4330_v16, %v3539_v15  ;;  %v4328_v33 = vld [vmem:[%s6698_s1 + $0x5e4] sm:$0xf0]  ;;  %v3340_v34 = vor.u32 %v4280_v25, %v3339_v24  ;;  %v3331_v37 = vld [vmem:[%s6698_s1 + $0x450] sm:$0xf] }
  0x34   :  { %2084 = vmatpush.bf16.msrb.mxu0 %v3060_v29  ;;  %v4296_v29 = vld [vmem:[%s6698_s1 + $0x4e4] sm:$0xf0]  ;;  %v3467_v30 = vld [vmem:[%s6698_s1 + $0x560] sm:$0xf]  ;;  %v4278_v38 = vld [vmem:[%s6698_s1 + $0x454] sm:$0xf0] }
  0x35   :  { %2097 = vmatpush.bf16.msrb.mxu1 %v3124_v31  ;;  %v4312_v31 = vld [vmem:[%s6698_s1 + $0x564] sm:$0xf0]  ;;  %v3404_v35 = vor.u32 %v4296_v29, %v3403_v27  ;;  %v3395_v39 = vld [vmem:[%s6698_s1 + $0x4d0] sm:$0xf]  ;;  %v4294_v41 = vld [vmem:[%s6698_s1 + $0x4d4] sm:$0xf0]  ;;  %v3332_v46 = vor.u32 %v4278_v38, %v3331_v37 }
  0x36   :  { %2110 = vmatpush.bf16.msrb.mxu2 %v3188_v32  ;;  %v3531_v32 = vld [vmem:[%s6698_s1 + $0x5e0] sm:$0xf]  ;;  %v3459_v42 = vld [vmem:[%s6698_s1 + $0x550] sm:$0xf]  ;;  %v4326_v45 = vld [vmem:[%s6698_s1 + $0x5d4] sm:$0xf0] }
  0x37   :  { %2123 = vmatpush.bf16.msrb.mxu3 %v3252_v36  ;;  %v3468_v36 = vor.u32 %v4312_v31, %v3467_v30  ;;  %v3532_v40 = vor.u32 %v4328_v33, %v3531_v32  ;;  %v3523_v44 = vld [vmem:[%s6698_s1 + $0x5d0] sm:$0xf]  ;;  %v3323_v49 = vld [vmem:[%s6698_s1 + $0x440] sm:$0xf]  ;;  %v4292_v57 = vld [vmem:[%s6698_s1 + $0x4c4] sm:$0xf0] }
  0x38   :  { %2085 = vmatpush.bf16.msrb.mxu0 %v3052_v43  ;;  %v4310_v43 = vld [vmem:[%s6698_s1 + $0x554] sm:$0xf0]  ;;  %v3387_v54 = vld [vmem:[%s6698_s1 + $0x4c0] sm:$0xf]  ;;  %v3524_v56 = vor.u32 %v4326_v45, %v3523_v44  ;;  %v4308_v59 = vld [vmem:[%s6698_s1 + $0x544] sm:$0xf0] }
  0x39   :  { %2098 = vmatpush.bf16.msrb.mxu1 %v3116_v47  ;;  %v3396_v47 = vor.u32 %v4294_v41, %v3395_v39  ;;  %v3515_v60 = vld [vmem:[%s6698_s1 + $0x5c0] sm:$0xf]  ;;  %v3388_v63 = vor.u32 %v4292_v57, %v3387_v54  ;;  %v3315_v1 = vld [vmem:[%s6698_s1 + $0x430] sm:$0xf]  ;;  %v4290_v5 = vld [vmem:[%s6698_s1 + $0x4b4] sm:$0xf0] }
  0x3a   :  { %2111 = vmatpush.bf16.msrb.mxu2 %v3180_v48  ;;  %v3460_v48 = vor.u32 %v4310_v43, %v3459_v42  ;;  %v3379_v3 = vld [vmem:[%s6698_s1 + $0x4b0] sm:$0xf]  ;;  %v4306_v7 = vld [vmem:[%s6698_s1 + $0x534] sm:$0xf0]  ;;  %v3371_v15 = vld [vmem:[%s6698_s1 + $0x4a0] sm:$0xf] }
  0x3b   :  { %2124 = vmatpush.bf16.msrb.mxu3 %v3244_v52  ;;  %v4276_v52 = vld [vmem:[%s6698_s1 + $0x444] sm:$0xf0]  ;;  %v3443_v6 = vld [vmem:[%s6698_s1 + $0x530] sm:$0xf]  ;;  %v3380_v11 = vor.u32 %v4290_v5, %v3379_v3  ;;  %v4270_v30 = vld [vmem:[%s6698_s1 + $0x414] sm:$0xf0] }
  0x3c   :  { %2086 = vmatpush.bf16.msrb.mxu0 %v3044_v58  ;;  %v3451_v58 = vld [vmem:[%s6698_s1 + $0x540] sm:$0xf]  ;;  %v3507_v8 = vld [vmem:[%s6698_s1 + $0x5b0] sm:$0xf]  ;;  %v3444_v12 = vor.u32 %v4306_v7, %v3443_v6  ;;  %v4320_v24 = vld [vmem:[%s6698_s1 + $0x5a4] sm:$0xf0] }
  0x3d   :  { %2099 = vmatpush.bf16.msrb.mxu1 %v3108_v61  ;;  %v4324_v61 = vld [vmem:[%s6698_s1 + $0x5c4] sm:$0xf0]  ;;  %v3452_v0 = vor.u32 %v4308_v59, %v3451_v58  ;;  %v3299_v29 = vld [vmem:[%s6698_s1 + $0x410] sm:$0xf]  ;;  %v4286_v33 = vld [vmem:[%s6698_s1 + $0x494] sm:$0xf0] }
  0x3e   :  { %2112 = vmatpush.bf16.msrb.mxu2 %v3172_v62  ;;  %v3324_v62 = vor.u32 %v4276_v52, %v3323_v49  ;;  %v3516_v4 = vor.u32 %v4324_v61, %v3515_v60  ;;  %v3363_v31 = vld [vmem:[%s6698_s1 + $0x490] sm:$0xf]  ;;  %v4318_v37 = vld [vmem:[%s6698_s1 + $0x594] sm:$0xf0]  ;;  %v3300_v38 = vor.u32 %v4270_v30, %v3299_v29  ;;  %v3291_v39 = vld [vmem:[%s6698_s1 + $0x400] sm:$0xf] }
  0x3f   :  { %2125 = vmatpush.bf16.msrb.mxu3 %v3236_v2  ;;  %v4274_v2 = vld [vmem:[%s6698_s1 + $0x434] sm:$0xf0]  ;;  %v3364_v41 = vor.u32 %v4286_v33, %v3363_v31  ;;  %v3355_v43 = vld [vmem:[%s6698_s1 + $0x480] sm:$0xf]  ;;  %v4284_v44 = vld [vmem:[%s6698_s1 + $0x484] sm:$0xf0] }
  0x40   :  { %2087 = vmatpush.bf16.msrb.mxu0 %v3036_v9  ;;  %v4322_v9 = vld [vmem:[%s6698_s1 + $0x5b4] sm:$0xf0]  ;;  %v3316_v10 = vor.u32 %v4274_v2, %v3315_v1  ;;  %v3419_v45 = vld [vmem:[%s6698_s1 + $0x500] sm:$0xf]  ;;  %v4316_v49 = vld [vmem:[%s6698_s1 + $0x584] sm:$0xf0]  ;;  %v3356_v61 = vor.u32 %v4284_v44, %v3355_v43 }
  0x41   :  { %2100 = vmatpush.bf16.msrb.mxu1 %v3100_v13  ;;  %v3307_v13 = vld [vmem:[%s6698_s1 + $0x420] sm:$0xf]  ;;  %v3508_v16 = vor.u32 %v4322_v9, %v3507_v8  ;;  %v3603_v52 = vld [vmem:[%s6698_s1 + $0x670] sm:$0xf]  ;;  %v4346_v54 = vld [vmem:[%s6698_s1 + $0x674] sm:$0xf0] }
  0x42   :  { %2113 = vmatpush.bf16.msrb.mxu2 %v3164_v14  ;;  %v4272_v14 = vld [vmem:[%s6698_s1 + $0x424] sm:$0xf0]  ;;  %v4362_v58 = vld [vmem:[%s6698_s1 + $0x6f4] sm:$0xf0]  ;;  %v3731_v59 = vld [vmem:[%s6698_s1 + $0x770] sm:$0xf]  ;;  %v3604_v2 = vor.u32 %v4346_v54, %v3603_v52 }
  0x43   :  { %2126 = vmatpush.bf16.msrb.mxu3 %v3228_v17  ;;  %2088 = vmatmul.bf16.vlgmr.msrb.gmra.mxu0 %v4948_v51  ;;  %v4288_v17 = vld [vmem:[%s6698_s1 + $0x4a4] sm:$0xf0]  ;;  %v3308_v25 = vor.u32 %v4272_v14, %v3307_v13  ;;  %v4378_v60 = vld [vmem:[%s6698_s1 + $0x774] sm:$0xf0]  ;;  %v3595_v5 = vld [vmem:[%s6698_s1 + $0x660] sm:$0xf] }
  0x44   :  { %2132 = vmatpush.bf16.msra.mxu0 %v3348_v18  ;;  %2101 = vmatmul.bf16.vlgmr.msrb.gmra.mxu1 %v4955_v55  ;;  %v3435_v18 = vld [vmem:[%s6698_s1 + $0x520] sm:$0xf]  ;;  %v3372_v27 = vor.u32 %v4288_v17, %v3371_v15  ;;  %v4344_v6 = vld [vmem:[%s6698_s1 + $0x664] sm:$0xf0]  ;;  %v5233_v15 = vld [vmem:[#allocation1 + $0x12] sm:$0xff] }
  0x45   :  { %2145 = vmatpush.bf16.msra.mxu1 %v3412_v19  ;;  %2114 = vmatmul.bf16.vlgmr.msrb.gmra.mxu2 %v4946_v50  ;;  %v4304_v19 = vld [vmem:[%s6698_s1 + $0x524] sm:$0xf0]  ;;  %v3659_v7 = vld [vmem:[%s6698_s1 + $0x6e0] sm:$0xf]  ;;  %v4358_v29 = vld [vmem:[%s6698_s1 + $0x6d4] sm:$0xf0] }
  0x46   :  { %2158 = vmatpush.bf16.msra.mxu2 %v3476_v23  ;;  %2127 = vmatmul.bf16.vlgmr.msrb.gmra.mxu3 %v4950_v53  ;;  %v3499_v23 = vld [vmem:[%s6698_s1 + $0x5a0] sm:$0xf]  ;;  %v4360_v9 = vld [vmem:[%s6698_s1 + $0x6e4] sm:$0xf0]  ;;  %v3715_v30 = vld [vmem:[%s6698_s1 + $0x750] sm:$0xf] }
  0x47   :  { %2171 = vmatpush.bf16.msra.mxu3 %v3540_v28  ;;  %v3436_v28 = vor.u32 %v4304_v19, %v3435_v18  ;;  %v3500_v32 = vor.u32 %v4320_v24, %v3499_v23  ;;  %v3787_v13 = vld [vmem:[%s6698_s1 + $0x7e0] sm:$0xf]  ;;  %v4392_v14 = vld [vmem:[%s6698_s1 + $0x7e4] sm:$0xf0]  ;;  %v3596_v18 = vor.u32 %v4344_v6, %v3595_v5  ;;  %v3660_v19 = vor.u32 %v4360_v9, %v3659_v7  ;;  %v3587_v24 = vld [vmem:[%s6698_s1 + $0x650] sm:$0xf] }
  0x48   :  { %2133 = vmatpush.bf16.msra.mxu0 %v3340_v34  ;;  %v3427_v34 = vld [vmem:[%s6698_s1 + $0x510] sm:$0xf]  ;;  %v5237_v17 = vld [vmem:[#allocation1 + $0x1b] sm:$0xff]  ;;  %v4372_v43 = vld [vmem:[%s6698_s1 + $0x744] sm:$0xf0] }
  0x49   :  { %2146 = vmatpush.bf16.msra.mxu1 %v3404_v35  ;;  %v4302_v35 = vld [vmem:[%s6698_s1 + $0x514] sm:$0xf0]  ;;  %v3771_v44 = vld [vmem:[%s6698_s1 + $0x7c0] sm:$0xf] }
  0x4a   :  { %2159 = vmatpush.bf16.msra.mxu2 %v3468_v36  ;;  %v3491_v36 = vld [vmem:[%s6698_s1 + $0x590] sm:$0xf]  ;;  %v3428_v42 = vor.u32 %v4302_v35, %v3427_v34  ;;  %v4374_v31 = vld [vmem:[%s6698_s1 + $0x754] sm:$0xf0]  ;;  %v3579_v35 = vld [vmem:[%s6698_s1 + $0x640] sm:$0xf] }
  0x4b   :  { %2172 = vmatpush.bf16.msra.mxu3 %v3532_v40  ;;  %v4268_v40 = vld [vmem:[%s6698_s1 + $0x404] sm:$0xf0]  ;;  %v4390_v33 = vld [vmem:[%s6698_s1 + $0x7d4] sm:$0xf0] }
  0x4c   :  { %2134 = vmatpush.bf16.msra.mxu0 %v3332_v46  ;;  %v3492_v46 = vor.u32 %v4318_v37, %v3491_v36  ;;  %v3292_v57 = vor.u32 %v4268_v40, %v3291_v39  ;;  %v3716_v37 = vor.u32 %v4374_v31, %v3715_v30  ;;  %v3643_v39 = vld [vmem:[%s6698_s1 + $0x6c0] sm:$0xf]  ;;  %v4356_v40 = vld [vmem:[%s6698_s1 + $0x6c4] sm:$0xf0] }
  0x4d   :  { %2147 = vmatpush.bf16.msra.mxu1 %v3396_v47  ;;  %v4300_v47 = vld [vmem:[%s6698_s1 + $0x504] sm:$0xf0] }
  0x4e   :  { %2160 = vmatpush.bf16.msra.mxu2 %v3460_v48  ;;  %v3483_v48 = vld [vmem:[%s6698_s1 + $0x580] sm:$0xf] }
  0x4f   :  { %2173 = vmatpush.bf16.msra.mxu3 %v3524_v56  ;;  %v3667_v56 = vld [vmem:[%s6698_s1 + $0x6f0] sm:$0xf]  ;;  %v3484_v1 = vor.u32 %v4316_v49, %v3483_v48 }
  0x50   :  { %2135 = vmatpush.bf16.msra.mxu0 %v3324_v62  ;;  %v3420_v62 = vor.u32 %v4300_v47, %v3419_v45  ;;  %v3668_v3 = vor.u32 %v4362_v58, %v3667_v56  ;;  %v4388_v45 = vld [vmem:[%s6698_s1 + $0x7c4] sm:$0xf0] }
  0x51   :  { %2148 = vmatpush.bf16.msra.mxu1 %v3388_v63  ;;  %v3795_v63 = vld [vmem:[%s6698_s1 + $0x7f0] sm:$0xf] }
  0x52   :  { %2161 = vmatpush.bf16.msra.mxu2 %v3452_v0  ;;  %v4394_v0 = vld [vmem:[%s6698_s1 + $0x7f4] sm:$0xf0] }
  0x53   :  { %2174 = vmatpush.bf16.msra.mxu3 %v3516_v4  ;;  %v3732_v4 = vor.u32 %v4378_v60, %v3731_v59  ;;  %v3796_v8 = vor.u32 %v4394_v0, %v3795_v63 }
  0x54   :  { %2136 = vmatpush.bf16.msra.mxu0 %v3316_v10  ;;  %v3723_v10 = vld [vmem:[%s6698_s1 + $0x760] sm:$0xf] }
  0x55   :  { %2149 = vmatpush.bf16.msra.mxu1 %v3380_v11  ;;  %v4376_v11 = vld [vmem:[%s6698_s1 + $0x764] sm:$0xf0] }
  0x56   :  { %2162 = vmatpush.bf16.msra.mxu2 %v3444_v12  ;;  %v5225_v12 = vld [vmem:[#allocation1] sm:$0xff]  ;;  %v3724_v23 = vor.u32 %v4376_v11, %v3723_v10 }
  0x57   :  { %2175 = vmatpush.bf16.msra.mxu3 %v3508_v16  ;;  %v5235_v16 = vld [vmem:[#allocation1 + $0x9] sm:$0xff] }
  0x58   :  { %2137 = vmatpush.bf16.msra.mxu0 %v3308_v25  ;;  %v4342_v25 = vld [vmem:[%s6698_s1 + $0x654] sm:$0xf0] }
  0x59   :  { %2150 = vmatpush.bf16.msra.mxu1 %v3372_v27  ;;  %v3651_v27 = vld [vmem:[%s6698_s1 + $0x6d0] sm:$0xf]  ;;  %v3588_v34 = vor.u32 %v4342_v25, %v3587_v24 }
  0x5a   :  { %2163 = vmatpush.bf16.msra.mxu2 %v3436_v28  ;;  %v3788_v28 = vor.u32 %v4392_v14, %v3787_v13  ;;  %v3652_v36 = vor.u32 %v4358_v29, %v3651_v27 }
  0x5b   :  { %2176 = vmatpush.bf16.msra.mxu3 %v3500_v32  ;;  %v3779_v32 = vld [vmem:[%s6698_s1 + $0x7d0] sm:$0xf] }
  0x5c   :  { %2138 = vmatpush.bf16.msra.mxu0 %v3300_v38  ;;  %v4340_v38 = vld [vmem:[%s6698_s1 + $0x644] sm:$0xf0] }
  0x5d   :  { %2151 = vmatpush.bf16.msra.mxu1 %v3364_v41  ;;  %v3780_v41 = vor.u32 %v4390_v33, %v3779_v32 }
  0x5e   :  { %2164 = vmatpush.bf16.msra.mxu2 %v3428_v42  ;;  %v3707_v42 = vld [vmem:[%s6698_s1 + $0x740] sm:$0xf] }
  0x5f   :  { %2177 = vmatpush.bf16.msra.mxu3 %v3492_v46 }
  0x60   :  { %2139 = vmatpush.bf16.msra.mxu0 %v3292_v57 }
  0x61   :  { %2152 = vmatpush.bf16.msra.mxu1 %v3356_v61 }
  0x62   :  { %2165 = vmatpush.bf16.msra.mxu2 %v3420_v62 }
  0x63   :  { %2178 = vmatpush.bf16.msra.mxu3 %v3484_v1  ;;  %2140 = vmatmul.bf16.vlgmr.msra.gmra.mxu0 %v5225_v12 }
  0x64   :  { %2184 = vmatpush.bf16.msrb.mxu0 %v3604_v2  ;;  %2153 = vmatmul.bf16.vlgmr.msra.gmra.mxu1 %v5235_v16 }
  0x65   :  { %2197 = vmatpush.bf16.msrb.mxu1 %v3668_v3  ;;  %2166 = vmatmul.bf16.vlgmr.msra.gmra.mxu2 %v5233_v15 }
  0x66   :  { %2210 = vmatpush.bf16.msrb.mxu2 %v3732_v4  ;;  %2179 = vmatmul.bf16.vlgmr.msra.gmra.mxu3 %v5237_v17 }
  0x67   :  { %2223 = vmatpush.bf16.msrb.mxu3 %v3796_v8 }
  0x68   :  { %2185 = vmatpush.bf16.msrb.mxu0 %v3596_v18 }
  0x69   :  { %2198 = vmatpush.bf16.msrb.mxu1 %v3660_v19 }
  0x6a   :  { %2211 = vmatpush.bf16.msrb.mxu2 %v3724_v23 }
  0x6b   :  { %2224 = vmatpush.bf16.msrb.mxu3 %v3788_v28 }
  0x6c   :  { %13 = vsyncpa [#allocation5], 0  ;;  %2186 = vmatpush.bf16.msrb.mxu0 %v3588_v34  ;;  %v3580_v46 = vor.u32 %v4340_v38, %v3579_v35  ;;  %v3644_v47 = vor.u32 %v4356_v40, %v3643_v39  ;;  %v3708_v48 = vor.u32 %v4372_v43, %v3707_v42  ;;  %v3571_v49 = vld [vmem:[%s6698_s1 + $0x630] sm:$0xf]  ;;  %v4338_v52 = vld [vmem:[%s6698_s1 + $0x634] sm:$0xf0]  ;;  %v3772_v56 = vor.u32 %v4388_v45, %v3771_v44 }
  0x6d   :  { %2199 = vmatpush.bf16.msrb.mxu1 %v3652_v36  ;;  %v3635_v54 = vld [vmem:[%s6698_s1 + $0x6b0] sm:$0xf]  ;;  %v4354_v57 = vld [vmem:[%s6698_s1 + $0x6b4] sm:$0xf0]  ;;  %v3572_v62 = vor.u32 %v4338_v52, %v3571_v49  ;;  %v3563_v1 = vld [vmem:[%s6698_s1 + $0x620] sm:$0xf] }
  0x6e   :  { %2212 = vmatpush.bf16.msrb.mxu2 %v3716_v37  ;;  %v3699_v58 = vld [vmem:[%s6698_s1 + $0x730] sm:$0xf]  ;;  %v4370_v59 = vld [vmem:[%s6698_s1 + $0x734] sm:$0xf0]  ;;  %v3636_v63 = vor.u32 %v4354_v57, %v3635_v54  ;;  %v4336_v2 = vld [vmem:[%s6698_s1 + $0x624] sm:$0xf0] }
  0x6f   :  { %2225 = vmatpush.bf16.msrb.mxu3 %v3780_v41  ;;  %v3763_v60 = vld [vmem:[%s6698_s1 + $0x7b0] sm:$0xf]  ;;  %v4386_v61 = vld [vmem:[%s6698_s1 + $0x7b4] sm:$0xf0]  ;;  %v3700_v0 = vor.u32 %v4370_v59, %v3699_v58  ;;  %v3627_v3 = vld [vmem:[%s6698_s1 + $0x6a0] sm:$0xf]  ;;  %v3564_v10 = vor.u32 %v4336_v2, %v3563_v1 }
  0x70   :  { %2187 = vmatpush.bf16.msrb.mxu0 %v3580_v46  ;;  %v3764_v4 = vor.u32 %v4386_v61, %v3763_v60  ;;  %v4352_v5 = vld [vmem:[%s6698_s1 + $0x6a4] sm:$0xf0]  ;;  %v3691_v6 = vld [vmem:[%s6698_s1 + $0x720] sm:$0xf]  ;;  %v3555_v11 = vld [vmem:[%s6698_s1 + $0x610] sm:$0xf] }
  0x71   :  { %2200 = vmatpush.bf16.msrb.mxu1 %v3644_v47  ;;  %v4368_v7 = vld [vmem:[%s6698_s1 + $0x724] sm:$0xf0]  ;;  %v3755_v8 = vld [vmem:[%s6698_s1 + $0x7a0] sm:$0xf]  ;;  %v3628_v13 = vor.u32 %v4352_v5, %v3627_v3  ;;  %v4334_v18 = vld [vmem:[%s6698_s1 + $0x614] sm:$0xf0] }
  0x72   :  { %2213 = vmatpush.bf16.msrb.mxu2 %v3708_v48  ;;  %v4384_v9 = vld [vmem:[%s6698_s1 + $0x7a4] sm:$0xf0]  ;;  %v3692_v14 = vor.u32 %v4368_v7, %v3691_v6  ;;  %v3619_v19 = vld [vmem:[%s6698_s1 + $0x690] sm:$0xf]  ;;  %v4350_v23 = vld [vmem:[%s6698_s1 + $0x694] sm:$0xf0]  ;;  %v3556_v32 = vor.u32 %v4334_v18, %v3555_v11 }
  0x73   :  { %2226 = vmatpush.bf16.msrb.mxu3 %v3772_v56  ;;  %v3756_v24 = vor.u32 %v4384_v9, %v3755_v8  ;;  %v3683_v25 = vld [vmem:[%s6698_s1 + $0x710] sm:$0xf]  ;;  %v4366_v27 = vld [vmem:[%s6698_s1 + $0x714] sm:$0xf0]  ;;  %v3547_v30 = vld [vmem:[%s6698_s1 + $0x600] sm:$0xf]  ;;  %v3620_v37 = vor.u32 %v4350_v23, %v3619_v19 }
  0x74   :  { %2188 = vmatpush.bf16.msrb.mxu0 %v3572_v62  ;;  %v3747_v28 = vld [vmem:[%s6698_s1 + $0x790] sm:$0xf]  ;;  %v4382_v29 = vld [vmem:[%s6698_s1 + $0x794] sm:$0xf0]  ;;  %v4332_v31 = vld [vmem:[%s6698_s1 + $0x604] sm:$0xf0]  ;;  %v3684_v38 = vor.u32 %v4366_v27, %v3683_v25 }
  0x75   :  { %2201 = vmatpush.bf16.msrb.mxu1 %v3636_v63  ;;  %v3611_v33 = vld [vmem:[%s6698_s1 + $0x680] sm:$0xf]  ;;  %v4348_v34 = vld [vmem:[%s6698_s1 + $0x684] sm:$0xf0]  ;;  %v3859_v41 = vld [vmem:[%s6698_s1 + $0x870] sm:$0xf]  ;;  %v3748_v43 = vor.u32 %v4382_v29, %v3747_v28  ;;  %v3548_v54 = vor.u32 %v4332_v31, %v3547_v30 }
  0x76   :  { %2214 = vmatpush.bf16.msrb.mxu2 %v3700_v0  ;;  %v3675_v35 = vld [vmem:[%s6698_s1 + $0x700] sm:$0xf]  ;;  %v4364_v36 = vld [vmem:[%s6698_s1 + $0x704] sm:$0xf0]  ;;  %v4410_v42 = vld [vmem:[%s6698_s1 + $0x874] sm:$0xf0]  ;;  %v3612_v58 = vor.u32 %v4348_v34, %v3611_v33 }
  0x77   :  { %2227 = vmatpush.bf16.msrb.mxu3 %v3764_v4  ;;  %v3739_v39 = vld [vmem:[%s6698_s1 + $0x780] sm:$0xf]  ;;  %v4380_v40 = vld [vmem:[%s6698_s1 + $0x784] sm:$0xf0]  ;;  %v3923_v44 = vld [vmem:[%s6698_s1 + $0x8f0] sm:$0xf]  ;;  %v3676_v59 = vor.u32 %v4364_v36, %v3675_v35  ;;  %v3860_v63 = vor.u32 %v4410_v42, %v3859_v41 }
  0x78   :  { %2189 = vmatpush.bf16.msrb.mxu0 %v3564_v10  ;;  %v4426_v45 = vld [vmem:[%s6698_s1 + $0x8f4] sm:$0xf0]  ;;  %v5399_v46 = vld [vmem:[#allocation1 + $0x24] sm:$0xff]  ;;  %v5403_v48 = vld [vmem:[#allocation1 + $0x2d] sm:$0xff]  ;;  %v3740_v62 = vor.u32 %v4380_v40, %v3739_v39  ;;  %vm2025_vm0 = vcmask 261120   ;;  %vm2579_vm1 = vcmask 1041408  }
  0x79   :  { %2202 = vmatpush.bf16.msrb.mxu1 %v3628_v13  ;;  %v5401_v47 = vld [vmem:[#allocation1 + $0x36] sm:$0xff]  ;;  %v5405_v49 = vld [vmem:[#allocation1 + $0x3f] sm:$0xff]  ;;  %v27_v52 = vld [vmem:[%s6697_s0 + $0x10] sm:$0x1f]  ;;  %v3924_v0 = vor.u32 %v4426_v45, %v3923_v44  ;;  %s2752_s30 = sshll.u32 %s6702_s5, 4  ;;  %s4541_s9 = smov [#allocation4]   ;;  %s2753_s30 = int_to_ptr.hbm [resolvable:$true] %s2752_s30 }
  0x7a   :  { %2215 = vmatpush.bf16.msrb.mxu2 %v3692_v14  ;;  %v3987_v56 = vld [vmem:[%s6698_s1 + $0x970] sm:$0xf]  ;;  %v4442_v57 = vld [vmem:[%s6698_s1 + $0x974] sm:$0xf0]  ;;  %379 = vst [vmem:[#allocation1] ss:$9 sm:$0xff] %v27_v52 }
  0x7b   :  { %2228 = vmatpush.bf16.msrb.mxu3 %v3756_v24  ;;  %v4051_v60 = vld [vmem:[%s6698_s1 + $0x9f0] sm:$0xf]  ;;  %v4458_v61 = vld [vmem:[%s6698_s1 + $0x9f4] sm:$0xf0]  ;;  %v3988_v1 = vor.u32 %v4442_v57, %v3987_v56  ;;  %v3851_v2 = vld [vmem:[%s6698_s1 + $0x860] sm:$0xf] }
  0x7c   :  { %2190 = vmatpush.bf16.msrb.mxu0 %v3556_v32  ;;  %v4408_v3 = vld [vmem:[%s6698_s1 + $0x864] sm:$0xf0]  ;;  %v3915_v4 = vld [vmem:[%s6698_s1 + $0x8e0] sm:$0xf]  ;;  %v4052_v5 = vor.u32 %v4458_v61, %v4051_v60  ;;  %v3843_v18 = vld [vmem:[%s6698_s1 + $0x850] sm:$0xf] }
  0x7d   :  { %2203 = vmatpush.bf16.msrb.mxu1 %v3620_v37  ;;  %v4424_v6 = vld [vmem:[%s6698_s1 + $0x8e4] sm:$0xf0]  ;;  %v3979_v7 = vld [vmem:[%s6698_s1 + $0x960] sm:$0xf]  ;;  %v3852_v11 = vor.u32 %v4408_v3, %v3851_v2  ;;  %v4406_v19 = vld [vmem:[%s6698_s1 + $0x854] sm:$0xf0] }
  0x7e   :  { %2216 = vmatpush.bf16.msrb.mxu2 %v3684_v38  ;;  %v4440_v8 = vld [vmem:[%s6698_s1 + $0x964] sm:$0xf0]  ;;  %v4043_v9 = vld [vmem:[%s6698_s1 + $0x9e0] sm:$0xf]  ;;  %v3916_v13 = vor.u32 %v4424_v6, %v3915_v4  ;;  %v3907_v23 = vld [vmem:[%s6698_s1 + $0x8d0] sm:$0xf]  ;;  %v3844_v31 = vor.u32 %v4406_v19, %v3843_v18 }
  0x7f   :  { %2229 = vmatpush.bf16.msrb.mxu3 %v3748_v43  ;;  %v4456_v10 = vld [vmem:[%s6698_s1 + $0x9e4] sm:$0xf0]  ;;  %v3980_v14 = vor.u32 %v4440_v8, %v3979_v7  ;;  %v4422_v25 = vld [vmem:[%s6698_s1 + $0x8d4] sm:$0xf0]  ;;  %v3971_v27 = vld [vmem:[%s6698_s1 + $0x950] sm:$0xf] }
  0x80   :  { %2191 = vmatpush.bf16.msrb.mxu0 %v3548_v54  ;;  %v4044_v24 = vor.u32 %v4456_v10, %v4043_v9  ;;  %v4438_v28 = vld [vmem:[%s6698_s1 + $0x954] sm:$0xf0]  ;;  %v4035_v29 = vld [vmem:[%s6698_s1 + $0x9d0] sm:$0xf]  ;;  %v3908_v32 = vor.u32 %v4422_v25, %v3907_v23  ;;  %v3835_v34 = vld [vmem:[%s6698_s1 + $0x840] sm:$0xf] }
  0x81   :  { %2204 = vmatpush.bf16.msrb.mxu1 %v3612_v58  ;;  %v4454_v30 = vld [vmem:[%s6698_s1 + $0x9d4] sm:$0xf0]  ;;  %v3972_v33 = vor.u32 %v4438_v28, %v3971_v27  ;;  %v4404_v35 = vld [vmem:[%s6698_s1 + $0x844] sm:$0xf0]  ;;  %v3899_v36 = vld [vmem:[%s6698_s1 + $0x8c0] sm:$0xf] }
  0x82   :  { %2217 = vmatpush.bf16.msrb.mxu2 %v3676_v59  ;;  %v4036_v37 = vor.u32 %v4454_v30, %v4035_v29  ;;  %v4420_v38 = vld [vmem:[%s6698_s1 + $0x8c4] sm:$0xf0]  ;;  %v3963_v39 = vld [vmem:[%s6698_s1 + $0x940] sm:$0xf]  ;;  %v3836_v43 = vor.u32 %v4404_v35, %v3835_v34  ;;  %v3827_v52 = vld [vmem:[%s6698_s1 + $0x830] sm:$0xf] }
  0x83   :  { %2230 = vmatpush.bf16.msrb.mxu3 %v3740_v62  ;;  %2192 = vmatmul.bf16.vlgmr.msrb.gmra.mxu0 %v5399_v46  ;;  %v4436_v40 = vld [vmem:[%s6698_s1 + $0x944] sm:$0xf0]  ;;  %v4027_v41 = vld [vmem:[%s6698_s1 + $0x9c0] sm:$0xf]  ;;  %v3900_v44 = vor.u32 %v4420_v38, %v3899_v36  ;;  %v4402_v54 = vld [vmem:[%s6698_s1 + $0x834] sm:$0xf0] }
  0x84   :  { %2236 = vmatpush.bf16.msra.mxu0 %v3860_v63  ;;  %2205 = vmatmul.bf16.vlgmr.msrb.gmra.mxu1 %v5403_v48  ;;  %v4452_v42 = vld [vmem:[%s6698_s1 + $0x9c4] sm:$0xf0]  ;;  %v3964_v45 = vor.u32 %v4436_v40, %v3963_v39  ;;  %v3891_v56 = vld [vmem:[%s6698_s1 + $0x8b0] sm:$0xf]  ;;  %v4418_v58 = vld [vmem:[%s6698_s1 + $0x8b4] sm:$0xf0]  ;;  %v3828_v63 = vor.u32 %v4402_v54, %v3827_v52 }
  0x85   :  { %2249 = vmatpush.bf16.msra.mxu1 %v3924_v0  ;;  %2218 = vmatmul.bf16.vlgmr.msrb.gmra.mxu2 %v5401_v47  ;;  %v4028_v57 = vor.u32 %v4452_v42, %v4027_v41  ;;  %v3955_v59 = vld [vmem:[%s6698_s1 + $0x930] sm:$0xf]  ;;  %v4434_v60 = vld [vmem:[%s6698_s1 + $0x934] sm:$0xf0]  ;;  %v3892_v0 = vor.u32 %v4418_v58, %v3891_v56  ;;  %v3819_v2 = vld [vmem:[%s6698_s1 + $0x820] sm:$0xf] }
  0x86   :  { %2262 = vmatpush.bf16.msra.mxu2 %v3988_v1  ;;  %2231 = vmatmul.bf16.vlgmr.msrb.gmra.mxu3 %v5405_v49  ;;  %v4019_v61 = vld [vmem:[%s6698_s1 + $0x9b0] sm:$0xf]  ;;  %v4450_v62 = vld [vmem:[%s6698_s1 + $0x9b4] sm:$0xf0]  ;;  %v3956_v1 = vor.u32 %v4434_v60, %v3955_v59  ;;  %v4400_v3 = vld [vmem:[%s6698_s1 + $0x824] sm:$0xf0] }
  0x87   :  { %2275 = vmatpush.bf16.msra.mxu3 %v4052_v5  ;;  %v3883_v4 = vld [vmem:[%s6698_s1 + $0x8a0] sm:$0xf]  ;;  %v4020_v5 = vor.u32 %v4450_v62, %v4019_v61  ;;  %v4416_v6 = vld [vmem:[%s6698_s1 + $0x8a4] sm:$0xf0]  ;;  %v3811_v18 = vld [vmem:[%s6698_s1 + $0x810] sm:$0xf] }
  0x88   :  { %2237 = vmatpush.bf16.msra.mxu0 %v3852_v11  ;;  %v3947_v7 = vld [vmem:[%s6698_s1 + $0x920] sm:$0xf]  ;;  %v4432_v8 = vld [vmem:[%s6698_s1 + $0x924] sm:$0xf0]  ;;  %v3820_v11 = vor.u32 %v4400_v3, %v3819_v2  ;;  %v4398_v19 = vld [vmem:[%s6698_s1 + $0x814] sm:$0xf0] }
  0x89   :  { %2250 = vmatpush.bf16.msra.mxu1 %v3916_v13  ;;  %v4011_v9 = vld [vmem:[%s6698_s1 + $0x9a0] sm:$0xf]  ;;  %v4448_v10 = vld [vmem:[%s6698_s1 + $0x9a4] sm:$0xf0]  ;;  %v3884_v13 = vor.u32 %v4416_v6, %v3883_v4  ;;  %v3875_v23 = vld [vmem:[%s6698_s1 + $0x890] sm:$0xf] }
  0x8a   :  { %2263 = vmatpush.bf16.msra.mxu2 %v3980_v14  ;;  %v3948_v14 = vor.u32 %v4432_v8, %v3947_v7  ;;  %v4414_v25 = vld [vmem:[%s6698_s1 + $0x894] sm:$0xf0]  ;;  %v3939_v27 = vld [vmem:[%s6698_s1 + $0x910] sm:$0xf]  ;;  %v3867_v36 = vld [vmem:[%s6698_s1 + $0x880] sm:$0xf] }
  0x8b   :  { %2276 = vmatpush.bf16.msra.mxu3 %v4044_v24  ;;  %v4012_v24 = vor.u32 %v4448_v10, %v4011_v9  ;;  %v4430_v28 = vld [vmem:[%s6698_s1 + $0x914] sm:$0xf0]  ;;  %v4003_v29 = vld [vmem:[%s6698_s1 + $0x990] sm:$0xf]  ;;  %v3876_v34 = vor.u32 %v4414_v25, %v3875_v23  ;;  %v3931_v38 = vld [vmem:[%s6698_s1 + $0x900] sm:$0xf] }
  0x8c   :  { %2238 = vmatpush.bf16.msra.mxu0 %v3844_v31  ;;  %v4446_v30 = vld [vmem:[%s6698_s1 + $0x994] sm:$0xf0]  ;;  %v3812_v31 = vor.u32 %v4398_v19, %v3811_v18  ;;  %v3940_v35 = vor.u32 %v4430_v28, %v3939_v27  ;;  %v4428_v40 = vld [vmem:[%s6698_s1 + $0x904] sm:$0xf0]  ;;  %v3995_v41 = vld [vmem:[%s6698_s1 + $0x980] sm:$0xf] }
  0x8d   :  { %2251 = vmatpush.bf16.msra.mxu1 %v3908_v32  ;;  %v3803_v32 = vld [vmem:[%s6698_s1 + $0x800] sm:$0xf]  ;;  %v4004_v39 = vor.u32 %v4446_v30, %v4003_v29  ;;  %v4444_v42 = vld [vmem:[%s6698_s1 + $0x984] sm:$0xf0]  ;;  %v2901_v54 = vld [vmem:[%s6698_s1 + $0xf8] sm:$0xf0]  ;;  %v3932_v59 = vor.u32 %v4428_v40, %v3931_v38 }
  0x8e   :  { %2264 = vmatpush.bf16.msra.mxu2 %v3972_v33  ;;  %v4396_v33 = vld [vmem:[%s6698_s1 + $0x804] sm:$0xf0]  ;;  %v4185_v56 = vld [vmem:[%s6698_s1 + $0x174] sm:$0xf]  ;;  %v4067_v60 = vld [vmem:[%s6698_s1 + $0xa10] sm:$0xf]  ;;  %v3996_v62 = vor.u32 %v4444_v42, %v3995_v41 }
  0x8f   :  { %2277 = vmatpush.bf16.msra.mxu3 %v4036_v37  ;;  %v4412_v37 = vld [vmem:[%s6698_s1 + $0x884] sm:$0xf0]  ;;  %v3804_v52 = vor.u32 %v4396_v33, %v3803_v32  ;;  %v4462_v61 = vld [vmem:[%s6698_s1 + $0xa14] sm:$0xf0]  ;;  %v2829_v4 = vld [vmem:[%s6698_s1 + $0x68] sm:$0xf0] }
  0x90   :  { %2239 = vmatpush.bf16.msra.mxu0 %v3836_v43  ;;  %v4153_v43 = vld [vmem:[%s6698_s1 + $0x74] sm:$0xf]  ;;  %v3868_v58 = vor.u32 %v4412_v37, %v3867_v36  ;;  %v4068_v6 = vor.u32 %v4462_v61, %v4067_v60  ;;  %v380_v7 = vld [vmem:[#allocation1] sm:$0xff]  ;;  %v2893_v8 = vld [vmem:[%s6698_s1 + $0xe8] sm:$0xf0]  ;;  %s2763_s12 = sshll.u32 %s6703_s6, 4  ;;  %s2764_s12 = int_to_ptr.hbm [resolvable:$true] %s2763_s12 }
  0x91   :  { %2252 = vmatpush.bf16.msra.mxu1 %v3900_v44  ;;  %v2837_v44 = vld [vmem:[%s6698_s1 + $0x78] sm:$0xf0]  ;;  %v382_v3 = vld [vmem:[#allocation1 + $0x12] sm:$0xff]  ;;  %v4183_v9 = vld [vmem:[%s6698_s1 + $0x164] sm:$0xf]  ;;  %vm2743_vm2 = vcmask 41984  }
  0x92   :  { %2265 = vmatpush.bf16.msra.mxu2 %v3964_v45  ;;  %v4169_v45 = vld [vmem:[%s6698_s1 + $0xf4] sm:$0xf]  ;;  %v2957_v10 = vld [vmem:[%s6698_s1 + $0x168] sm:$0xf0]  ;;  %v383_v18 = vld [vmem:[#allocation1 + $0x1b] sm:$0xff] }
  0x93   :  { %2278 = vmatpush.bf16.msra.mxu3 %v4028_v57  ;;  %v2965_v57 = vld [vmem:[%s6698_s1 + $0x178] sm:$0xf0]  ;;  %v4201_v23 = vld [vmem:[%s6698_s1 + $0x1f4] sm:$0xf]  ;;  %v2960_v27 = vor.u32 %v4183_v9, %v2957_v10  ;;  %v4199_v37 = vld [vmem:[%s6698_s1 + $0x1e4] sm:$0xf] }
  0x94   :  { %2240 = vmatpush.bf16.msra.mxu0 %v3828_v63  ;;  %v2840_v63 = vor.u32 %v4153_v43, %v2837_v44  ;;  %v2968_v2 = vor.u32 %v4185_v56, %v2965_v57  ;;  %v4149_v28 = vld [vmem:[%s6698_s1 + $0x54] sm:$0xf]  ;;  %v2821_v29 = vld [vmem:[%s6698_s1 + $0x58] sm:$0xf0]  ;;  %v3021_v38 = vld [vmem:[%s6698_s1 + $0x1e8] sm:$0xf0] }
  0x95   :  { %2253 = vmatpush.bf16.msra.mxu1 %v3892_v0  ;;  %v4151_v0 = vld [vmem:[%s6698_s1 + $0x64] sm:$0xf]  ;;  %v4165_v30 = vld [vmem:[%s6698_s1 + $0xd4] sm:$0xf]  ;;  %v2885_v32 = vld [vmem:[%s6698_s1 + $0xd8] sm:$0xf0]  ;;  %v2824_v36 = vor.u32 %v4149_v28, %v2821_v29 }
  0x96   :  { %2266 = vmatpush.bf16.msra.mxu2 %v3956_v1  ;;  %v2904_v1 = vor.u32 %v4169_v45, %v2901_v54  ;;  %v2832_v19 = vor.u32 %v4151_v0, %v2829_v4  ;;  %v4181_v33 = vld [vmem:[%s6698_s1 + $0x154] sm:$0xf]  ;;  %v4147_v41 = vld [vmem:[%s6698_s1 + $0x44] sm:$0xf]  ;;  %v2813_v42 = vld [vmem:[%s6698_s1 + $0x48] sm:$0xf0]  ;;  %v3024_v54 = vor.u32 %v4199_v37, %v3021_v38 }
  0x97   :  { %2279 = vmatpush.bf16.msra.mxu3 %v4020_v5  ;;  %v4167_v5 = vld [vmem:[%s6698_s1 + $0xe4] sm:$0xf]  ;;  %v2877_v44 = vld [vmem:[%s6698_s1 + $0xc8] sm:$0xf0]  ;;  %v2816_v56 = vor.u32 %v4147_v41, %v2813_v42  ;;  %v4197_v57 = vld [vmem:[%s6698_s1 + $0x1d4] sm:$0xf] }
  0x98   :  { %2241 = vmatpush.bf16.msra.mxu0 %v3820_v11  ;;  %v381_v11 = vld [vmem:[#allocation1 + $0x9] sm:$0xff]  ;;  %v2896_v25 = vor.u32 %v4167_v5, %v2893_v8  ;;  %v4163_v43 = vld [vmem:[%s6698_s1 + $0xc4] sm:$0xf]  ;;  %v2869_v0 = vld [vmem:[%s6698_s1 + $0xb8] sm:$0xf0] }
  0x99   :  { %2254 = vmatpush.bf16.msra.mxu1 %v3884_v13  ;;  %v4059_v13 = vld [vmem:[%s6698_s1 + $0xa00] sm:$0xf]  ;;  %v4179_v45 = vld [vmem:[%s6698_s1 + $0x144] sm:$0xf]  ;;  %v2880_v60 = vor.u32 %v4163_v43, %v2877_v44  ;;  %v4193_v28 = vld [vmem:[%s6698_s1 + $0x1b4] sm:$0xf] }
  0x9a   :  { %2267 = vmatpush.bf16.msra.mxu2 %v3948_v14  ;;  %v4460_v14 = vld [vmem:[%s6698_s1 + $0xa04] sm:$0xf0]  ;;  %v4143_v8 = vld [vmem:[%s6698_s1 + $0x24] sm:$0xf]  ;;  %v2997_v29 = vld [vmem:[%s6698_s1 + $0x1b8] sm:$0xf0] }
  0x9b   :  { %2280 = vmatpush.bf16.msra.mxu3 %v4012_v24  ;;  %v3029_v24 = vld [vmem:[%s6698_s1 + $0x1f8] sm:$0xf0]  ;;  %v3000_v42 = vor.u32 %v4193_v28, %v2997_v29  ;;  %v4191_v44 = vld [vmem:[%s6698_s1 + $0x1a4] sm:$0xf]  ;;  %v3085_v28 = vld [vmem:[%s6698_s1 + $0x268] sm:$0xf0] }
  0x9c   :  { %2242 = vmatpush.bf16.msra.mxu0 %v3812_v31  ;;  %v4060_v31 = vor.u32 %v4460_v14, %v4059_v13  ;;  %v4159_v13 = vld [vmem:[%s6698_s1 + $0xa4] sm:$0xf]  ;;  %v2853_v38 = vld [vmem:[%s6698_s1 + $0x98] sm:$0xf0] }
  0x9d   :  { %2255 = vmatpush.bf16.msra.mxu1 %v3876_v34  ;;  %v2949_v34 = vld [vmem:[%s6698_s1 + $0x158] sm:$0xf0]  ;;  %v4231_v29 = vld [vmem:[%s6698_s1 + $0x2e4] sm:$0xf] }
  0x9e   :  { %2268 = vmatpush.bf16.msra.mxu2 %v3940_v35  ;;  %v3032_v35 = vor.u32 %v4201_v23, %v3029_v24  ;;  %v2952_v40 = vor.u32 %v4181_v33, %v2949_v34  ;;  %v2925_v23 = vld [vmem:[%s6698_s1 + $0x128] sm:$0xf0]  ;;  %v384_v24 = vld [vmem:[#allocation1 + $0x24] sm:$0xff]  ;;  %v4141_v33 = vld [vmem:[%s6698_s1 + $0x14] sm:$0xf] }
  0x9f   :  { %2281 = vmatpush.bf16.msra.mxu3 %v4004_v39  ;;  %v2888_v39 = vor.u32 %v4165_v30, %v2885_v32  ;;  %v2789_v34 = vld [vmem:[%s6698_s1 + $0x18] sm:$0xf0] }
  0xa0   :  { %2243 = vmatpush.bf16.msra.mxu0 %v3804_v52  ;;  %v2941_v52 = vld [vmem:[%s6698_s1 + $0x148] sm:$0xf0]  ;;  %v2792_v43 = vor.u32 %v4141_v33, %v2789_v34  ;;  %v4187_v34 = vld [vmem:[%s6698_s1 + $0x184] sm:$0xf] }
  0xa1   :  { %2256 = vmatpush.bf16.msra.mxu1 %v3868_v58  ;;  %v3013_v58 = vld [vmem:[%s6698_s1 + $0x1d8] sm:$0xf0]  ;;  %v2944_v61 = vor.u32 %v4179_v45, %v2941_v52  ;;  %v2989_v45 = vld [vmem:[%s6698_s1 + $0x1a8] sm:$0xf0]  ;;  %v4139_v52 = vld [vmem:[%s6698_s1 + $0x4] sm:$0xf] }
  0xa2   :  { %2269 = vmatpush.bf16.msra.mxu2 %v3932_v59  ;;  %v4145_v59 = vld [vmem:[%s6698_s1 + $0x34] sm:$0xf]  ;;  %v3016_v4 = vor.u32 %v4197_v57, %v3013_v58  ;;  %v2781_v57 = vld [vmem:[%s6698_s1 + $0x8] sm:$0xf0]  ;;  %v4155_v58 = vld [vmem:[%s6698_s1 + $0x84] sm:$0xf] }
  0xa3   :  { %2282 = vmatpush.bf16.msra.mxu3 %v3996_v62  ;;  %2244 = vmatmul.bf16.vlgmr.msra.gmra.mxu0 %v380_v7  ;;  %v2805_v62 = vld [vmem:[%s6698_s1 + $0x38] sm:$0xf0]  ;;  %v3005_v7 = vld [vmem:[%s6698_s1 + $0x1c8] sm:$0xf0]  ;;  %v2037_v30 = vpop.f32.mrf.mxu0 }
  0xa4   :  { %2294 = vmatpush.bf16.msrb.mxu0 %v4068_v6  ;;  %2257 = vmatmul.bf16.vlgmr.msra.gmra.mxu1 %v381_v11  ;;  %v2808_v5 = vor.u32 %v4145_v59, %v2805_v62  ;;  %v4195_v6 = vld [vmem:[%s6698_s1 + $0x1c4] sm:$0xf]  ;;  %v2797_v11 = vld [vmem:[%s6698_s1 + $0x28] sm:$0xf0] }
  0xa5   :  { %2301 = vmatpush.bf16.msrb.mxu1 %v2840_v63  ;;  %2270 = vmatmul.bf16.vlgmr.msra.gmra.mxu2 %v382_v3  ;;  %v4161_v63 = vld [vmem:[%s6698_s1 + $0xb4] sm:$0xf]  ;;  %v352_v3 = vld [vmem:[%s6699_s2] sm:$0x3]  ;;  %v2845_v59 = vld [vmem:[%s6698_s1 + $0x88] sm:$0xf0] }
  0xa6   :  { %2314 = vmatpush.bf16.msrb.mxu2 %v2904_v1  ;;  %2283 = vmatmul.bf16.vlgmr.msra.gmra.mxu3 %v383_v18  ;;  %v4177_v1 = vld [vmem:[%s6698_s1 + $0x134] sm:$0xf]  ;;  %v2872_v9 = vor.u32 %v4161_v63, %v2869_v0  ;;  %v354_v14 = vperm.slane %v352_v3, 0  ;;  %v2861_v18 = vld [vmem:[%s6698_s1 + $0xa8] sm:$0xf0] }
  0xa7   :  { %2327 = vmatpush.bf16.msrb.mxu3 %v2968_v2  ;;  %v2933_v2 = vld [vmem:[%s6698_s1 + $0x138] sm:$0xf0]  ;;  %v2050_v37 = vpop.f32.mrf.mxu1  ;;  %v2909_v62 = vld [vmem:[%s6698_s1 + $0x108] sm:$0xf0]  ;;  %v4217_v63 = vld [vmem:[%s6698_s1 + $0x274] sm:$0xf] }
  0xa8   :  { %2295 = vmatpush.bf16.msrb.mxu0 %v4060_v31  ;;  %v2936_v10 = vor.u32 %v4177_v1, %v2933_v2  ;;  %v2864_v31 = vor.u32 %v4159_v13, %v2861_v18  ;;  %v3093_v2 = vld [vmem:[%s6698_s1 + $0x278] sm:$0xf0]  ;;  %v4233_v3 = vld [vmem:[%s6698_s1 + $0x2f4] sm:$0xf]  ;;  %v3213_v33 = vld [vmem:[%s6698_s1 + $0x368] sm:$0xf0] }
  0xa9   :  { %2302 = vmatpush.bf16.msrb.mxu1 %v2832_v19  ;;  %v4175_v19 = vld [vmem:[%s6698_s1 + $0x124] sm:$0xf]  ;;  %v2981_v18 = vld [vmem:[%s6698_s1 + $0x198] sm:$0xf0] }
  0xaa   :  { %2315 = vmatpush.bf16.msrb.mxu2 %v2896_v25  ;;  %v3008_v25 = vor.u32 %v4195_v6, %v3005_v7  ;;  %v2928_v32 = vor.u32 %v4175_v19, %v2925_v23  ;;  %v2784_v6 = vor.u32 %v4139_v52, %v2781_v57  ;;  %v4249_v7 = vld [vmem:[%s6698_s1 + $0x374] sm:$0xf]  ;;  %v3096_v23 = vor.u32 %v4217_v63, %v3093_v2  ;;  %v3141_v52 = vld [vmem:[%s6698_s1 + $0x2d8] sm:$0xf0]  ;;  %v4227_v63 = vld [vmem:[%s6698_s1 + $0x2c4] sm:$0xf] }
  0xab   :  { %2328 = vmatpush.bf16.msrb.mxu3 %v2960_v27  ;;  %v2800_v27 = vor.u32 %v4143_v8, %v2797_v11  ;;  %v2076_v1 = vpop.f32.mrf.mxu3  ;;  %v3221_v8 = vld [vmem:[%s6698_s1 + $0x378] sm:$0xf0]  ;;  %v2848_v11 = vor.u32 %v4155_v58, %v2845_v59  ;;  %v3197_v2 = vld [vmem:[%s6698_s1 + $0x348] sm:$0xf0] }
  0xac   :  { %2340 = vmatpush.bf16.msra.mxu0 %v3032_v35  ;;  %v4157_v35 = vld [vmem:[%s6698_s1 + $0x94] sm:$0xf]  ;;  %v3205_v57 = vld [vmem:[%s6698_s1 + $0x358] sm:$0xf0] }
  0xad   :  { %2303 = vmatpush.bf16.msrb.mxu1 %v2824_v36  ;;  %v2038_v36 = vadd.f32 %v2037_v30, %v354_v14  ;;  %v4189_v14 = vld [vmem:[%s6698_s1 + $0x194] sm:$0xf]  ;;  %v3149_v30 = vld [vmem:[%s6698_s1 + $0x2e8] sm:$0xf0] }
  0xae   :  { %2316 = vmatpush.bf16.msrb.mxu2 %v2888_v39  ;;  %v4173_v39 = vld [vmem:[%s6698_s1 + $0x114] sm:$0xf] }
  0xaf   :  { %2329 = vmatpush.bf16.msrb.mxu3 %v2952_v40  ;;  %v2917_v40 = vld [vmem:[%s6698_s1 + $0x118] sm:$0xf0]  ;;  %v2051_v41 = vadd.f32 %v2050_v37, %v2038_v36  ;;  %v2052_v19 = vpop.f32.mrf.mxu1 }
  0xb0   :  { %2341 = vmatpush.bf16.msra.mxu0 %v3024_v54  ;;  %v2856_v54 = vor.u32 %v4157_v35, %v2853_v38  ;;  %v2973_v35 = vld [vmem:[%s6698_s1 + $0x188] sm:$0xf0]  ;;  %v3152_v38 = vor.u32 %v4231_v29, %v3149_v30  ;;  %v3125_v19 = vld [vmem:[%s6698_s1 + $0x2b8] sm:$0xf0]  ;;  %v4259_v30 = vld [vmem:[%s6698_s1 + $0x3c4] sm:$0xf] }
  0xb1   :  { %2304 = vmatpush.bf16.msrb.mxu1 %v2816_v56  ;;  %v2920_v56 = vor.u32 %v4173_v39, %v2917_v40  ;;  %v4265_v39 = vld [vmem:[%s6698_s1 + $0x3f4] sm:$0xf]  ;;  %v3285_v40 = vld [vmem:[%s6698_s1 + $0x3f8] sm:$0xf0] }
  0xb2   :  { %2317 = vmatpush.bf16.msrb.mxu2 %v2880_v60  ;;  %v2063_v60 = vpop.f32.mrf.mxu2  ;;  %v3288_v58 = vor.u32 %v4265_v39, %v3285_v40  ;;  %v3181_v39 = vld [vmem:[%s6698_s1 + $0x328] sm:$0xf0] }
  0xb3   :  { %2330 = vmatpush.bf16.msrb.mxu3 %v2944_v61  ;;  %4073 = vmatmul.msk.bf16.vlgmr.msrb.gmra.mxu0 %vm2025_vm0, %v384_v24  ;;  %v4171_v61 = vld [vmem:[%s6698_s1 + $0x104] sm:$0xf]  ;;  %v2064_v0 = vadd.f32 %v2063_v60, %v2051_v41  ;;  %v4213_v41 = vld [vmem:[%s6698_s1 + $0x254] sm:$0xf] }
  0xb4   :  { %2342 = vmatpush.bf16.msra.mxu0 %v3016_v4  ;;  %v3157_v4 = vld [vmem:[%s6698_s1 + $0x2f8] sm:$0xf0]  ;;  %v2912_v13 = vor.u32 %v4171_v61, %v2909_v62  ;;  %v3277_v61 = vld [vmem:[%s6698_s1 + $0x3e8] sm:$0xf0]  ;;  %v4211_v62 = vld [vmem:[%s6698_s1 + $0x244] sm:$0xf] }
  0xb5   :  { %2305 = vmatpush.bf16.msrb.mxu1 %v2808_v5  ;;  %v2992_v5 = vor.u32 %v4191_v44, %v2989_v45  ;;  %v3160_v24 = vor.u32 %v4233_v3, %v3157_v4  ;;  %v3077_v44 = vld [vmem:[%s6698_s1 + $0x258] sm:$0xf0]  ;;  %v4229_v45 = vld [vmem:[%s6698_s1 + $0x2d4] sm:$0xf] }
  0xb6   :  { %2318 = vmatpush.bf16.msrb.mxu2 %v2872_v9  ;;  %v5808_v9 = vadd.f32 %v2076_v1, %v2064_v0  ;;  %v3080_v59 = vor.u32 %v4213_v41, %v3077_v44  ;;  %v3144_v60 = vor.u32 %v4229_v45, %v3141_v52  ;;  %v3133_v0 = vld [vmem:[%s6698_s1 + $0x2c8] sm:$0xf0]  ;;  %v4243_v1 = vld [vmem:[%s6698_s1 + $0x344] sm:$0xf]  ;;  %v4257_v45 = vld [vmem:[%s6698_s1 + $0x3b4] sm:$0xf] }
  0xb7   :  { %2331 = vmatpush.bf16.msrb.mxu3 %v2936_v10  ;;  %v2039_v10 = vpop.f32.mrf.mxu0  ;;  %v3253_v52 = vld [vmem:[%s6698_s1 + $0x3b8] sm:$0xf0] }
  0xb8   :  { %2343 = vmatpush.bf16.msra.mxu0 %v3008_v25  ;;  %v4215_v25 = vld [vmem:[%s6698_s1 + $0x264] sm:$0xf]  ;;  %v4209_v10 = vld [vmem:[%s6698_s1 + $0x234] sm:$0xf] }
  0xb9   :  { %2306 = vmatpush.bf16.msrb.mxu1 %v2800_v27  ;;  %v3224_v27 = vor.u32 %v4249_v7, %v3221_v8  ;;  %v3088_v37 = vor.u32 %v4215_v25, %v3085_v28  ;;  %v3269_v7 = vld [vmem:[%s6698_s1 + $0x3d8] sm:$0xf0] }
  0xba   :  { %2319 = vmatpush.bf16.msrb.mxu2 %v2864_v31  ;;  %v2984_v31 = vor.u32 %v4189_v14, %v2981_v18  ;;  %v2065_v36 = vpop.f32.mrf.mxu2  ;;  %v3061_v14 = vld [vmem:[%s6698_s1 + $0x238] sm:$0xf0]  ;;  %v4225_v18 = vld [vmem:[%s6698_s1 + $0x2b4] sm:$0xf] }
  0xbb   :  { %2332 = vmatpush.bf16.msrb.mxu3 %v2928_v32  ;;  %v4247_v32 = vld [vmem:[%s6698_s1 + $0x364] sm:$0xf]  ;;  %v3064_v28 = vor.u32 %v4209_v10, %v3061_v14  ;;  %v3128_v29 = vor.u32 %v4225_v18, %v3125_v19  ;;  %v3117_v36 = vld [vmem:[%s6698_s1 + $0x2a8] sm:$0xf0]  ;;  %v4297_v14 = vld [vmem:[%s6698_s1 + $0x4f4] sm:$0xf] }
  0xbc   :  { %2344 = vmatpush.bf16.msra.mxu0 %v3000_v42  ;;  %v2078_v42 = vpop.f32.mrf.mxu3 }
  0xbd   :  { %2307 = vmatpush.bf16.msrb.mxu1 %v2792_v43  ;;  %v3216_v43 = vor.u32 %v4247_v32, %v3213_v33 }
  0xbe   :  { %2320 = vmatpush.bf16.msrb.mxu2 %v2856_v54  ;;  %v2976_v54 = vor.u32 %v4187_v34, %v2973_v35  ;;  %v3053_v34 = vld [vmem:[%s6698_s1 + $0x228] sm:$0xf0]  ;;  %v4223_v35 = vld [vmem:[%s6698_s1 + $0x2a4] sm:$0xf] }
  0xbf   :  { %2333 = vmatpush.bf16.msrb.mxu3 %v2920_v56  ;;  %v4245_v56 = vld [vmem:[%s6698_s1 + $0x354] sm:$0xf] }
  0xc0   :  { %2345 = vmatpush.bf16.msra.mxu0 %v2992_v5  ;;  %v3136_v5 = vor.u32 %v4227_v63, %v3133_v0  ;;  %v2089_v8 = vpop.f32.mrf.mxu0  ;;  %v3245_v63 = vld [vmem:[%s6698_s1 + $0x3a8] sm:$0xf0] }
  0xc1   :  { %2308 = vmatpush.bf16.msrb.mxu1 %v2784_v6  ;;  %v4261_v6 = vld [vmem:[%s6698_s1 + $0x3d4] sm:$0xf] }
  0xc2   :  { %2321 = vmatpush.bf16.msrb.mxu2 %v2848_v11  ;;  %v3200_v11 = vor.u32 %v4243_v1, %v3197_v2  ;;  %v3272_v25 = vor.u32 %v4261_v6, %v3269_v7  ;;  %v4203_v2 = vld [vmem:[%s6698_s1 + $0x204] sm:$0xf]  ;;  %v3101_v6 = vld [vmem:[%s6698_s1 + $0x288] sm:$0xf0] }
  0xc3   :  { %2334 = vmatpush.bf16.msrb.mxu3 %v2912_v13  ;;  %v2090_v13 = vadd.f32 %v2089_v8, %v5808_v9  ;;  %v3189_v9 = vld [vmem:[%s6698_s1 + $0x338] sm:$0xf0]  ;;  %v4235_v7 = vld [vmem:[%s6698_s1 + $0x304] sm:$0xf]  ;;  %v3165_v8 = vld [vmem:[%s6698_s1 + $0x308] sm:$0xf0] }
  0xc4   :  { %2309 = vmatmul.bf16.vlgmr.msrb.gmra.mxu1 %v4882_v21  ;;  %2346 = vmatpush.bf16.msra.mxu0 %v2984_v31  ;;  %v4263_v21 = vld [vmem:[%s6698_s1 + $0x3e4] sm:$0xf] }
  0xc5   :  { %2353 = vmatpush.bf16.msra.mxu1 %v3096_v23  ;;  %2322 = vmatmul.bf16.vlgmr.msrb.gmra.mxu2 %v4893_v26  ;;  %v3208_v26 = vor.u32 %v4245_v56, %v3205_v57  ;;  %v3280_v3 = vor.u32 %v4263_v21, %v3277_v61  ;;  %v2102_v23 = vpop.f32.mrf.mxu1  ;;  %v4207_v31 = vld [vmem:[%s6698_s1 + $0x224] sm:$0xf]  ;;  %v4237_v61 = vld [vmem:[%s6698_s1 + $0x314] sm:$0xf] }
  0xc6   :  { %2366 = vmatpush.bf16.msra.mxu2 %v3160_v24  ;;  %2335 = vmatmul.bf16.vlgmr.msrb.gmra.mxu3 %v4880_v20  ;;  %v3069_v20 = vld [vmem:[%s6698_s1 + $0x248] sm:$0xf0]  ;;  %v4241_v24 = vld [vmem:[%s6698_s1 + $0x334] sm:$0xf]  ;;  %v3056_v42 = vor.u32 %v4207_v31, %v3053_v34 }
  0xc7   :  { %2379 = vmatpush.bf16.msra.mxu3 %v3224_v27  ;;  %v3072_v4 = vor.u32 %v4211_v62, %v3069_v20  ;;  %v2103_v27 = vadd.f32 %v2102_v23, %v2090_v13  ;;  %v3192_v32 = vor.u32 %v4241_v24, %v3189_v9  ;;  %v3173_v62 = vld [vmem:[%s6698_s1 + $0x318] sm:$0xf0]  ;;  %v4255_v20 = vld [vmem:[%s6698_s1 + $0x3a4] sm:$0xf]  ;;  %v4313_v24 = vld [vmem:[%s6698_s1 + $0x574] sm:$0xf] }
  0xc8   :  { %2347 = vmatpush.bf16.msra.mxu0 %v2976_v54  ;;  %v2115_v33 = vpop.f32.mrf.mxu2  ;;  %v4205_v54 = vld [vmem:[%s6698_s1 + $0x214] sm:$0xf]  ;;  %v2091_v56 = vpop.f32.mrf.mxu0  ;;  %v3349_v13 = vld [vmem:[%s6698_s1 + $0x478] sm:$0xf0]  ;;  %v3248_v19 = vor.u32 %v4255_v20, %v3245_v63  ;;  %v3341_v34 = vld [vmem:[%s6698_s1 + $0x468] sm:$0xf0] }
  0xc9   :  { %2354 = vmatpush.bf16.msra.mxu1 %v3088_v37  ;;  %v2116_v37 = vadd.f32 %v2115_v33, %v2103_v27  ;;  %v2128_v40 = vpop.f32.mrf.mxu3  ;;  %v3413_v23 = vld [vmem:[%s6698_s1 + $0x4f8] sm:$0xf0]  ;;  %v4279_v33 = vld [vmem:[%s6698_s1 + $0x464] sm:$0xf]  ;;  %v4277_v56 = vld [vmem:[%s6698_s1 + $0x454] sm:$0xf] }
  0xca   :  { %2367 = vmatpush.bf16.msra.mxu2 %v3152_v38  ;;  %v4239_v38 = vld [vmem:[%s6698_s1 + $0x324] sm:$0xf]  ;;  %v3477_v9 = vld [vmem:[%s6698_s1 + $0x578] sm:$0xf0]  ;;  %v3416_v31 = vor.u32 %v4297_v14, %v3413_v23  ;;  %v3533_v20 = vld [vmem:[%s6698_s1 + $0x5e8] sm:$0xf0] }
  0xcb   :  { %2380 = vmatpush.bf16.msra.mxu3 %v3216_v43  ;;  %2348 = vmatmul.bf16.vlgmr.msra.gmra.mxu0 %v4884_v22  ;;  %v3261_v22 = vld [vmem:[%s6698_s1 + $0x3c8] sm:$0xf0]  ;;  %v3120_v43 = vor.u32 %v4223_v35, %v3117_v36  ;;  %v5941_v44 = vadd.f32 %v2128_v40, %v2116_v37  ;;  %v3184_v57 = vor.u32 %v4239_v38, %v3181_v39  ;;  %v4295_v35 = vld [vmem:[%s6698_s1 + $0x4e4] sm:$0xf]  ;;  %v3317_v23 = vld [vmem:[%s6698_s1 + $0x438] sm:$0xf0] }
  0xcc   :  { %2392 = vmatpush.bf16.msrb.mxu0 %v3288_v58  ;;  %v3264_v41 = vor.u32 %v4259_v30, %v3261_v22  ;;  %v3045_v58 = vld [vmem:[%s6698_s1 + $0x218] sm:$0xf0]  ;;  %v3168_v30 = vor.u32 %v4235_v7, %v3165_v8  ;;  %v3405_v37 = vld [vmem:[%s6698_s1 + $0x4e8] sm:$0xf0]  ;;  %v4311_v38 = vld [vmem:[%s6698_s1 + $0x564] sm:$0xf] }
  0xcd   :  { %2355 = vmatpush.bf16.msra.mxu1 %v3080_v59  ;;  %v4221_v59 = vld [vmem:[%s6698_s1 + $0x294] sm:$0xf]  ;;  %v2104_v21 = vpop.f32.mrf.mxu1  ;;  %v3048_v0 = vor.u32 %v4205_v54, %v3045_v58  ;;  %v3469_v39 = vld [vmem:[%s6698_s1 + $0x568] sm:$0xf0]  ;;  %v4251_v40 = vld [vmem:[%s6698_s1 + $0x384] sm:$0xf] }
  0xce   :  { %2368 = vmatpush.bf16.msra.mxu2 %v3144_v60  ;;  %v3109_v60 = vld [vmem:[%s6698_s1 + $0x298] sm:$0xf0]  ;;  %v3472_v54 = vor.u32 %v4311_v38, %v3469_v39  ;;  %v4293_v58 = vld [vmem:[%s6698_s1 + $0x4d4] sm:$0xf] }
  0xcf   :  { %2381 = vmatpush.bf16.msra.mxu3 %v3208_v26  ;;  %v3256_v26 = vor.u32 %v4257_v45, %v3253_v52  ;;  %v3112_v1 = vor.u32 %v4221_v59, %v3109_v60  ;;  %v3541_v45 = vld [vmem:[%s6698_s1 + $0x5f8] sm:$0xf0]  ;;  %v3408_v52 = vor.u32 %v4295_v35, %v3405_v37  ;;  %v4309_v21 = vld [vmem:[%s6698_s1 + $0x554] sm:$0xf]  ;;  %v3373_v35 = vld [vmem:[%s6698_s1 + $0x4a8] sm:$0xf0] }
  0xd0   :  { %2393 = vmatpush.bf16.msrb.mxu0 %v3280_v3  ;;  %v3037_v3 = vld [vmem:[%s6698_s1 + $0x208] sm:$0xf0]  ;;  %v2117_v10 = vpop.f32.mrf.mxu2  ;;  %v3397_v60 = vld [vmem:[%s6698_s1 + $0x4d8] sm:$0xf0]  ;;  %v4325_v8 = vld [vmem:[%s6698_s1 + $0x5d4] sm:$0xf] }
  0xd1   :  { %2356 = vmatpush.bf16.msra.mxu1 %v3072_v4  ;;  %v4219_v4 = vld [vmem:[%s6698_s1 + $0x284] sm:$0xf]  ;;  %v2130_v18 = vpop.f32.mrf.mxu3  ;;  %v3400_v63 = vor.u32 %v4293_v58, %v3397_v60  ;;  %v3525_v10 = vld [vmem:[%s6698_s1 + $0x5d8] sm:$0xf0]  ;;  %v3437_v37 = vld [vmem:[%s6698_s1 + $0x528] sm:$0xf0] }
  0xd2   :  { %2369 = vmatpush.bf16.msra.mxu2 %v3136_v5  ;;  %v3176_v5 = vor.u32 %v4237_v61, %v3173_v62  ;;  %v3104_v27 = vor.u32 %v4219_v4, %v3101_v6  ;;  %v3461_v61 = vld [vmem:[%s6698_s1 + $0x558] sm:$0xf0]  ;;  %v3453_v4 = vld [vmem:[%s6698_s1 + $0x548] sm:$0xf0] }
  0xd3   :  { %2382 = vmatpush.bf16.msra.mxu3 %v3200_v11  ;;  %v4281_v11 = vld [vmem:[%s6698_s1 + $0x474] sm:$0xf]  ;;  %v3301_v58 = vld [vmem:[%s6698_s1 + $0x418] sm:$0xf0] }
  0xd4   :  { %2394 = vmatpush.bf16.msrb.mxu0 %v3272_v25  ;;  %v3040_v25 = vor.u32 %v4203_v2, %v3037_v3  ;;  %v3352_v22 = vor.u32 %v4281_v11, %v3349_v13  ;;  %v3389_v2 = vld [vmem:[%s6698_s1 + $0x4c8] sm:$0xf0]  ;;  %v4307_v3 = vld [vmem:[%s6698_s1 + $0x544] sm:$0xf] }
  0xd5   :  { %2357 = vmatpush.bf16.msra.mxu1 %v3064_v28  ;;  %v4253_v28 = vld [vmem:[%s6698_s1 + $0x394] sm:$0xf]  ;;  %v3456_v14 = vor.u32 %v4307_v3, %v3453_v4  ;;  %v4283_v3 = vld [vmem:[%s6698_s1 + $0x484] sm:$0xf]  ;;  %v3357_v4 = vld [vmem:[%s6698_s1 + $0x488] sm:$0xf0] }
  0xd6   :  { %2370 = vmatpush.bf16.msra.mxu2 %v3128_v29  ;;  %v3237_v29 = vld [vmem:[%s6698_s1 + $0x398] sm:$0xf0] }
  0xd7   :  { %2383 = vmatpush.bf16.msra.mxu3 %v3192_v32  ;;  %v3480_v32 = vor.u32 %v4313_v24, %v3477_v9  ;;  %v3240_v36 = vor.u32 %v4253_v28, %v3237_v29  ;;  %v4289_v24 = vld [vmem:[%s6698_s1 + $0x4b4] sm:$0xf]  ;;  %v3528_v28 = vor.u32 %v4325_v8, %v3525_v10  ;;  %v3605_v8 = vld [vmem:[%s6698_s1 + $0x678] sm:$0xf0] }
  0xd8   :  { %2395 = vmatpush.bf16.msrb.mxu0 %v3264_v41  ;;  %v3229_v41 = vld [vmem:[%s6698_s1 + $0x388] sm:$0xf0]  ;;  %v4305_v9 = vld [vmem:[%s6698_s1 + $0x534] sm:$0xf] }
  0xd9   :  { %2358 = vmatpush.bf16.msra.mxu1 %v3056_v42  ;;  %v3344_v42 = vor.u32 %v4279_v33, %v3341_v34  ;;  %v3232_v59 = vor.u32 %v4251_v40, %v3229_v41  ;;  %v3309_v33 = vld [vmem:[%s6698_s1 + $0x428] sm:$0xf0]  ;;  %v4287_v34 = vld [vmem:[%s6698_s1 + $0x4a4] sm:$0xf] }
  0xda   :  { %2371 = vmatpush.bf16.msra.mxu2 %v3120_v43  ;;  %v4329_v43 = vld [vmem:[%s6698_s1 + $0x5f4] sm:$0xf] }
  0xdb   :  { %2384 = vmatpush.bf16.msra.mxu3 %v3184_v57  ;;  %v3333_v57 = vld [vmem:[%s6698_s1 + $0x458] sm:$0xf0]  ;;  %v3544_v62 = vor.u32 %v4329_v43, %v3541_v45  ;;  %v4321_v43 = vld [vmem:[%s6698_s1 + $0x5b4] sm:$0xf] }
  0xdc   :  { %2396 = vmatpush.bf16.msrb.mxu0 %v3256_v26  ;;  %v4327_v26 = vld [vmem:[%s6698_s1 + $0x5e4] sm:$0xf]  ;;  %v3509_v45 = vld [vmem:[%s6698_s1 + $0x5b8] sm:$0xf0] }
  0xdd   :  { %2359 = vmatpush.bf16.msra.mxu1 %v3048_v0  ;;  %v3464_v0 = vor.u32 %v4309_v21, %v3461_v61  ;;  %v3365_v61 = vld [vmem:[%s6698_s1 + $0x498] sm:$0xf0] }
  0xde   :  { %2372 = vmatpush.bf16.msra.mxu2 %v3112_v1  ;;  %v4291_v1 = vld [vmem:[%s6698_s1 + $0x4c4] sm:$0xf] }
  0xdf   :  { %2385 = vmatpush.bf16.msra.mxu3 %v3176_v5  ;;  %v3536_v5 = vor.u32 %v4327_v26, %v3533_v20  ;;  %v3392_v13 = vor.u32 %v4291_v1, %v3389_v2  ;;  %v3512_v26 = vor.u32 %v4321_v43, %v3509_v45  ;;  %v4319_v20 = vld [vmem:[%s6698_s1 + $0x5a4] sm:$0xf] }
  0xe0   :  { %2397 = vmatpush.bf16.msrb.mxu0 %v3248_v19  ;;  %v2141_v6 = vpop.f32.mrf.mxu0  ;;  %v4273_v19 = vld [vmem:[%s6698_s1 + $0x434] sm:$0xf] }
  0xe1   :  { %2360 = vmatpush.bf16.msra.mxu1 %v3040_v25  ;;  %v2142_v11 = vadd.f32 %v2141_v6, %v5941_v44  ;;  %v2154_v18 = vpop.f32.mrf.mxu1  ;;  %v3381_v44 = vld [vmem:[%s6698_s1 + $0x4b8] sm:$0xf0]  ;;  %v3320_v29 = vor.u32 %v4273_v19, %v3317_v23  ;;  %v3421_v6 = vld [vmem:[%s6698_s1 + $0x508] sm:$0xf0] }
  0xe2   :  { %2373 = vmatpush.bf16.msra.mxu2 %v3104_v27  ;;  %v3445_v25 = vld [vmem:[%s6698_s1 + $0x538] sm:$0xf0] }
  0xe3   :  { %2386 = vmatpush.bf16.msra.mxu3 %v3168_v30  ;;  %v2155_v27 = vadd.f32 %v2154_v18, %v2142_v11  ;;  %v3517_v30 = vld [vmem:[%s6698_s1 + $0x5c8] sm:$0xf0]  ;;  %v4361_v11 = vld [vmem:[%s6698_s1 + $0x6f4] sm:$0xf]  ;;  %v3733_v23 = vld [vmem:[%s6698_s1 + $0x778] sm:$0xf0] }
  0xe4   :  { %2398 = vmatpush.bf16.msrb.mxu0 %v3240_v36  ;;  %2361 = vmatmul.bf16.vlgmr.msra.gmra.mxu1 %v4948_v51  ;;  %v3325_v51 = vld [vmem:[%s6698_s1 + $0x448] sm:$0xf0]  ;;  %v4303_v36 = vld [vmem:[%s6698_s1 + $0x524] sm:$0xf] }
  0xe5   :  { %2405 = vmatpush.bf16.msrb.mxu1 %v3352_v22  ;;  %2374 = vmatmul.bf16.vlgmr.msra.gmra.mxu2 %v4955_v55  ;;  %v3336_v55 = vor.u32 %v4277_v56, %v3333_v57  ;;  %v3384_v22 = vor.u32 %v4289_v24, %v3381_v44  ;;  %v3440_v56 = vor.u32 %v4303_v36, %v3437_v37  ;;  %v4269_v57 = vld [vmem:[%s6698_s1 + $0x414] sm:$0xf]  ;;  %v3493_v44 = vld [vmem:[%s6698_s1 + $0x598] sm:$0xf0]  ;;  %v4315_v36 = vld [vmem:[%s6698_s1 + $0x584] sm:$0xf] }
  0xe6   :  { %2418 = vmatpush.bf16.msrb.mxu2 %v3416_v31  ;;  %2387 = vmatmul.bf16.vlgmr.msra.gmra.mxu3 %v4946_v50  ;;  %v4275_v50 = vld [vmem:[%s6698_s1 + $0x444] sm:$0xf]  ;;  %v3448_v31 = vor.u32 %v4305_v9, %v3445_v25  ;;  %v4317_v24 = vld [vmem:[%s6698_s1 + $0x594] sm:$0xf]  ;;  %v3360_v25 = vor.u32 %v4283_v3, %v3357_v4  ;;  %v3485_v37 = vld [vmem:[%s6698_s1 + $0x588] sm:$0xf0] }
  0xe7   :  { %2431 = vmatpush.bf16.msrb.mxu3 %v3480_v32  ;;  %v3328_v7 = vor.u32 %v4275_v50, %v3325_v51  ;;  %v4271_v32 = vld [vmem:[%s6698_s1 + $0x424] sm:$0xf]  ;;  %v3293_v51 = vld [vmem:[%s6698_s1 + $0x408] sm:$0xf0]  ;;  %v3488_v45 = vor.u32 %v4315_v36, %v3485_v37  ;;  %v4333_v36 = vld [vmem:[%s6698_s1 + $0x614] sm:$0xf] }
  0xe8   :  { %2399 = vmatpush.bf16.msrb.mxu0 %v3232_v59  ;;  %v2167_v38 = vpop.f32.mrf.mxu2  ;;  %v4285_v59 = vld [vmem:[%s6698_s1 + $0x494] sm:$0xf]  ;;  %v4267_v50 = vld [vmem:[%s6698_s1 + $0x404] sm:$0xf] }
  0xe9   :  { %2406 = vmatpush.bf16.msrb.mxu1 %v3344_v42  ;;  %v2168_v40 = vadd.f32 %v2167_v38, %v2155_v27  ;;  %v2180_v41 = vpop.f32.mrf.mxu3  ;;  %v3312_v42 = vor.u32 %v4271_v32, %v3309_v33  ;;  %v2156_v60 = vpop.f32.mrf.mxu1  ;;  %v3368_v1 = vor.u32 %v4285_v59, %v3365_v61  ;;  %v3296_v19 = vor.u32 %v4267_v50, %v3293_v51  ;;  %v4359_v32 = vld [vmem:[%s6698_s1 + $0x6e4] sm:$0xf]  ;;  %v3661_v33 = vld [vmem:[%s6698_s1 + $0x6e8] sm:$0xf0]  ;;  %v4393_v38 = vld [vmem:[%s6698_s1 + $0x7f4] sm:$0xf] }
  0xea   :  { %2419 = vmatpush.bf16.msrb.mxu2 %v3408_v52  ;;  %v2143_v52 = vpop.f32.mrf.mxu0  ;;  %v3717_v59 = vld [vmem:[%s6698_s1 + $0x758] sm:$0xf0]  ;;  %v4391_v60 = vld [vmem:[%s6698_s1 + $0x7e4] sm:$0xf]  ;;  %v3709_v50 = vld [vmem:[%s6698_s1 + $0x748] sm:$0xf0] }
  0xeb   :  { %2432 = vmatpush.bf16.msrb.mxu3 %v3472_v54  ;;  %2400 = vmatmul.bf16.vlgmr.msrb.gmra.mxu0 %v4950_v53  ;;  %v4323_v53 = vld [vmem:[%s6698_s1 + $0x5c4] sm:$0xf]  ;;  %v3376_v54 = vor.u32 %v4287_v34, %v3373_v35  ;;  %v6155_v21 = vadd.f32 %v2180_v41, %v2168_v40  ;;  %v3725_v35 = vld [vmem:[%s6698_s1 + $0x768] sm:$0xf0]  ;;  %v3664_v41 = vor.u32 %v4359_v32, %v3661_v33  ;;  %v3589_v52 = vld [vmem:[%s6698_s1 + $0x658] sm:$0xf0] }
  0xec   :  { %2444 = vmatpush.bf16.msra.mxu0 %v3544_v62  ;;  %v3520_v39 = vor.u32 %v4323_v53, %v3517_v30  ;;  %v4301_v62 = vld [vmem:[%s6698_s1 + $0x514] sm:$0xf]  ;;  %v4343_v53 = vld [vmem:[%s6698_s1 + $0x664] sm:$0xf]  ;;  %v3597_v30 = vld [vmem:[%s6698_s1 + $0x668] sm:$0xf0] }
  0xed   :  { %2407 = vmatpush.bf16.msrb.mxu1 %v3336_v55  ;;  %v3429_v55 = vld [vmem:[%s6698_s1 + $0x518] sm:$0xf0]  ;;  %v4375_v34 = vld [vmem:[%s6698_s1 + $0x764] sm:$0xf]  ;;  %v3600_v40 = vor.u32 %v4343_v53, %v3597_v30  ;;  %v4389_v51 = vld [vmem:[%s6698_s1 + $0x7d4] sm:$0xf] }
  0xee   :  { %2420 = vmatpush.bf16.msrb.mxu2 %v3400_v63  ;;  %v3304_v63 = vor.u32 %v4269_v57, %v3301_v58  ;;  %v3432_v2 = vor.u32 %v4301_v62, %v3429_v55  ;;  %v3728_v43 = vor.u32 %v4375_v34, %v3725_v35  ;;  %v4373_v58 = vld [vmem:[%s6698_s1 + $0x754] sm:$0xf]  ;;  %v4339_v62 = vld [vmem:[%s6698_s1 + $0x644] sm:$0xf]  ;;  %v3693_v30 = vld [vmem:[%s6698_s1 + $0x728] sm:$0xf0] }
  0xef   :  { %2433 = vmatpush.bf16.msrb.mxu3 %v3464_v0  ;;  %v3501_v0 = vld [vmem:[%s6698_s1 + $0x5a8] sm:$0xf0]  ;;  %v3720_v55 = vor.u32 %v4373_v58, %v3717_v59  ;;  %v4367_v53 = vld [vmem:[%s6698_s1 + $0x724] sm:$0xf]  ;;  %v3765_v32 = vld [vmem:[%s6698_s1 + $0x7b8] sm:$0xf0] }
  0xf0   :  { %2445 = vmatpush.bf16.msra.mxu0 %v3536_v5  ;;  %v4299_v5 = vld [vmem:[%s6698_s1 + $0x504] sm:$0xf]  ;;  %v3504_v10 = vor.u32 %v4319_v20, %v3501_v0  ;;  %v2169_v18 = vpop.f32.mrf.mxu2  ;;  %v3645_v20 = vld [vmem:[%s6698_s1 + $0x6c8] sm:$0xf0] }
  0xf1   :  { %2408 = vmatpush.bf16.msrb.mxu1 %v3328_v7  ;;  %v4345_v7 = vld [vmem:[%s6698_s1 + $0x674] sm:$0xf]  ;;  %v2182_v9 = vpop.f32.mrf.mxu3  ;;  %v3424_v27 = vor.u32 %v4299_v5, %v3421_v6  ;;  %v4371_v0 = vld [vmem:[%s6698_s1 + $0x744] sm:$0xf] }
  0xf2   :  { %2421 = vmatpush.bf16.msrb.mxu2 %v3392_v13  ;;  %v3669_v13 = vld [vmem:[%s6698_s1 + $0x6f8] sm:$0xf0]  ;;  %v4337_v5 = vld [vmem:[%s6698_s1 + $0x634] sm:$0xf]  ;;  %v3712_v6 = vor.u32 %v4371_v0, %v3709_v50  ;;  %v4387_v18 = vld [vmem:[%s6698_s1 + $0x7c4] sm:$0xf] }
  0xf3   :  { %2434 = vmatpush.bf16.msrb.mxu3 %v3456_v14  ;;  %v4377_v14 = vld [vmem:[%s6698_s1 + $0x774] sm:$0xf]  ;;  %v4331_v59 = vld [vmem:[%s6698_s1 + $0x604] sm:$0xf]  ;;  %v3925_v0 = vld [vmem:[%s6698_s1 + $0x8f8] sm:$0xf0] }
  0xf4   :  { %2446 = vmatpush.bf16.msra.mxu0 %v3528_v28  ;;  %v3608_v28 = vor.u32 %v4345_v7, %v3605_v8  ;;  %v3573_v8 = vld [vmem:[%s6698_s1 + $0x638] sm:$0xf0]  ;;  %v4441_v50 = vld [vmem:[%s6698_s1 + $0x974] sm:$0xf] }
  0xf5   :  { %2409 = vmatpush.bf16.msrb.mxu1 %v3320_v29  ;;  %v3672_v29 = vor.u32 %v4361_v11, %v3669_v13  ;;  %v3637_v11 = vld [vmem:[%s6698_s1 + $0x6b8] sm:$0xf0] }
  0xf6   :  { %2422 = vmatpush.bf16.msrb.mxu2 %v3384_v22  ;;  %v3736_v22 = vor.u32 %v4377_v14, %v3733_v23  ;;  %v3701_v14 = vld [vmem:[%s6698_s1 + $0x738] sm:$0xf0]  ;;  %v3576_v23 = vor.u32 %v4337_v5, %v3573_v8  ;;  %v4381_v5 = vld [vmem:[%s6698_s1 + $0x794] sm:$0xf] }
  0xf7   :  { %2435 = vmatpush.bf16.msrb.mxu3 %v3448_v31  ;;  %v3496_v31 = vor.u32 %v4317_v24, %v3493_v44  ;;  %v4335_v44 = vld [vmem:[%s6698_s1 + $0x624] sm:$0xf] }
  0xf8   :  { %2447 = vmatpush.bf16.msra.mxu0 %v3520_v39  ;;  %v3797_v39 = vld [vmem:[%s6698_s1 + $0x7f8] sm:$0xf0] }
  0xf9   :  { %2410 = vmatpush.bf16.msrb.mxu1 %v3312_v42  ;;  %v4341_v42 = vld [vmem:[%s6698_s1 + $0x654] sm:$0xf]  ;;  %v3800_v57 = vor.u32 %v4393_v38, %v3797_v39  ;;  %v3696_v38 = vor.u32 %v4367_v53, %v3693_v30  ;;  %v3557_v39 = vld [vmem:[%s6698_s1 + $0x618] sm:$0xf0] }
  0xfa   :  { %2423 = vmatpush.bf16.msrb.mxu2 %v3376_v54  ;;  %v4357_v54 = vld [vmem:[%s6698_s1 + $0x6d4] sm:$0xf]  ;;  %v4053_v53 = vld [vmem:[%s6698_s1 + $0x9f8] sm:$0xf0] }
  0xfb   :  { %2436 = vmatpush.bf16.msrb.mxu3 %v3440_v56  ;;  %v3653_v56 = vld [vmem:[%s6698_s1 + $0x6d8] sm:$0xf0] }
  0xfc   :  { %2448 = vmatpush.bf16.msra.mxu0 %v3512_v26  ;;  %v3656_v61 = vor.u32 %v4357_v54, %v3653_v56  ;;  %v4355_v26 = vld [vmem:[%s6698_s1 + $0x6c4] sm:$0xf]  ;;  %v3757_v56 = vld [vmem:[%s6698_s1 + $0x7a8] sm:$0xf0] }
  0xfd   :  { %2411 = vmatpush.bf16.msrb.mxu1 %v3304_v63  ;;  %v3648_v4 = vor.u32 %v4355_v26, %v3645_v20  ;;  %v4383_v54 = vld [vmem:[%s6698_s1 + $0x7a4] sm:$0xf]  ;;  %v4409_v26 = vld [vmem:[%s6698_s1 + $0x874] sm:$0xf]  ;;  %v3861_v20 = vld [vmem:[%s6698_s1 + $0x878] sm:$0xf0] }
  0xfe   :  { %2424 = vmatpush.bf16.msrb.mxu2 %v3368_v1  ;;  %v3781_v1 = vld [vmem:[%s6698_s1 + $0x7d8] sm:$0xf0] }
  0xff   :  { %2437 = vmatpush.bf16.msrb.mxu3 %v3432_v2  ;;  %v3784_v13 = vor.u32 %v4389_v51, %v3781_v1  ;;  %v3989_v51 = vld [vmem:[%s6698_s1 + $0x978] sm:$0xf0] }
 0x100   :  { %2449 = vmatpush.bf16.msra.mxu0 %v3504_v10  ;;  %v6295_v2 = vpop.f32.mrf.mxu0  ;;  %v4353_v10 = vld [vmem:[%s6698_s1 + $0x6b4] sm:$0xf] }
 0x101   :  { %2412 = vmatpush.bf16.msrb.mxu1 %v3296_v19  ;;  %v6301_v7 = vpop.f32.mrf.mxu1  ;;  %v3773_v19 = vld [vmem:[%s6698_s1 + $0x7c8] sm:$0xf0]  ;;  %v3640_v24 = vor.u32 %v4353_v10, %v3637_v11  ;;  %v3864_v11 = vor.u32 %v4409_v26, %v3861_v20 }
 0x102   :  { %2425 = vmatpush.bf16.msrb.mxu2 %v3360_v25  ;;  %v3565_v25 = vld [vmem:[%s6698_s1 + $0x628] sm:$0xf0] }
 0x103   :  { %2438 = vmatpush.bf16.msrb.mxu3 %v3424_v27  ;;  %v4351_v27 = vld [vmem:[%s6698_s1 + $0x6a4] sm:$0xf]  ;;  %v3568_v34 = vor.u32 %v4335_v44, %v3565_v25 }
 0x104   :  { %2450 = vmatpush.bf16.msra.mxu0 %v3496_v31  ;;  %2413 = vmatmul.bf16.vlgmr.msrb.gmra.mxu1 %v5225_v12  ;;  %v3789_v12 = vld [vmem:[%s6698_s1 + $0x7e8] sm:$0xf0]  ;;  %v4385_v31 = vld [vmem:[%s6698_s1 + $0x7b4] sm:$0xf]  ;;  %v4439_v44 = vld [vmem:[%s6698_s1 + $0x964] sm:$0xf] }
 0x105   :  { %2457 = vmatpush.bf16.msra.mxu1 %v3608_v28  ;;  %2426 = vmatmul.bf16.vlgmr.msrb.gmra.mxu2 %v5235_v16  ;;  %v3592_v16 = vor.u32 %v4341_v42, %v3589_v52  ;;  %v3792_v63 = vor.u32 %v4391_v60, %v3789_v12  ;;  %v3629_v28 = vld [vmem:[%s6698_s1 + $0x6a8] sm:$0xf0]  ;;  %v3685_v52 = vld [vmem:[%s6698_s1 + $0x718] sm:$0xf0]  ;;  %v4347_v12 = vld [vmem:[%s6698_s1 + $0x684] sm:$0xf] }
 0x106   :  { %2470 = vmatpush.bf16.msra.mxu2 %v3672_v29  ;;  %2439 = vmatmul.bf16.vlgmr.msrb.gmra.mxu3 %v5233_v15  ;;  %v3581_v15 = vld [vmem:[%s6698_s1 + $0x648] sm:$0xf0]  ;;  %v3776_v29 = vor.u32 %v4387_v18, %v3773_v19  ;;  %v3632_v35 = vor.u32 %v4351_v27, %v3629_v28  ;;  %v4423_v19 = vld [vmem:[%s6698_s1 + $0x8e4] sm:$0xf] }
 0x107   :  { %2483 = vmatpush.bf16.msra.mxu3 %v3736_v22  ;;  %v3584_v3 = vor.u32 %v4339_v62, %v3581_v15  ;;  %v3549_v60 = vld [vmem:[%s6698_s1 + $0x608] sm:$0xf0]  ;;  %v4363_v62 = vld [vmem:[%s6698_s1 + $0x704] sm:$0xf]  ;;  %v3760_v15 = vor.u32 %v4383_v54, %v3757_v56 }
 0x108   :  { %2451 = vmatpush.bf16.msra.mxu0 %v3488_v45  ;;  %v6342_v22 = vpop.f32.mrf.mxu2  ;;  %v2195_v37 = vpop.f32.mrf.mxu0  ;;  %v4365_v45 = vld [vmem:[%s6698_s1 + $0x714] sm:$0xf]  ;;  %v3853_v18 = vld [vmem:[%s6698_s1 + $0x868] sm:$0xf0]  ;;  %v4379_v25 = vld [vmem:[%s6698_s1 + $0x784] sm:$0xf] }
 0x109   :  { %2458 = vmatpush.bf16.msra.mxu1 %v3600_v40  ;;  %v6350_v33 = vpop.f32.mrf.mxu3  ;;  %v4349_v40 = vld [vmem:[%s6698_s1 + $0x694] sm:$0xf]  ;;  %v2208_v42 = vpop.f32.mrf.mxu1  ;;  %v3741_v27 = vld [vmem:[%s6698_s1 + $0x788] sm:$0xf0]  ;;  %v3909_v37 = vld [vmem:[%s6698_s1 + $0x8d8] sm:$0xf0] }
 0x10a   :  { %2471 = vmatpush.bf16.msra.mxu2 %v3664_v41  ;;  %v3621_v41 = vld [vmem:[%s6698_s1 + $0x698] sm:$0xf0]  ;;  %v4045_v42 = vld [vmem:[%s6698_s1 + $0x9e8] sm:$0xf0]  ;;  %v4435_v56 = vld [vmem:[%s6698_s1 + $0x944] sm:$0xf] }
 0x10b   :  { %2484 = vmatpush.bf16.msra.mxu3 %v3728_v43  ;;  %2452 = vmatmul.bf16.vlgmr.msra.gmra.mxu0 %v5237_v17  ;;  %v4369_v17 = vld [vmem:[%s6698_s1 + $0x734] sm:$0xf]  ;;  %v3768_v43 = vor.u32 %v4385_v31, %v3765_v32  ;;  %v3624_v58 = vor.u32 %v4349_v40, %v3621_v41  ;;  %v4455_v41 = vld [vmem:[%s6698_s1 + $0x9e4] sm:$0xf]  ;;  %v3901_v54 = vld [vmem:[%s6698_s1 + $0x8c8] sm:$0xf0] }
 0x10c   :  { %2496 = vmatpush.bf16.msrb.mxu0 %v3800_v57  ;;  %v3704_v9 = vor.u32 %v4369_v17, %v3701_v14  ;;  %v3560_v57 = vor.u32 %v4333_v36, %v3557_v39  ;;  %v3992_v17 = vor.u32 %v4441_v50, %v3989_v51  ;;  %v4407_v14 = vld [vmem:[%s6698_s1 + $0x864] sm:$0xf]  ;;  %v4405_v32 = vld [vmem:[%s6698_s1 + $0x854] sm:$0xf]  ;;  %v3744_v36 = vor.u32 %v4379_v25, %v3741_v27  ;;  %v3973_v39 = vld [vmem:[%s6698_s1 + $0x958] sm:$0xf0] }
 0x10d   :  { %2459 = vmatpush.bf16.msra.mxu1 %v3592_v16  ;;  %v3688_v16 = vor.u32 %v4365_v45, %v3685_v52  ;;  %v3856_v28 = vor.u32 %v4407_v14, %v3853_v18  ;;  %v4419_v52 = vld [vmem:[%s6698_s1 + $0x8c4] sm:$0xf]  ;;  %v3957_v50 = vld [vmem:[%s6698_s1 + $0x938] sm:$0xf0]  ;;  %v4397_v27 = vld [vmem:[%s6698_s1 + $0x814] sm:$0xf] }
 0x10e   :  { %2472 = vmatpush.bf16.msra.mxu2 %v3656_v61  ;;  %v3613_v61 = vld [vmem:[%s6698_s1 + $0x688] sm:$0xf0] }
 0x10f   :  { %2485 = vmatpush.bf16.msra.mxu3 %v3720_v55  ;;  %v3677_v55 = vld [vmem:[%s6698_s1 + $0x708] sm:$0xf0] }
 0x110   :  { %2497 = vmatpush.bf16.msrb.mxu0 %v3792_v63  ;;  %v4425_v63 = vld [vmem:[%s6698_s1 + $0x8f4] sm:$0xf]  ;;  %v2221_v1 = vpop.f32.mrf.mxu2  ;;  %v3680_v10 = vor.u32 %v4363_v62, %v3677_v55  ;;  %v3829_v55 = vld [vmem:[%s6698_s1 + $0x838] sm:$0xf0] }
 0x111   :  { %2460 = vmatpush.bf16.msra.mxu1 %v3584_v3  ;;  %v3552_v3 = vor.u32 %v4331_v59, %v3549_v60  ;;  %v2234_v8 = vpop.f32.mrf.mxu3  ;;  %v4453_v60 = vld [vmem:[%s6698_s1 + $0x9d4] sm:$0xf] }
 0x112   :  { %2473 = vmatpush.bf16.msra.mxu2 %v3648_v4  ;;  %v3616_v4 = vor.u32 %v4347_v12, %v3613_v61  ;;  %v4037_v12 = vld [vmem:[%s6698_s1 + $0x9d8] sm:$0xf0]  ;;  %v4401_v62 = vld [vmem:[%s6698_s1 + $0x834] sm:$0xf]  ;;  %v3821_v8 = vld [vmem:[%s6698_s1 + $0x828] sm:$0xf0] }
 0x113   :  { %2486 = vmatpush.bf16.msra.mxu3 %v3712_v6  ;;  %v3749_v6 = vld [vmem:[%s6698_s1 + $0x798] sm:$0xf0]  ;;  %v4040_v51 = vor.u32 %v4453_v60, %v4037_v12  ;;  %v3832_v1 = vor.u32 %v4401_v62, %v3829_v55 }
 0x114   :  { %2498 = vmatpush.bf16.msrb.mxu0 %v3784_v13  ;;  %v3928_v13 = vor.u32 %v4425_v63, %v3925_v0  ;;  %v3893_v63 = vld [vmem:[%s6698_s1 + $0x8b8] sm:$0xf0]  ;;  %v4433_v0 = vld [vmem:[%s6698_s1 + $0x934] sm:$0xf] }
 0x115   :  { %2461 = vmatpush.bf16.msra.mxu1 %v3576_v23  ;;  %v3752_v23 = vor.u32 %v4381_v5, %v3749_v6  ;;  %v3960_v5 = vor.u32 %v4433_v0, %v3957_v50  ;;  %v4399_v6 = vld [vmem:[%s6698_s1 + $0x824] sm:$0xf]  ;;  %v4470_v62 = vld [vmem:[%s6700_s3 + $0x38] sm:$0xff]  ;;  %v4061_v50 = vld [vmem:[%s6698_s1 + $0xa08] sm:$0xf0] }
 0x116   :  { %2474 = vmatpush.bf16.msra.mxu2 %v3640_v24  ;;  %v3917_v24 = vld [vmem:[%s6698_s1 + $0x8e8] sm:$0xf0]  ;;  %v4459_v0 = vld [vmem:[%s6698_s1 + $0xa04] sm:$0xf] }
 0x117   :  { %2487 = vmatpush.bf16.msra.mxu3 %v3704_v9  ;;  %v3981_v9 = vld [vmem:[%s6698_s1 + $0x968] sm:$0xf0]  ;;  %v3920_v30 = vor.u32 %v4423_v19, %v3917_v24  ;;  %v3824_v19 = vor.u32 %v4399_v6, %v3821_v8  ;;  %v4021_v24 = vld [vmem:[%s6698_s1 + $0x9b8] sm:$0xf0]  ;;  %v4484_v6 = vld [vmem:[#allocation1 + $0x12] sm:$0xff] }
 0x118   :  { %2499 = vmatpush.bf16.msrb.mxu0 %v3776_v29  ;;  %v4457_v29 = vld [vmem:[%s6698_s1 + $0x9f4] sm:$0xf]  ;;  %v3984_v31 = vor.u32 %v4439_v44, %v3981_v9 }
 0x119   :  { %2462 = vmatpush.bf16.msra.mxu1 %v3568_v34  ;;  %v3845_v34 = vld [vmem:[%s6698_s1 + $0x858] sm:$0xf0]  ;;  %v4056_v40 = vor.u32 %v4457_v29, %v4053_v53  ;;  %v4413_v29 = vld [vmem:[%s6698_s1 + $0x894] sm:$0xf] }
 0x11a   :  { %2475 = vmatpush.bf16.msra.mxu2 %v3632_v35  ;;  %v4421_v35 = vld [vmem:[%s6698_s1 + $0x8d4] sm:$0xf] }
 0x11b   :  { %2488 = vmatpush.bf16.msra.mxu3 %v3696_v38  ;;  %v4437_v38 = vld [vmem:[%s6698_s1 + $0x954] sm:$0xf] }
 0x11c   :  { %2500 = vmatpush.bf16.msrb.mxu0 %v3768_v43  ;;  %v3912_v43 = vor.u32 %v4421_v35, %v3909_v37  ;;  %v3976_v45 = vor.u32 %v4437_v38, %v3973_v39  ;;  %v4447_v37 = vld [vmem:[%s6698_s1 + $0x9a4] sm:$0xf]  ;;  %v4013_v38 = vld [vmem:[%s6698_s1 + $0x9a8] sm:$0xf0] }
 0x11d   :  { %2463 = vmatpush.bf16.msra.mxu1 %v3560_v57  ;;  %v3965_v57 = vld [vmem:[%s6698_s1 + $0x948] sm:$0xf0] }
 0x11e   :  { %2476 = vmatpush.bf16.msra.mxu2 %v3624_v58  ;;  %v4048_v58 = vor.u32 %v4455_v41, %v4045_v42  ;;  %v3968_v61 = vor.u32 %v4435_v56, %v3965_v57  ;;  %v3805_v41 = vld [vmem:[%s6698_s1 + $0x808] sm:$0xf0]  ;;  %v4411_v42 = vld [vmem:[%s6698_s1 + $0x884] sm:$0xf] }
 0x11f   :  { %2489 = vmatpush.bf16.msra.mxu3 %v3688_v16  ;;  %v3904_v16 = vor.u32 %v4419_v52, %v3901_v54  ;;  %v4461_v52 = vld [vmem:[%s6698_s1 + $0xa14] sm:$0xf]  ;;  %v4069_v54 = vld [vmem:[%s6698_s1 + $0xa18] sm:$0xf0] }
 0x120   :  { %2501 = vmatpush.bf16.msrb.mxu0 %v3760_v15  ;;  %v4417_v15 = vld [vmem:[%s6698_s1 + $0x8b4] sm:$0xf]  ;;  %v6508_v26 = vpop.f32.mrf.mxu0  ;;  %v4072_v55 = vor.u32 %v4461_v52, %v4069_v54 }
 0x121   :  { %2464 = vmatpush.bf16.msra.mxu1 %v3552_v3  ;;  %v6511_v20 = vpop.f32.mrf.mxu1  ;;  %v4029_v3 = vld [vmem:[%s6698_s1 + $0x9c8] sm:$0xf0] }
 0x122   :  { %2477 = vmatpush.bf16.msra.mxu2 %v3616_v4  ;;  %v3896_v4 = vor.u32 %v4417_v15, %v3893_v63  ;;  %v2194_v15 = vadd.f32 %v6295_v2, %v6155_v21  ;;  %v4469_v21 = vld [vmem:[%s6700_s3 + $0x30] sm:$0xff]  ;;  %v4064_v2 = vor.u32 %v4459_v0, %v4061_v50  ;;  %v4476_v50 = vld [vmem:[%s6700_s3 + $0x68] sm:$0xff] }
 0x123   :  { %2490 = vmatpush.bf16.msra.mxu3 %v3680_v10  ;;  %v4415_v10 = vld [vmem:[%s6698_s1 + $0x8a4] sm:$0xf] }
 0x124   :  { %2502 = vmatpush.bf16.msrb.mxu0 %v3752_v23  ;;  %2465 = vmatmul.bf16.vlgmr.msra.gmra.mxu1 %v5399_v46  ;;  %v3848_v46 = vor.u32 %v4405_v32, %v3845_v34  ;;  %v4449_v23 = vld [vmem:[%s6698_s1 + $0x9b4] sm:$0xf]  ;;  %v3941_v32 = vld [vmem:[%s6698_s1 + $0x918] sm:$0xf0] }
 0x125   :  { %2509 = vmatpush.bf16.msrb.mxu1 %v3864_v11  ;;  %2478 = vmatmul.bf16.vlgmr.msra.gmra.mxu2 %v5403_v48  ;;  %v4403_v48 = vld [vmem:[%s6698_s1 + $0x844] sm:$0xf]  ;;  %v3885_v11 = vld [vmem:[%s6698_s1 + $0x8a8] sm:$0xf0]  ;;  %v4024_v35 = vor.u32 %v4449_v23, %v4021_v24 }
 0x126   :  { %2522 = vmatpush.bf16.msrb.mxu2 %v3928_v13  ;;  %2491 = vmatmul.bf16.vlgmr.msra.gmra.mxu3 %v5401_v47  ;;  %v3837_v47 = vld [vmem:[%s6698_s1 + $0x848] sm:$0xf0]  ;;  %v4431_v13 = vld [vmem:[%s6698_s1 + $0x924] sm:$0xf]  ;;  %v3888_v9 = vor.u32 %v4415_v10, %v3885_v11 }
 0x127   :  { %2535 = vmatpush.bf16.msrb.mxu3 %v3992_v17  ;;  %v3840_v59 = vor.u32 %v4403_v48, %v3837_v47  ;;  %v3949_v17 = vld [vmem:[%s6698_s1 + $0x928] sm:$0xf0]  ;;  %v4016_v47 = vor.u32 %v4447_v37, %v4013_v38  ;;  %v4463_v37 = vld [vmem:[%s6700_s3] sm:$0xff] }
 0x128   :  { %2503 = vmatpush.bf16.msrb.mxu0 %v3744_v36  ;;  %v6546_v14 = vpop.f32.mrf.mxu2  ;;  %v3952_v25 = vor.u32 %v4431_v13, %v3949_v17  ;;  %v2247_v53 = vpop.f32.mrf.mxu0  ;;  %v3933_v48 = vld [vmem:[%s6698_s1 + $0x908] sm:$0xf0]  ;;  %v4485_v13 = vld [vmem:[#allocation1 + $0x1b] sm:$0xff] }
 0x129   :  { %2510 = vmatpush.bf16.msrb.mxu1 %v3856_v28  ;;  %v6554_v44 = vpop.f32.mrf.mxu3  ;;  %v3813_v28 = vld [vmem:[%s6698_s1 + $0x818] sm:$0xf0]  ;;  %v2260_v34 = vpop.f32.mrf.mxu1  ;;  %v4468_v10 = vld [vmem:[%s6700_s3 + $0x28] sm:$0xff]  ;;  %v4467_v17 = vld [vmem:[%s6700_s3 + $0x20] sm:$0xff] }
 0x12a   :  { %2523 = vmatpush.bf16.msrb.mxu2 %v3920_v30  ;;  %v3877_v30 = vld [vmem:[%s6698_s1 + $0x898] sm:$0xf0]  ;;  %v3816_v36 = vor.u32 %v4397_v27, %v3813_v28  ;;  %v4465_v28 = vld [vmem:[%s6700_s3 + $0x10] sm:$0xff] }
 0x12b   :  { %2536 = vmatpush.bf16.msrb.mxu3 %v3984_v31  ;;  %2504 = vmatmul.bf16.vlgmr.msrb.gmra.mxu0 %v5405_v49  ;;  %v4451_v49 = vld [vmem:[%s6698_s1 + $0x9c4] sm:$0xf]  ;;  %v4429_v31 = vld [vmem:[%s6698_s1 + $0x914] sm:$0xf]  ;;  %v3880_v39 = vor.u32 %v4413_v29, %v3877_v30 }
 0x12c   :  { %2548 = vmatpush.bf16.msra.mxu0 %v4056_v40  ;;  %v4032_v18 = vor.u32 %v4451_v49, %v4029_v3  ;;  %v3944_v40 = vor.u32 %v4429_v31, %v3941_v32  ;;  %v2207_v49 = vadd.f32 %v6301_v7, %v2194_v15  ;;  %v4482_v3 = vld [vmem:[#allocation1] sm:$0xff] }
 0x12d   :  { %2511 = vmatpush.bf16.msrb.mxu1 %v3848_v46  ;;  %v4395_v46 = vld [vmem:[%s6698_s1 + $0x804] sm:$0xf] }
 0x12e   :  { %2524 = vmatpush.bf16.msrb.mxu2 %v3912_v43  ;;  %v3869_v43 = vld [vmem:[%s6698_s1 + $0x888] sm:$0xf0]  ;;  %v3808_v57 = vor.u32 %v4395_v46, %v3805_v41  ;;  %v2220_v8 = vadd.f32 %v6342_v22, %v2207_v49  ;;  %v4486_v22 = vld [vmem:[%s6699_s2] sm:$0x3]  ;;  %s2761_s2 = sshll.u32 %s4541_s9, 4  ;;  %s2762_s2 = int_to_ptr.vmem [resolvable:$true] %s2761_s2 }
 0x12f   :  { %2537 = vmatpush.bf16.msrb.mxu3 %v3976_v45  ;;  %v4427_v45 = vld [vmem:[%s6698_s1 + $0x904] sm:$0xf]  ;;  %v3872_v60 = vor.u32 %v4411_v42, %v3869_v43 }
 0x130   :  { %2549 = vmatpush.bf16.msra.mxu0 %v4048_v58  ;;  %v2273_v56 = vpop.f32.mrf.mxu2  ;;  %v4445_v58 = vld [vmem:[%s6698_s1 + $0x994] sm:$0xf]  ;;  %v3936_v12 = vor.u32 %v4427_v45, %v3933_v48  ;;  %v2233_v7 = vadd.f32 %v6350_v33, %v2220_v8  ;;  %v4466_v33 = vld [vmem:[%s6700_s3 + $0x18] sm:$0xff] }
 0x131   :  { %2512 = vmatpush.bf16.msrb.mxu1 %v3840_v59  ;;  %v4005_v59 = vld [vmem:[%s6698_s1 + $0x998] sm:$0xf0] }
 0x132   :  { %2525 = vmatpush.bf16.msrb.mxu2 %v3904_v16  ;;  %v2286_v16 = vpop.f32.mrf.mxu3  ;;  %v4008_v63 = vor.u32 %v4445_v58, %v4005_v59  ;;  %v2246_v23 = vadd.f32 %v6508_v26, %v2233_v7  ;;  %v4487_v26 = vld [vmem:[#allocation1 + $0x24] sm:$0xff] }
 0x133   :  { %2538 = vmatpush.bf16.msrb.mxu3 %v3968_v61  ;;  %v2297_v61 = vpop.f32.mrf.mxu0 }
 0x134   :  { %2550 = vmatpush.bf16.msra.mxu0 %v4040_v51  ;;  %v4443_v51 = vld [vmem:[%s6698_s1 + $0x984] sm:$0xf] }
 0x135   :  { %2513 = vmatpush.bf16.msrb.mxu1 %v3832_v1  ;;  %v3997_v1 = vld [vmem:[%s6698_s1 + $0x988] sm:$0xf0] }
 0x136   :  { %2526 = vmatpush.bf16.msrb.mxu2 %v3896_v4  ;;  %v4000_v4 = vor.u32 %v4443_v51, %v3997_v1  ;;  %v4475_v51 = vld [vmem:[%s6700_s3 + $0x60] sm:$0xff] }
 0x137   :  { %2539 = vmatpush.bf16.msrb.mxu3 %v3960_v5  ;;  %v4483_v5 = vld [vmem:[#allocation1 + $0x9] sm:$0xff] }
 0x138   :  { %2551 = vmatpush.bf16.msra.mxu0 %v4032_v18  ;;  %v355_v18 = vperm.slane %v4486_v22, 1  ;;  %v4471_v22 = vld [vmem:[%s6700_s3 + $0x40] sm:$0xff] }
 0x139   :  { %2514 = vmatpush.bf16.msrb.mxu1 %v3824_v19 }
 0x13a   :  { %2527 = vmatpush.bf16.msrb.mxu2 %v3888_v9  ;;  %v2259_v9 = vadd.f32 %v6511_v20, %v2246_v23  ;;  %v4464_v20 = vld [vmem:[%s6700_s3 + $0x8] sm:$0xff] }
 0x13b   :  { %2540 = vmatpush.bf16.msrb.mxu3 %v3952_v25  ;;  %v2299_v11 = vpop.f32.mrf.mxu0 }
 0x13c   :  { %2552 = vmatpush.bf16.msra.mxu0 %v4024_v35  ;;  %v2272_v25 = vadd.f32 %v6546_v14, %v2259_v9 }
 0x13d   :  { %2515 = vmatpush.bf16.msrb.mxu1 %v3816_v36 }
 0x13e   :  { %2528 = vmatpush.bf16.msrb.mxu2 %v3880_v39  ;;  %v2285_v34 = vadd.f32 %v6554_v44, %v2272_v25 }
 0x13f   :  { %2541 = vmatpush.bf16.msrb.mxu3 %v3944_v40 }
 0x140   :  { %2553 = vmatpush.bf16.msra.mxu0 %v4016_v47  ;;  %v2298_v35 = vadd.f32 %v2297_v61, %v2285_v34 }
 0x141   :  { %2516 = vmatpush.bf16.msrb.mxu1 %v3808_v57  ;;  %v2310_v19 = vpop.f32.mrf.mxu1 }
 0x142   :  { %2529 = vmatpush.bf16.msrb.mxu2 %v3872_v60  ;;  %v2311_v24 = vadd.f32 %v2310_v19, %v355_v18  ;;  %v6659_v40 = vmax.f32 %v2298_v35, 0.0 }
 0x143   :  { %2542 = vmatpush.bf16.msrb.mxu3 %v3936_v12 }
 0x144   :  { %2554 = vmatpush.bf16.msra.mxu0 %v4008_v63  ;;  %2517 = vmatmul.bf16.vlgmr.msrb.gmra.mxu1 %v4482_v3  ;;  %v2583_v44 = vpack.c.bf16 %v6659_v40, %v6659_v40 }
 0x145   :  { %2567 = vmatpush.bf16.msra.mxu1 %v4072_v55  ;;  %2530 = vmatmul.bf16.vlgmr.msrb.gmra.mxu2 %v4483_v5  ;;  %v4477_v55 = vld [vmem:[%s6700_s3 + $0x70] sm:$0xff] }
 0x146   :  { %2717 = vmatpush.bf16.msra.mxu2 %v4470_v62  ;;  %2543 = vmatmul.bf16.vlgmr.msrb.gmra.mxu3 %v4484_v6  ;;  %v4478_v62 = vld [vmem:[%s6700_s3 + $0x78] sm:$0xff]  ;;  %v4473_v5 = vld [vmem:[%s6700_s3 + $0x50] sm:$0xff] }
 0x147   :  { %2730 = vmatpush.bf16.msra.mxu3 %v4478_v62 }
 0x148   :  { %2555 = vmatpush.bf16.msra.mxu0 %v4000_v4  ;;  %v2323_v27 = vpop.f32.mrf.mxu2  ;;  %v2349_v30 = vpop.f32.mrf.mxu0 }
 0x149   :  { %2568 = vmatpush.bf16.msra.mxu1 %v4064_v2  ;;  %v2324_v29 = vadd.f32 %v2323_v27, %v2311_v24  ;;  %v2336_v53 = vpop.f32.mrf.mxu3  ;;  %v2312_v31 = vpop.f32.mrf.mxu1 }
 0x14a   :  { %2718 = vmatpush.bf16.msra.mxu2 %v4469_v21  ;;  %v4474_v21 = vld [vmem:[%s6700_s3 + $0x58] sm:$0xff] }
 0x14b   :  { %2556 = vmatmul.bf16.vlgmr.msra.gmra.mxu0 %v4485_v13  ;;  %v2337_v32 = vadd.f32 %v2336_v53, %v2324_v29  ;;  %2731 = vmatpush.bf16.msra.mxu3 %v4477_v55 }
 0x14d   :  { %v2350_v14 = vadd.f32 %v2349_v30, %v2337_v32 }
 0x14e   :  { %2719 = vmatpush.bf16.msra.mxu2 %v4468_v10  ;;  %v4472_v10 = vld [vmem:[%s6700_s3 + $0x48] sm:$0xff]  ;;  %s4540_s3 = smov [#allocation2]  }
 0x14f   :  { %2732 = vmatpush.bf16.msra.mxu3 %v4476_v50  ;;  %s2750_s27 = sshll.u32 %s4540_s3, 4  ;;  %s2751_s27 = int_to_ptr.vmem [resolvable:$true] %s2750_s27 }
 0x150   :  { %v2325_v36 = vpop.f32.mrf.mxu2  ;;  %v2351_v39 = vpop.f32.mrf.mxu0 }
 0x151   :  { %v2338_v38 = vpop.f32.mrf.mxu3 }
 0x152   :  { %2720 = vmatpush.bf16.msra.mxu2 %v4467_v17 }
 0x153   :  { %2733 = vmatpush.bf16.msra.mxu3 %v4475_v51 }
 0x154   :  { %4074 = vmatmul.msk.bf16.vlgmr.msra.gmra.mxu1 %vm2025_vm0, %v4487_v26 }
 0x156   :  { %2721 = vmatpush.bf16.msra.mxu2 %v4466_v33 }
 0x157   :  { %2734 = vmatpush.bf16.msra.mxu3 %v4474_v21 }
 0x15a   :  { %2722 = vmatpush.bf16.msra.mxu2 %v4465_v28 }
 0x15b   :  { %2735 = vmatpush.bf16.msra.mxu3 %v4473_v5 }
 0x15e   :  { %2723 = vmatpush.bf16.msra.mxu2 %v4464_v20 }
 0x15f   :  { %2736 = vmatpush.bf16.msra.mxu3 %v4472_v10 }
 0x161   :  { %v2362_v46 = vpop.f32.mrf.mxu1 }
 0x162   :  { %2724 = vmatpush.bf16.msra.mxu2 %v4463_v37  ;;  %v2363_v41 = vadd.f32 %v2362_v46, %v2350_v14 }
 0x163   :  { %2737 = vmatpush.bf16.msra.mxu3 %v4471_v22 }
 0x165   :  { %2725 = vmatmul.bf16.vlgmr.msra.gmra.mxu2 %v2583_v44 }
 0x168   :  { %v2375_v42 = vpop.f32.mrf.mxu2  ;;  %v2401_v48 = vpop.f32.mrf.mxu0 }
 0x169   :  { %v2376_v43 = vadd.f32 %v2375_v42, %v2363_v41  ;;  %v2388_v45 = vpop.f32.mrf.mxu3  ;;  %v2364_v52 = vpop.f32.mrf.mxu1  ;;  %v4481_v42 = vld [vmem:[%s6701_s4] ss:$0 sm:$0xff] }
 0x16b   :  { %v2389_v47 = vadd.f32 %v2388_v45, %v2376_v43 }
 0x16d   :  { %v2402_v54 = vadd.f32 %v2401_v48, %v2389_v47 }
 0x170   :  { %v2377_v56 = vpop.f32.mrf.mxu2  ;;  %v2403_v58 = vpop.f32.mrf.mxu0 }
 0x171   :  { %v2390_v57 = vpop.f32.mrf.mxu3 }
 0x181   :  { %v2414_v59 = vpop.f32.mrf.mxu1 }
 0x182   :  { %v2415_v6 = vadd.f32 %v2414_v59, %v2402_v54 }
 0x188   :  { %v2427_v60 = vpop.f32.mrf.mxu2  ;;  %v2453_v16 = vpop.f32.mrf.mxu0 }
 0x189   :  { %v2440_v12 = vpop.f32.mrf.mxu3  ;;  %v2416_v61 = vpop.f32.mrf.mxu1  ;;  %v2428_v8 = vadd.f32 %v2427_v60, %v2415_v6 }
 0x18b   :  { %v2441_v17 = vadd.f32 %v2440_v12, %v2428_v8 }
 0x18d   :  { %v2454_v18 = vadd.f32 %v2453_v16, %v2441_v17 }
 0x190   :  { %v2429_v15 = vpop.f32.mrf.mxu2  ;;  %v2455_v0 = vpop.f32.mrf.mxu0 }
 0x191   :  { %v2442_v63 = vpop.f32.mrf.mxu3 }
 0x1a1   :  { %v2466_v1 = vpop.f32.mrf.mxu1 }
 0x1a2   :  { %v2467_v19 = vadd.f32 %v2466_v1, %v2454_v18 }
 0x1a8   :  { %v2479_v2 = vpop.f32.mrf.mxu2  ;;  %v2505_v3 = vpop.f32.mrf.mxu0 }
 0x1a9   :  { %v2492_v49 = vpop.f32.mrf.mxu3  ;;  %v2468_v4 = vpop.f32.mrf.mxu1  ;;  %v2480_v23 = vadd.f32 %v2479_v2, %v2467_v19 }
 0x1ab   :  { %v2493_v33 = vadd.f32 %v2492_v49, %v2480_v23 }
 0x1ad   :  { %v2506_v9 = vadd.f32 %v2505_v3, %v2493_v33 }
 0x1b0   :  { %v2481_v11 = vpop.f32.mrf.mxu2  ;;  %v2507_v13 = vpop.f32.mrf.mxu0 }
 0x1b1   :  { %v2494_v7 = vpop.f32.mrf.mxu3 }
 0x1c1   :  { %v2518_v24 = vpop.f32.mrf.mxu1 }
 0x1c2   :  { %v2519_v25 = vadd.f32 %v2518_v24, %v2506_v9 }
 0x1c8   :  { %v2531_v27 = vpop.f32.mrf.mxu2  ;;  %v2557_v53 = vpop.f32.mrf.mxu0 }
 0x1c9   :  { %v2544_v28 = vpop.f32.mrf.mxu3  ;;  %v2532_v29 = vadd.f32 %v2531_v27, %v2519_v25  ;;  %v2520_v30 = vpop.f32.mrf.mxu1 }
 0x1cb   :  { %v2545_v26 = vadd.f32 %v2544_v28, %v2532_v29 }
 0x1cd   :  { %v2558_v31 = vadd.f32 %v2557_v53, %v2545_v26 }
 0x1d0   :  { %v2533_v32 = vpop.f32.mrf.mxu2  ;;  %v2559_v20 = vpop.f32.mrf.mxu0 }
 0x1d1   :  { %v2546_v34 = vpop.f32.mrf.mxu3  ;;  %v2570_v14 = vpop.f32.mrf.mxu1 }
 0x1d2   :  { %v2571_v35 = vadd.f32 %v2570_v14, %v2558_v31 }
 0x1d4   :  { %v2575_v36 = vmax.f32 %v2571_v35, 0.0 }
 0x1d6   :  { %v2578_v37 = vrot.slane %v2575_v36, 6  ;;  %v2584_v38 = vpack.c.bf16 %v2575_v36, %v2575_v36 }
 0x1d8   :  { %2738 = vmatmul.bf16.vlgmr.msra.gmra.mxu3 %v2584_v38  ;;  %v2580_v39 = vsel %vm2579_vm1, %v6659_v40, %v2578_v37 }
 0x1d9   :  { %v2572_v44 = vpop.f32.mrf.mxu1  ;;  %2582 = vst [vmem:[#allocation2] sm:$0xf] %v2580_v39 }
 0x1da   :  { %2755 = dma.vmem_to_hbm [thread:$0]  %s2751_s27, 64, %s2753_s30, [#allocation3]  }
 0x1e8   :  { %v2726_v46 = vpop.f32.mrf.mxu2 }
 0x1e9   :  { %v2727_v40 = vadd.f32 %v4481_v42, %v2726_v46 }
 0x1f0   :  { %v2728_v41 = vpop.f32.mrf.mxu2 }
 0x25b   :  { %v2739_v43 = vpop.f32.mrf.mxu3 }
 0x25c   :  { %v2740_v45 = vadd.f32 %v2739_v43, %v2727_v40 }
 0x25e   :  { %2744 = vst.msk [vmem:[#allocation4] sm:$0x3] %vm2743_vm2, %v2740_v45 }
 0x25f   :  { %2766 = dma.vmem_to_hbm [thread:$0]  %s2762_s2, 32, %s2764_s12, [#allocation5]  }
 0x263   :  { %v2741_v48 = vpop.f32.mrf.mxu3 }
 0x264   :  { %4536 = dma.done.wait [#allocation3], 64  }
 0x265   :  { %4537 = vsyncadd [#allocation3], 4294967232 }
 0x266   :  { %4538 = dma.done.wait [#allocation5], 32  }
 0x267   :  { %4539 = vsyncadd [#allocation5], 4294967264 }
 0x268   :  { %2775 = vsyncpa [#allocation3], 1 }
 0x269   :  { %2776 = vsyncpa [#allocation5], 1 }

</bundles_post_ra>
